<compile_context>
chip_gen: v5e
topology: v5e:2x2
jax: 0.10.0
libtpu: 0.0.40
codegen_flags: <defaults>
</compile_context>

<pallas_src>
import functools
import math

import jax
import jax.numpy as jnp
from jax import lax
from jax.experimental import pallas as pl
from jax.experimental.pallas import tpu as pltpu

LEAKY_SLOPE = 0.01      # nn.LeakyReLU default negative_slope
LN_EPS = 1e-5           # nn.LayerNorm default eps
LOG10 = math.log(10.0)  # exponent in _scaled_sigmoid


# ----------------------------------------------------------------------------
# Shared math helpers (used inside the kernel and in the pure-JAX reference).
# ----------------------------------------------------------------------------
def _linear_ln_lrelu(x, w, b, g, beta):
    """Linear -> LayerNorm(last dim) -> LeakyReLU, matching torch semantics."""
    y = jnp.dot(x, w, preferred_element_type=jnp.float32) + b
    mu = jnp.mean(y, axis=-1, keepdims=True)
    var = jnp.mean((y - mu) ** 2, axis=-1, keepdims=True)   # biased variance
    y = (y - mu) * lax.rsqrt(var + LN_EPS)
    y = y * g + beta
    return jnp.where(y >= 0.0, y, LEAKY_SLOPE * y)


def _scaled_sigmoid(x):
    """2 * sigmoid(x)**log(10) + 1e-18 (always positive)."""
    s = jax.nn.sigmoid(x)
    return 2.0 * jnp.exp(LOG10 * jnp.log(s)) + 1e-18


# ----------------------------------------------------------------------------
# Parameter packing: all 1-D bias / LN-gamma / LN-beta vectors go into one
# (n_vecs, max_width) f32 array (rows zero-padded to max_width).
# ----------------------------------------------------------------------------
VEC_NAMES = (
    "bb1", "gb1", "ab1",
    "bb2", "gb2", "ab2",
    "bb3", "gb3", "ab3",
    "bih", "bhh",
    "bm1", "gm1", "am1",
    "bm2", "gm2", "am2",
    "bm3", "gm3", "am3",
    "bo",
)

WEIGHT_ORDER = ("wb1", "wb2", "wb3", "wih", "whh", "wm1", "wm2", "wm3", "wo")


def _pack_vectors(params):
    widths = {n: int(params[n].shape[-1]) for n in VEC_NAMES}
    vmax = max(widths.values())
    rows, slots = [], {}
    for i, n in enumerate(VEC_NAMES):
        w = widths[n]
        v = params[n].reshape(1, w).astype(jnp.float32)
        rows.append(jnp.pad(v, ((0, 0), (0, vmax - w))))
        slots[n] = (i, w)
    return jnp.concatenate(rows, axis=0), slots


# ----------------------------------------------------------------------------
# Pallas kernel: bottleneck MLP -> (hoisted gi matmul) -> GRU recurrence ->
# inter MLP -> output head.  Everything is tiny and lives fully in VMEM.
# ----------------------------------------------------------------------------
def decoder_kernel(
    z_ref,                                   # (T*B, L)   time-major, 2D
    wb1, wb2, wb3,                           # bottleneck weights
    wih, whh,                                # GRU weights ([r|z|n] packed)
    wm1, wm2, wm3,                           # inter MLP weights
    wo,                                      # output Linear weight
    vecs_ref,                                # (n_vecs, vmax) packed vectors
    out_ref,                                 # (T*B, n_bands)
    gi_ref,                                  # scratch (T, B, 3H): x@Wih + bih
    hseq_ref,                                # scratch (T, B, H): GRU hidden seq
    *, vec_slots,
):
    T, B, H = hseq_ref.shape
    TB, L = z_ref.shape
    NB = wo.shape[1]

    def vec(name):
        row, w = vec_slots[name]
        return vecs_ref[row:row + 1, 0:w]    # (1, w), static slice

    # ---- input bottleneck: 3 x (Linear + LayerNorm + LeakyReLU), 2D ----
    x = z_ref[...]
    x = _linear_ln_lrelu(x, wb1[...], vec("bb1"), vec("gb1"), vec("ab1"))
    x = _linear_ln_lrelu(x, wb2[...], vec("bb2"), vec("gb2"), vec("ab2"))
    x = _linear_ln_lrelu(x, wb3[...], vec("bb3"), vec("gb3"), vec("ab3"))

    # ---- hoisted input-to-hidden GRU matmul for all timesteps ----
    gi_all = jnp.dot(x, wih[...], preferred_element_type=jnp.float32) + vec("bih")
    gi_ref[...] = gi_all.reshape(T, B, 3 * H)

    # ---- GRU recurrence (zero initial state); only h @ W_hh per step ----
    w_hh = whh[...]
    b_hh = vec("bhh")

    def gru_step(t, h):
        gi = gi_ref[t]                                               # (B, 3H)
        gh = jnp.dot(h, w_hh, preferred_element_type=jnp.float32) + b_hh
        r = jax.nn.sigmoid(gi[:, 0:H] + gh[:, 0:H])
        u = jax.nn.sigmoid(gi[:, H:2 * H] + gh[:, H:2 * H])
        n = jnp.tanh(gi[:, 2 * H:3 * H] + r * gh[:, 2 * H:3 * H])
        h_new = (1.0 - u) * n + u * h
        hseq_ref[t] = h_new
        return h_new

    h0 = jnp.zeros((B, H), jnp.float32)
    if T <= 32:
        # Full unroll at trace time -> scheduler sees across iterations.
        h = h0
        for t in range(T):
            h = gru_step(t, h)
    else:
        lax.fori_loop(0, T, gru_step, h0, unroll=8)

    hs = hseq_ref[...].reshape(T * B, H)

    # ---- inter MLP: 3 x (Linear + LayerNorm + LeakyReLU), 2D ----
    y = _linear_ln_lrelu(hs, wm1[...], vec("bm1"), vec("gm1"), vec("am1"))
    y = _linear_ln_lrelu(y, wm2[...], vec("bm2"), vec("gm2"), vec("am2"))
    y = _linear_ln_lrelu(y, wm3[...], vec("bm3"), vec("gm3"), vec("am3"))

    # ---- output projection + scaled sigmoid (lane-dense (T*B, NB) store) ----
    o = jnp.dot(y, wo[...], preferred_element_type=jnp.float32) + vec("bo")
    out_ref[...] = _scaled_sigmoid(o)


def decoder_forward(z_btl, params):
    """z_btl: (B, T, latent) -> (B, n_bands, T), matching torch Decoder.forward."""
    B, T, L = z_btl.shape
    H = params["wih"].shape[0]
    NB = params["wo"].shape[1]

    # Glue: go time-major + flatten to dense 2D (T*B, L) rows (t-major, b-minor).
    z2d = jnp.transpose(z_btl, (1, 0, 2)).reshape(T * B, L)
    vecs, slots = _pack_vectors(params)
    weights = [params[k] for k in WEIGHT_ORDER]

    kernel = functools.partial(decoder_kernel, vec_slots=slots)

    out2d = pl.pallas_call(
        kernel,
        out_shape=jax.ShapeDtypeStruct((T * B, NB), jnp.float32),
        in_specs=[pl.BlockSpec(memory_space=pltpu.MemorySpace.VMEM)]
        * (1 + len(weights) + 1),
        out_specs=pl.BlockSpec(memory_space=pltpu.MemorySpace.VMEM),
        scratch_shapes=[
            pltpu.VMEM((T, B, 3 * H), jnp.float32),   # hoisted gi sequence
            pltpu.VMEM((T, B, H), jnp.float32),       # GRU hidden sequence
        ],
        # No vmem_limit_bytes: whole footprint ~1 MiB, default scoped limit ok.
    )(z2d, *weights, vecs)

    # (T*B, NB) -> (T, B, NB) -> (B, NB, T)  ==  torch output.permute(0, 2, 1)
    return jnp.transpose(out2d.reshape(T, B, NB), (1, 2, 0))


# ----------------------------------------------------------------------------
# Pure-JAX reference (mirrors the PyTorch forward) for a correctness check.
# ----------------------------------------------------------------------------
def decoder_ref(z, p):
    B, T, L = z.shape
    H = p["wih"].shape[0]
    x = z.reshape(B * T, L)
    x = _linear_ln_lrelu(x, p["wb1"], p["bb1"], p["gb1"], p["ab1"])
    x = _linear_ln_lrelu(x, p["wb2"], p["bb2"], p["gb2"], p["ab2"])
    x = _linear_ln_lrelu(x, p["wb3"], p["bb3"], p["gb3"], p["ab3"])
    x = x.reshape(B, T, H)

    h = jnp.zeros((B, H), jnp.float32)
    hs = []
    for t in range(T):
        x_t = x[:, t, :]
        gi = x_t @ p["wih"] + p["bih"]
        gh = h @ p["whh"] + p["bhh"]
        r = jax.nn.sigmoid(gi[:, 0:H] + gh[:, 0:H])
        u = jax.nn.sigmoid(gi[:, H:2 * H] + gh[:, H:2 * H])
        n = jnp.tanh(gi[:, 2 * H:3 * H] + r * gh[:, 2 * H:3 * H])
        h = (1.0 - u) * n + u * h
        hs.append(h)
    hs = jnp.stack(hs, axis=1).reshape(B * T, H)

    y = _linear_ln_lrelu(hs, p["wm1"], p["bm1"], p["gm1"], p["am1"])
    y = _linear_ln_lrelu(y, p["wm2"], p["bm2"], p["gm2"], p["am2"])
    y = _linear_ln_lrelu(y, p["wm3"], p["bm3"], p["gm3"], p["am3"])
    o = _scaled_sigmoid(y @ p["wo"] + p["bo"])
    return jnp.transpose(o.reshape(B, T, -1), (0, 2, 1))


# ----------------------------------------------------------------------------
# Deterministic parameter init (shapes follow the module's __init__).
# ----------------------------------------------------------------------------
def init_params(key, latent=16, layer_sizes=(32, 64, 128), n_bands=256):
    sizes = [latent] + list(layer_sizes)
    H = layer_sizes[-1]
    keys = iter(jax.random.split(key, 18))
    p = {}

    def lin_w(k, i, o):
        return (0.1 * jax.random.normal(k, (i, o))).astype(jnp.float32)

    def lin_b(k, o):
        return (0.01 * jax.random.normal(k, (1, o))).astype(jnp.float32)

    # input bottleneck: Linear+LN+LeakyReLU for [latent]+layer_sizes
    for idx in range(3):
        i, o = sizes[idx], sizes[idx + 1]
        p[f"wb{idx + 1}"] = lin_w(next(keys), i, o)
        p[f"bb{idx + 1}"] = lin_b(next(keys), o)
        p[f"gb{idx + 1}"] = jnp.ones((1, o), jnp.float32)   # LN weight init
        p[f"ab{idx + 1}"] = jnp.zeros((1, o), jnp.float32)  # LN bias init

    # GRU(H, H), gate order [r | z | n] as in torch
    p["wih"] = lin_w(next(keys), H, 3 * H)
    p["whh"] = lin_w(next(keys), H, 3 * H)
    p["bih"] = lin_b(next(keys), 3 * H)
    p["bhh"] = lin_b(next(keys), 3 * H)

    # inter MLP: 3 x (Linear(H,H)+LN+LeakyReLU)
    for idx in range(3):
        p[f"wm{idx + 1}"] = lin_w(next(keys), H, H)
        p[f"bm{idx + 1}"] = lin_b(next(keys), H)
        p[f"gm{idx + 1}"] = jnp.ones((1, H), jnp.float32)
        p[f"am{idx + 1}"] = jnp.zeros((1, H), jnp.float32)

    # output_params: Linear(H, n_bands)
    p["wo"] = lin_w(next(keys), H, n_bands)
    p["bo"] = lin_b(next(keys), n_bands)
    return p


if __name__ == "__main__":
    B, T = 2, 8
    LATENT, LAYERS, N_BANDS = 16, (32, 64, 128), 256

    key = jax.random.PRNGKey(0)
    kz, kp = jax.random.split(key)
    params = init_params(kp, LATENT, LAYERS, N_BANDS)
    z = jax.random.normal(kz, (B, T, LATENT), jnp.float32)

    fwd = jax.jit(decoder_forward)
    out = jax.block_until_ready(fwd(z, params))

    ref = jax.block_until_ready(decoder_ref(z, params))
    assert out.shape == (B, N_BANDS, T), out.shape
    max_err = float(jnp.max(jnp.abs(out - ref)))
    assert jnp.allclose(out, ref, rtol=1e-4, atol=1e-4), max_err

    print("KERNEL_OK")
</pallas_src>

<mosaic_0001>
module attributes {stable_mosaic.version = 11 : i64} {
  func.func @decoder_kernel(%arg0: memref<16x16xf32, #tpu.memory_space<vmem>>, %arg1: memref<16x32xf32, #tpu.memory_space<vmem>>, %arg2: memref<32x64xf32, #tpu.memory_space<vmem>>, %arg3: memref<64x128xf32, #tpu.memory_space<vmem>>, %arg4: memref<128x384xf32, #tpu.memory_space<vmem>>, %arg5: memref<128x384xf32, #tpu.memory_space<vmem>>, %arg6: memref<128x128xf32, #tpu.memory_space<vmem>>, %arg7: memref<128x128xf32, #tpu.memory_space<vmem>>, %arg8: memref<128x128xf32, #tpu.memory_space<vmem>>, %arg9: memref<128x256xf32, #tpu.memory_space<vmem>>, %arg10: memref<21x384xf32, #tpu.memory_space<vmem>>, %arg11: memref<16x256xf32, #tpu.memory_space<vmem>>, %arg12: memref<8x2x384xf32, #tpu.memory_space<vmem>>, %arg13: memref<8x2x128xf32, #tpu.memory_space<vmem>>) attributes {dimension_semantics = [], scalar_prefetch = 0 : i64, scratch_operands = 2 : i64, tpu.core_type = #tpu.core_type<tc>} {
    %c0 = arith.constant 0 : index
    %c0_0 = arith.constant 0 : index
    %0 = vector.load %arg0[%c0, %c0_0] : memref<16x16xf32, #tpu.memory_space<vmem>>, vector<16x16xf32>
    %c0_1 = arith.constant 0 : index
    %c0_2 = arith.constant 0 : index
    %1 = vector.load %arg1[%c0_1, %c0_2] : memref<16x32xf32, #tpu.memory_space<vmem>>, vector<16x32xf32>
    %c0_3 = arith.constant 0 : index
    %c0_4 = arith.constant 0 : index
    %2 = vector.load %arg10[%c0_3, %c0_4] : memref<21x384xf32, #tpu.memory_space<vmem>>, vector<1x32xf32>
    %c1 = arith.constant 1 : index
    %c0_5 = arith.constant 0 : index
    %3 = vector.load %arg10[%c1, %c0_5] : memref<21x384xf32, #tpu.memory_space<vmem>>, vector<1x32xf32>
    %c2 = arith.constant 2 : index
    %c0_6 = arith.constant 0 : index
    %4 = vector.load %arg10[%c2, %c0_6] : memref<21x384xf32, #tpu.memory_space<vmem>>, vector<1x32xf32>
    %cst = arith.constant dense<0.000000e+00> : vector<16x32xf32>
    %5 = tpu.matmul %0, %1, %cst {dimension_numbers = #tpu.dot_dimension_numbers<[1], [0], [0], [1], [0, 0, 1, 1], [], []>} : vector<16x16xf32>, vector<16x32xf32>, vector<16x32xf32> -> vector<16x32xf32>
    %6 = vector.broadcast %2 : vector<1x32xf32> to vector<16x32xf32>
    %7 = arith.addf %5, %6 : vector<16x32xf32>
    %cst_7 = arith.constant dense<0.000000e+00> : vector<16xf32>
    %8 = vector.multi_reduction <add>, %7, %cst_7 [1] : vector<16x32xf32> to vector<16xf32>
    %9 = vector.shape_cast %8 : vector<16xf32> to vector<16x1xf32>
    %cst_8 = arith.constant 3.200000e+01 : f32
    %10 = vector.broadcast %cst_8 : f32 to vector<16x1xf32>
    %11 = arith.divf %9, %10 : vector<16x1xf32>
    %12 = vector.broadcast %11 : vector<16x1xf32> to vector<16x32xf32>
    %13 = arith.subf %7, %12 : vector<16x32xf32>
    %14 = arith.mulf %13, %13 : vector<16x32xf32>
    %cst_9 = arith.constant dense<0.000000e+00> : vector<16xf32>
    %15 = vector.multi_reduction <add>, %14, %cst_9 [1] : vector<16x32xf32> to vector<16xf32>
    %16 = vector.shape_cast %15 : vector<16xf32> to vector<16x1xf32>
    %cst_10 = arith.constant 3.200000e+01 : f32
    %17 = vector.broadcast %cst_10 : f32 to vector<16x1xf32>
    %18 = arith.divf %16, %17 : vector<16x1xf32>
    %19 = vector.broadcast %11 : vector<16x1xf32> to vector<16x32xf32>
    %20 = arith.subf %7, %19 : vector<16x32xf32>
    %cst_11 = arith.constant 9.99999974E-6 : f32
    %21 = vector.broadcast %cst_11 : f32 to vector<16x1xf32>
    %22 = arith.addf %18, %21 : vector<16x1xf32>
    %23 = math.rsqrt %22 : vector<16x1xf32>
    %24 = vector.broadcast %23 : vector<16x1xf32> to vector<16x32xf32>
    %25 = arith.mulf %20, %24 : vector<16x32xf32>
    %26 = vector.broadcast %3 : vector<1x32xf32> to vector<16x32xf32>
    %27 = arith.mulf %25, %26 : vector<16x32xf32>
    %28 = vector.broadcast %4 : vector<1x32xf32> to vector<16x32xf32>
    %29 = arith.addf %27, %28 : vector<16x32xf32>
    %cst_12 = arith.constant 0.000000e+00 : f32
    %30 = vector.broadcast %cst_12 : f32 to vector<16x32xf32>
    %31 = arith.cmpf oge, %29, %30 : vector<16x32xf32>
    %cst_13 = arith.constant 0.00999999977 : f32
    %32 = vector.broadcast %cst_13 : f32 to vector<16x32xf32>
    %33 = arith.mulf %32, %29 : vector<16x32xf32>
    %34 = arith.select %31, %29, %33 : vector<16x32xi1>, vector<16x32xf32>
    %c0_14 = arith.constant 0 : index
    %c0_15 = arith.constant 0 : index
    %35 = vector.load %arg2[%c0_14, %c0_15] : memref<32x64xf32, #tpu.memory_space<vmem>>, vector<32x64xf32>
    %c3 = arith.constant 3 : index
    %c0_16 = arith.constant 0 : index
    %36 = vector.load %arg10[%c3, %c0_16] : memref<21x384xf32, #tpu.memory_space<vmem>>, vector<1x64xf32>
    %c4 = arith.constant 4 : index
    %c0_17 = arith.constant 0 : index
    %37 = vector.load %arg10[%c4, %c0_17] : memref<21x384xf32, #tpu.memory_space<vmem>>, vector<1x64xf32>
    %c5 = arith.constant 5 : index
    %c0_18 = arith.constant 0 : index
    %38 = vector.load %arg10[%c5, %c0_18] : memref<21x384xf32, #tpu.memory_space<vmem>>, vector<1x64xf32>
    %cst_19 = arith.constant dense<0.000000e+00> : vector<16x64xf32>
    %39 = tpu.matmul %34, %35, %cst_19 {dimension_numbers = #tpu.dot_dimension_numbers<[1], [0], [0], [1], [0, 0, 1, 1], [], []>} : vector<16x32xf32>, vector<32x64xf32>, vector<16x64xf32> -> vector<16x64xf32>
    %40 = vector.broadcast %36 : vector<1x64xf32> to vector<16x64xf32>
    %41 = arith.addf %39, %40 : vector<16x64xf32>
    %cst_20 = arith.constant dense<0.000000e+00> : vector<16xf32>
    %42 = vector.multi_reduction <add>, %41, %cst_20 [1] : vector<16x64xf32> to vector<16xf32>
    %43 = vector.shape_cast %42 : vector<16xf32> to vector<16x1xf32>
    %cst_21 = arith.constant 6.400000e+01 : f32
    %44 = vector.broadcast %cst_21 : f32 to vector<16x1xf32>
    %45 = arith.divf %43, %44 : vector<16x1xf32>
    %46 = vector.broadcast %45 : vector<16x1xf32> to vector<16x64xf32>
    %47 = arith.subf %41, %46 : vector<16x64xf32>
    %48 = arith.mulf %47, %47 : vector<16x64xf32>
    %cst_22 = arith.constant dense<0.000000e+00> : vector<16xf32>
    %49 = vector.multi_reduction <add>, %48, %cst_22 [1] : vector<16x64xf32> to vector<16xf32>
    %50 = vector.shape_cast %49 : vector<16xf32> to vector<16x1xf32>
    %cst_23 = arith.constant 6.400000e+01 : f32
    %51 = vector.broadcast %cst_23 : f32 to vector<16x1xf32>
    %52 = arith.divf %50, %51 : vector<16x1xf32>
    %53 = vector.broadcast %45 : vector<16x1xf32> to vector<16x64xf32>
    %54 = arith.subf %41, %53 : vector<16x64xf32>
    %cst_24 = arith.constant 9.99999974E-6 : f32
    %55 = vector.broadcast %cst_24 : f32 to vector<16x1xf32>
    %56 = arith.addf %52, %55 : vector<16x1xf32>
    %57 = math.rsqrt %56 : vector<16x1xf32>
    %58 = vector.broadcast %57 : vector<16x1xf32> to vector<16x64xf32>
    %59 = arith.mulf %54, %58 : vector<16x64xf32>
    %60 = vector.broadcast %37 : vector<1x64xf32> to vector<16x64xf32>
    %61 = arith.mulf %59, %60 : vector<16x64xf32>
    %62 = vector.broadcast %38 : vector<1x64xf32> to vector<16x64xf32>
    %63 = arith.addf %61, %62 : vector<16x64xf32>
    %cst_25 = arith.constant 0.000000e+00 : f32
    %64 = vector.broadcast %cst_25 : f32 to vector<16x64xf32>
    %65 = arith.cmpf oge, %63, %64 : vector<16x64xf32>
    %cst_26 = arith.constant 0.00999999977 : f32
    %66 = vector.broadcast %cst_26 : f32 to vector<16x64xf32>
    %67 = arith.mulf %66, %63 : vector<16x64xf32>
    %68 = arith.select %65, %63, %67 : vector<16x64xi1>, vector<16x64xf32>
    %c0_27 = arith.constant 0 : index
    %c0_28 = arith.constant 0 : index
    %69 = vector.load %arg3[%c0_27, %c0_28] : memref<64x128xf32, #tpu.memory_space<vmem>>, vector<64x128xf32>
    %c6 = arith.constant 6 : index
    %c0_29 = arith.constant 0 : index
    %70 = vector.load %arg10[%c6, %c0_29] : memref<21x384xf32, #tpu.memory_space<vmem>>, vector<1x128xf32>
    %c7 = arith.constant 7 : index
    %c0_30 = arith.constant 0 : index
    %71 = vector.load %arg10[%c7, %c0_30] : memref<21x384xf32, #tpu.memory_space<vmem>>, vector<1x128xf32>
    %c8 = arith.constant 8 : index
    %c0_31 = arith.constant 0 : index
    %72 = vector.load %arg10[%c8, %c0_31] : memref<21x384xf32, #tpu.memory_space<vmem>>, vector<1x128xf32>
    %cst_32 = arith.constant dense<0.000000e+00> : vector<16x128xf32>
    %73 = tpu.matmul %68, %69, %cst_32 {dimension_numbers = #tpu.dot_dimension_numbers<[1], [0], [0], [1], [0, 0, 1, 1], [], []>} : vector<16x64xf32>, vector<64x128xf32>, vector<16x128xf32> -> vector<16x128xf32>
    %74 = vector.broadcast %70 : vector<1x128xf32> to vector<16x128xf32>
    %75 = arith.addf %73, %74 : vector<16x128xf32>
    %cst_33 = arith.constant dense<0.000000e+00> : vector<16xf32>
    %76 = vector.multi_reduction <add>, %75, %cst_33 [1] : vector<16x128xf32> to vector<16xf32>
    %77 = vector.shape_cast %76 : vector<16xf32> to vector<16x1xf32>
    %cst_34 = arith.constant 1.280000e+02 : f32
    %78 = vector.broadcast %cst_34 : f32 to vector<16x1xf32>
    %79 = arith.divf %77, %78 : vector<16x1xf32>
    %80 = vector.broadcast %79 : vector<16x1xf32> to vector<16x128xf32>
    %81 = arith.subf %75, %80 : vector<16x128xf32>
    %82 = arith.mulf %81, %81 : vector<16x128xf32>
    %cst_35 = arith.constant dense<0.000000e+00> : vector<16xf32>
    %83 = vector.multi_reduction <add>, %82, %cst_35 [1] : vector<16x128xf32> to vector<16xf32>
    %84 = vector.shape_cast %83 : vector<16xf32> to vector<16x1xf32>
    %cst_36 = arith.constant 1.280000e+02 : f32
    %85 = vector.broadcast %cst_36 : f32 to vector<16x1xf32>
    %86 = arith.divf %84, %85 : vector<16x1xf32>
    %87 = vector.broadcast %79 : vector<16x1xf32> to vector<16x128xf32>
    %88 = arith.subf %75, %87 : vector<16x128xf32>
    %cst_37 = arith.constant 9.99999974E-6 : f32
    %89 = vector.broadcast %cst_37 : f32 to vector<16x1xf32>
    %90 = arith.addf %86, %89 : vector<16x1xf32>
    %91 = math.rsqrt %90 : vector<16x1xf32>
    %92 = vector.broadcast %91 : vector<16x1xf32> to vector<16x128xf32>
    %93 = arith.mulf %88, %92 : vector<16x128xf32>
    %94 = vector.broadcast %71 : vector<1x128xf32> to vector<16x128xf32>
    %95 = arith.mulf %93, %94 : vector<16x128xf32>
    %96 = vector.broadcast %72 : vector<1x128xf32> to vector<16x128xf32>
    %97 = arith.addf %95, %96 : vector<16x128xf32>
    %cst_38 = arith.constant 0.000000e+00 : f32
    %98 = vector.broadcast %cst_38 : f32 to vector<16x128xf32>
    %99 = arith.cmpf oge, %97, %98 : vector<16x128xf32>
    %cst_39 = arith.constant 0.00999999977 : f32
    %100 = vector.broadcast %cst_39 : f32 to vector<16x128xf32>
    %101 = arith.mulf %100, %97 : vector<16x128xf32>
    %102 = arith.select %99, %97, %101 : vector<16x128xi1>, vector<16x128xf32>
    %c0_40 = arith.constant 0 : index
    %c0_41 = arith.constant 0 : index
    %103 = vector.load %arg4[%c0_40, %c0_41] : memref<128x384xf32, #tpu.memory_space<vmem>>, vector<128x384xf32>
    %cst_42 = arith.constant dense<0.000000e+00> : vector<16x384xf32>
    %104 = tpu.matmul %102, %103, %cst_42 {dimension_numbers = #tpu.dot_dimension_numbers<[1], [0], [0], [1], [0, 0, 1, 1], [], []>} : vector<16x128xf32>, vector<128x384xf32>, vector<16x384xf32> -> vector<16x384xf32>
    %c9 = arith.constant 9 : index
    %c0_43 = arith.constant 0 : index
    %105 = vector.load %arg10[%c9, %c0_43] : memref<21x384xf32, #tpu.memory_space<vmem>>, vector<1x384xf32>
    %106 = vector.broadcast %105 : vector<1x384xf32> to vector<16x384xf32>
    %107 = arith.addf %104, %106 : vector<16x384xf32>
    %108 = vector.shape_cast %107 : vector<16x384xf32> to vector<8x2x384xf32>
    %c0_44 = arith.constant 0 : index
    %c0_45 = arith.constant 0 : index
    %c0_46 = arith.constant 0 : index
    %109 = vector.load %arg12[%c0_44, %c0_45, %c0_46] : memref<8x2x384xf32, #tpu.memory_space<vmem>>, vector<8x2x384xf32>
    tpu.vector_store %arg12[%c0_44, %c0_45, %c0_46], %108 {strides = array<i32>} : memref<8x2x384xf32, #tpu.memory_space<vmem>>, vector<8x2x384xf32>,
    %c0_47 = arith.constant 0 : index
    %c0_48 = arith.constant 0 : index
    %110 = vector.load %arg5[%c0_47, %c0_48] : memref<128x384xf32, #tpu.memory_space<vmem>>, vector<128x384xf32>
    %c10 = arith.constant 10 : index
    %c0_49 = arith.constant 0 : index
    %111 = vector.load %arg10[%c10, %c0_49] : memref<21x384xf32, #tpu.memory_space<vmem>>, vector<1x384xf32>
    %cst_50 = arith.constant 0.000000e+00 : f32
    %112 = vector.broadcast %cst_50 : f32 to vector<2x128xf32>
    %c0_51 = arith.constant 0 : index
    %c0_52 = arith.constant 0 : index
    %c0_53 = arith.constant 0 : index
    %113 = vector.load %arg12[%c0_51, %c0_52, %c0_53] : memref<8x2x384xf32, #tpu.memory_space<vmem>>, vector<1x2x384xf32>
    %114 = vector.shape_cast %113 : vector<1x2x384xf32> to vector<2x384xf32>
    %cst_54 = arith.constant dense<0.000000e+00> : vector<2x384xf32>
    %115 = tpu.matmul %112, %110, %cst_54 {dimension_numbers = #tpu.dot_dimension_numbers<[1], [0], [0], [1], [0, 0, 1, 1], [], []>} : vector<2x128xf32>, vector<128x384xf32>, vector<2x384xf32> -> vector<2x384xf32>
    %116 = vector.broadcast %111 : vector<1x384xf32> to vector<2x384xf32>
    %117 = arith.addf %115, %116 : vector<2x384xf32>
    %118 = vector.extract_strided_slice %114 {offsets = [0, 0], sizes = [2, 128], strides = [1, 1]} : vector<2x384xf32> to vector<2x128xf32>
    %119 = vector.extract_strided_slice %117 {offsets = [0, 0], sizes = [2, 128], strides = [1, 1]} : vector<2x384xf32> to vector<2x128xf32>
    %120 = arith.addf %118, %119 : vector<2x128xf32>
    %121 = arith.negf %120 : vector<2x128xf32>
    %122 = math.exp %121 : vector<2x128xf32>
    %cst_55 = arith.constant 1.000000e+00 : f32
    %123 = vector.broadcast %cst_55 : f32 to vector<2x128xf32>
    %124 = arith.addf %123, %122 : vector<2x128xf32>
    %125 = arith.divf %123, %124 : vector<2x128xf32>
    %126 = vector.extract_strided_slice %114 {offsets = [0, 128], sizes = [2, 128], strides = [1, 1]} : vector<2x384xf32> to vector<2x128xf32>
    %127 = vector.extract_strided_slice %117 {offsets = [0, 128], sizes = [2, 128], strides = [1, 1]} : vector<2x384xf32> to vector<2x128xf32>
    %128 = arith.addf %126, %127 : vector<2x128xf32>
    %129 = arith.negf %128 : vector<2x128xf32>
    %130 = math.exp %129 : vector<2x128xf32>
    %cst_56 = arith.constant 1.000000e+00 : f32
    %131 = vector.broadcast %cst_56 : f32 to vector<2x128xf32>
    %132 = arith.addf %131, %130 : vector<2x128xf32>
    %133 = arith.divf %131, %132 : vector<2x128xf32>
    %134 = vector.extract_strided_slice %114 {offsets = [0, 256], sizes = [2, 128], strides = [1, 1]} : vector<2x384xf32> to vector<2x128xf32>
    %135 = vector.extract_strided_slice %117 {offsets = [0, 256], sizes = [2, 128], strides = [1, 1]} : vector<2x384xf32> to vector<2x128xf32>
    %136 = arith.mulf %125, %135 : vector<2x128xf32>
    %137 = arith.addf %134, %136 : vector<2x128xf32>
    %138 = math.tanh %137 : vector<2x128xf32>
    %cst_57 = arith.constant 1.000000e+00 : f32
    %139 = vector.broadcast %cst_57 : f32 to vector<2x128xf32>
    %140 = arith.subf %139, %133 : vector<2x128xf32>
    %141 = arith.mulf %140, %138 : vector<2x128xf32>
    %142 = arith.mulf %133, %112 : vector<2x128xf32>
    %143 = arith.addf %141, %142 : vector<2x128xf32>
    %c0_58 = arith.constant 0 : index
    %c0_59 = arith.constant 0 : index
    %c0_60 = arith.constant 0 : index
    %144 = vector.load %arg13[%c0_58, %c0_59, %c0_60] : memref<8x2x128xf32, #tpu.memory_space<vmem>>, vector<1x2x128xf32>
    %145 = vector.shape_cast %144 : vector<1x2x128xf32> to vector<2x128xf32>
    %146 = vector.shape_cast %143 : vector<2x128xf32> to vector<1x2x128xf32>
    tpu.vector_store %arg13[%c0_58, %c0_59, %c0_60], %146 {strides = array<i32>} : memref<8x2x128xf32, #tpu.memory_space<vmem>>, vector<1x2x128xf32>,
    %c1_61 = arith.constant 1 : index
    %c0_62 = arith.constant 0 : index
    %c0_63 = arith.constant 0 : index
    %147 = vector.load %arg12[%c1_61, %c0_62, %c0_63] : memref<8x2x384xf32, #tpu.memory_space<vmem>>, vector<1x2x384xf32>
    %148 = vector.shape_cast %147 : vector<1x2x384xf32> to vector<2x384xf32>
    %cst_64 = arith.constant dense<0.000000e+00> : vector<2x384xf32>
    %149 = tpu.matmul %143, %110, %cst_64 {dimension_numbers = #tpu.dot_dimension_numbers<[1], [0], [0], [1], [0, 0, 1, 1], [], []>} : vector<2x128xf32>, vector<128x384xf32>, vector<2x384xf32> -> vector<2x384xf32>
    %150 = vector.broadcast %111 : vector<1x384xf32> to vector<2x384xf32>
    %151 = arith.addf %149, %150 : vector<2x384xf32>
    %152 = vector.extract_strided_slice %148 {offsets = [0, 0], sizes = [2, 128], strides = [1, 1]} : vector<2x384xf32> to vector<2x128xf32>
    %153 = vector.extract_strided_slice %151 {offsets = [0, 0], sizes = [2, 128], strides = [1, 1]} : vector<2x384xf32> to vector<2x128xf32>
    %154 = arith.addf %152, %153 : vector<2x128xf32>
    %155 = arith.negf %154 : vector<2x128xf32>
    %156 = math.exp %155 : vector<2x128xf32>
    %cst_65 = arith.constant 1.000000e+00 : f32
    %157 = vector.broadcast %cst_65 : f32 to vector<2x128xf32>
    %158 = arith.addf %157, %156 : vector<2x128xf32>
    %159 = arith.divf %157, %158 : vector<2x128xf32>
    %160 = vector.extract_strided_slice %148 {offsets = [0, 128], sizes = [2, 128], strides = [1, 1]} : vector<2x384xf32> to vector<2x128xf32>
    %161 = vector.extract_strided_slice %151 {offsets = [0, 128], sizes = [2, 128], strides = [1, 1]} : vector<2x384xf32> to vector<2x128xf32>
    %162 = arith.addf %160, %161 : vector<2x128xf32>
    %163 = arith.negf %162 : vector<2x128xf32>
    %164 = math.exp %163 : vector<2x128xf32>
    %cst_66 = arith.constant 1.000000e+00 : f32
    %165 = vector.broadcast %cst_66 : f32 to vector<2x128xf32>
    %166 = arith.addf %165, %164 : vector<2x128xf32>
    %167 = arith.divf %165, %166 : vector<2x128xf32>
    %168 = vector.extract_strided_slice %148 {offsets = [0, 256], sizes = [2, 128], strides = [1, 1]} : vector<2x384xf32> to vector<2x128xf32>
    %169 = vector.extract_strided_slice %151 {offsets = [0, 256], sizes = [2, 128], strides = [1, 1]} : vector<2x384xf32> to vector<2x128xf32>
    %170 = arith.mulf %159, %169 : vector<2x128xf32>
    %171 = arith.addf %168, %170 : vector<2x128xf32>
    %172 = math.tanh %171 : vector<2x128xf32>
    %cst_67 = arith.constant 1.000000e+00 : f32
    %173 = vector.broadcast %cst_67 : f32 to vector<2x128xf32>
    %174 = arith.subf %173, %167 : vector<2x128xf32>
    %175 = arith.mulf %174, %172 : vector<2x128xf32>
    %176 = arith.mulf %167, %143 : vector<2x128xf32>
    %177 = arith.addf %175, %176 : vector<2x128xf32>
    %c1_68 = arith.constant 1 : index
    %c0_69 = arith.constant 0 : index
    %c0_70 = arith.constant 0 : index
    %178 = vector.load %arg13[%c1_68, %c0_69, %c0_70] : memref<8x2x128xf32, #tpu.memory_space<vmem>>, vector<1x2x128xf32>
    %179 = vector.shape_cast %178 : vector<1x2x128xf32> to vector<2x128xf32>
    %180 = vector.shape_cast %177 : vector<2x128xf32> to vector<1x2x128xf32>
    tpu.vector_store %arg13[%c1_68, %c0_69, %c0_70], %180 {strides = array<i32>} : memref<8x2x128xf32, #tpu.memory_space<vmem>>, vector<1x2x128xf32>,
    %c2_71 = arith.constant 2 : index
    %c0_72 = arith.constant 0 : index
    %c0_73 = arith.constant 0 : index
    %181 = vector.load %arg12[%c2_71, %c0_72, %c0_73] : memref<8x2x384xf32, #tpu.memory_space<vmem>>, vector<1x2x384xf32>
    %182 = vector.shape_cast %181 : vector<1x2x384xf32> to vector<2x384xf32>
    %cst_74 = arith.constant dense<0.000000e+00> : vector<2x384xf32>
    %183 = tpu.matmul %177, %110, %cst_74 {dimension_numbers = #tpu.dot_dimension_numbers<[1], [0], [0], [1], [0, 0, 1, 1], [], []>} : vector<2x128xf32>, vector<128x384xf32>, vector<2x384xf32> -> vector<2x384xf32>
    %184 = vector.broadcast %111 : vector<1x384xf32> to vector<2x384xf32>
    %185 = arith.addf %183, %184 : vector<2x384xf32>
    %186 = vector.extract_strided_slice %182 {offsets = [0, 0], sizes = [2, 128], strides = [1, 1]} : vector<2x384xf32> to vector<2x128xf32>
    %187 = vector.extract_strided_slice %185 {offsets = [0, 0], sizes = [2, 128], strides = [1, 1]} : vector<2x384xf32> to vector<2x128xf32>
    %188 = arith.addf %186, %187 : vector<2x128xf32>
    %189 = arith.negf %188 : vector<2x128xf32>
    %190 = math.exp %189 : vector<2x128xf32>
    %cst_75 = arith.constant 1.000000e+00 : f32
    %191 = vector.broadcast %cst_75 : f32 to vector<2x128xf32>
    %192 = arith.addf %191, %190 : vector<2x128xf32>
    %193 = arith.divf %191, %192 : vector<2x128xf32>
    %194 = vector.extract_strided_slice %182 {offsets = [0, 128], sizes = [2, 128], strides = [1, 1]} : vector<2x384xf32> to vector<2x128xf32>
    %195 = vector.extract_strided_slice %185 {offsets = [0, 128], sizes = [2, 128], strides = [1, 1]} : vector<2x384xf32> to vector<2x128xf32>
    %196 = arith.addf %194, %195 : vector<2x128xf32>
    %197 = arith.negf %196 : vector<2x128xf32>
    %198 = math.exp %197 : vector<2x128xf32>
    %cst_76 = arith.constant 1.000000e+00 : f32
    %199 = vector.broadcast %cst_76 : f32 to vector<2x128xf32>
    %200 = arith.addf %199, %198 : vector<2x128xf32>
    %201 = arith.divf %199, %200 : vector<2x128xf32>
    %202 = vector.extract_strided_slice %182 {offsets = [0, 256], sizes = [2, 128], strides = [1, 1]} : vector<2x384xf32> to vector<2x128xf32>
    %203 = vector.extract_strided_slice %185 {offsets = [0, 256], sizes = [2, 128], strides = [1, 1]} : vector<2x384xf32> to vector<2x128xf32>
    %204 = arith.mulf %193, %203 : vector<2x128xf32>
    %205 = arith.addf %202, %204 : vector<2x128xf32>
    %206 = math.tanh %205 : vector<2x128xf32>
    %cst_77 = arith.constant 1.000000e+00 : f32
    %207 = vector.broadcast %cst_77 : f32 to vector<2x128xf32>
    %208 = arith.subf %207, %201 : vector<2x128xf32>
    %209 = arith.mulf %208, %206 : vector<2x128xf32>
    %210 = arith.mulf %201, %177 : vector<2x128xf32>
    %211 = arith.addf %209, %210 : vector<2x128xf32>
    %c2_78 = arith.constant 2 : index
    %c0_79 = arith.constant 0 : index
    %c0_80 = arith.constant 0 : index
    %212 = vector.load %arg13[%c2_78, %c0_79, %c0_80] : memref<8x2x128xf32, #tpu.memory_space<vmem>>, vector<1x2x128xf32>
    %213 = vector.shape_cast %212 : vector<1x2x128xf32> to vector<2x128xf32>
    %214 = vector.shape_cast %211 : vector<2x128xf32> to vector<1x2x128xf32>
    tpu.vector_store %arg13[%c2_78, %c0_79, %c0_80], %214 {strides = array<i32>} : memref<8x2x128xf32, #tpu.memory_space<vmem>>, vector<1x2x128xf32>,
    %c3_81 = arith.constant 3 : index
    %c0_82 = arith.constant 0 : index
    %c0_83 = arith.constant 0 : index
    %215 = vector.load %arg12[%c3_81, %c0_82, %c0_83] : memref<8x2x384xf32, #tpu.memory_space<vmem>>, vector<1x2x384xf32>
    %216 = vector.shape_cast %215 : vector<1x2x384xf32> to vector<2x384xf32>
    %cst_84 = arith.constant dense<0.000000e+00> : vector<2x384xf32>
    %217 = tpu.matmul %211, %110, %cst_84 {dimension_numbers = #tpu.dot_dimension_numbers<[1], [0], [0], [1], [0, 0, 1, 1], [], []>} : vector<2x128xf32>, vector<128x384xf32>, vector<2x384xf32> -> vector<2x384xf32>
    %218 = vector.broadcast %111 : vector<1x384xf32> to vector<2x384xf32>
    %219 = arith.addf %217, %218 : vector<2x384xf32>
    %220 = vector.extract_strided_slice %216 {offsets = [0, 0], sizes = [2, 128], strides = [1, 1]} : vector<2x384xf32> to vector<2x128xf32>
    %221 = vector.extract_strided_slice %219 {offsets = [0, 0], sizes = [2, 128], strides = [1, 1]} : vector<2x384xf32> to vector<2x128xf32>
    %222 = arith.addf %220, %221 : vector<2x128xf32>
    %223 = arith.negf %222 : vector<2x128xf32>
    %224 = math.exp %223 : vector<2x128xf32>
    %cst_85 = arith.constant 1.000000e+00 : f32
    %225 = vector.broadcast %cst_85 : f32 to vector<2x128xf32>
    %226 = arith.addf %225, %224 : vector<2x128xf32>
    %227 = arith.divf %225, %226 : vector<2x128xf32>
    %228 = vector.extract_strided_slice %216 {offsets = [0, 128], sizes = [2, 128], strides = [1, 1]} : vector<2x384xf32> to vector<2x128xf32>
    %229 = vector.extract_strided_slice %219 {offsets = [0, 128], sizes = [2, 128], strides = [1, 1]} : vector<2x384xf32> to vector<2x128xf32>
    %230 = arith.addf %228, %229 : vector<2x128xf32>
    %231 = arith.negf %230 : vector<2x128xf32>
    %232 = math.exp %231 : vector<2x128xf32>
    %cst_86 = arith.constant 1.000000e+00 : f32
    %233 = vector.broadcast %cst_86 : f32 to vector<2x128xf32>
    %234 = arith.addf %233, %232 : vector<2x128xf32>
    %235 = arith.divf %233, %234 : vector<2x128xf32>
    %236 = vector.extract_strided_slice %216 {offsets = [0, 256], sizes = [2, 128], strides = [1, 1]} : vector<2x384xf32> to vector<2x128xf32>
    %237 = vector.extract_strided_slice %219 {offsets = [0, 256], sizes = [2, 128], strides = [1, 1]} : vector<2x384xf32> to vector<2x128xf32>
    %238 = arith.mulf %227, %237 : vector<2x128xf32>
    %239 = arith.addf %236, %238 : vector<2x128xf32>
    %240 = math.tanh %239 : vector<2x128xf32>
    %cst_87 = arith.constant 1.000000e+00 : f32
    %241 = vector.broadcast %cst_87 : f32 to vector<2x128xf32>
    %242 = arith.subf %241, %235 : vector<2x128xf32>
    %243 = arith.mulf %242, %240 : vector<2x128xf32>
    %244 = arith.mulf %235, %211 : vector<2x128xf32>
    %245 = arith.addf %243, %244 : vector<2x128xf32>
    %c3_88 = arith.constant 3 : index
    %c0_89 = arith.constant 0 : index
    %c0_90 = arith.constant 0 : index
    %246 = vector.load %arg13[%c3_88, %c0_89, %c0_90] : memref<8x2x128xf32, #tpu.memory_space<vmem>>, vector<1x2x128xf32>
    %247 = vector.shape_cast %246 : vector<1x2x128xf32> to vector<2x128xf32>
    %248 = vector.shape_cast %245 : vector<2x128xf32> to vector<1x2x128xf32>
    tpu.vector_store %arg13[%c3_88, %c0_89, %c0_90], %248 {strides = array<i32>} : memref<8x2x128xf32, #tpu.memory_space<vmem>>, vector<1x2x128xf32>,
    %c4_91 = arith.constant 4 : index
    %c0_92 = arith.constant 0 : index
    %c0_93 = arith.constant 0 : index
    %249 = vector.load %arg12[%c4_91, %c0_92, %c0_93] : memref<8x2x384xf32, #tpu.memory_space<vmem>>, vector<1x2x384xf32>
    %250 = vector.shape_cast %249 : vector<1x2x384xf32> to vector<2x384xf32>
    %cst_94 = arith.constant dense<0.000000e+00> : vector<2x384xf32>
    %251 = tpu.matmul %245, %110, %cst_94 {dimension_numbers = #tpu.dot_dimension_numbers<[1], [0], [0], [1], [0, 0, 1, 1], [], []>} : vector<2x128xf32>, vector<128x384xf32>, vector<2x384xf32> -> vector<2x384xf32>
    %252 = vector.broadcast %111 : vector<1x384xf32> to vector<2x384xf32>
    %253 = arith.addf %251, %252 : vector<2x384xf32>
    %254 = vector.extract_strided_slice %250 {offsets = [0, 0], sizes = [2, 128], strides = [1, 1]} : vector<2x384xf32> to vector<2x128xf32>
    %255 = vector.extract_strided_slice %253 {offsets = [0, 0], sizes = [2, 128], strides = [1, 1]} : vector<2x384xf32> to vector<2x128xf32>
    %256 = arith.addf %254, %255 : vector<2x128xf32>
    %257 = arith.negf %256 : vector<2x128xf32>
    %258 = math.exp %257 : vector<2x128xf32>
    %cst_95 = arith.constant 1.000000e+00 : f32
    %259 = vector.broadcast %cst_95 : f32 to vector<2x128xf32>
    %260 = arith.addf %259, %258 : vector<2x128xf32>
    %261 = arith.divf %259, %260 : vector<2x128xf32>
    %262 = vector.extract_strided_slice %250 {offsets = [0, 128], sizes = [2, 128], strides = [1, 1]} : vector<2x384xf32> to vector<2x128xf32>
    %263 = vector.extract_strided_slice %253 {offsets = [0, 128], sizes = [2, 128], strides = [1, 1]} : vector<2x384xf32> to vector<2x128xf32>
    %264 = arith.addf %262, %263 : vector<2x128xf32>
    %265 = arith.negf %264 : vector<2x128xf32>
    %266 = math.exp %265 : vector<2x128xf32>
    %cst_96 = arith.constant 1.000000e+00 : f32
    %267 = vector.broadcast %cst_96 : f32 to vector<2x128xf32>
    %268 = arith.addf %267, %266 : vector<2x128xf32>
    %269 = arith.divf %267, %268 : vector<2x128xf32>
    %270 = vector.extract_strided_slice %250 {offsets = [0, 256], sizes = [2, 128], strides = [1, 1]} : vector<2x384xf32> to vector<2x128xf32>
    %271 = vector.extract_strided_slice %253 {offsets = [0, 256], sizes = [2, 128], strides = [1, 1]} : vector<2x384xf32> to vector<2x128xf32>
    %272 = arith.mulf %261, %271 : vector<2x128xf32>
    %273 = arith.addf %270, %272 : vector<2x128xf32>
    %274 = math.tanh %273 : vector<2x128xf32>
    %cst_97 = arith.constant 1.000000e+00 : f32
    %275 = vector.broadcast %cst_97 : f32 to vector<2x128xf32>
    %276 = arith.subf %275, %269 : vector<2x128xf32>
    %277 = arith.mulf %276, %274 : vector<2x128xf32>
    %278 = arith.mulf %269, %245 : vector<2x128xf32>
    %279 = arith.addf %277, %278 : vector<2x128xf32>
    %c4_98 = arith.constant 4 : index
    %c0_99 = arith.constant 0 : index
    %c0_100 = arith.constant 0 : index
    %280 = vector.load %arg13[%c4_98, %c0_99, %c0_100] : memref<8x2x128xf32, #tpu.memory_space<vmem>>, vector<1x2x128xf32>
    %281 = vector.shape_cast %280 : vector<1x2x128xf32> to vector<2x128xf32>
    %282 = vector.shape_cast %279 : vector<2x128xf32> to vector<1x2x128xf32>
    tpu.vector_store %arg13[%c4_98, %c0_99, %c0_100], %282 {strides = array<i32>} : memref<8x2x128xf32, #tpu.memory_space<vmem>>, vector<1x2x128xf32>,
    %c5_101 = arith.constant 5 : index
    %c0_102 = arith.constant 0 : index
    %c0_103 = arith.constant 0 : index
    %283 = vector.load %arg12[%c5_101, %c0_102, %c0_103] : memref<8x2x384xf32, #tpu.memory_space<vmem>>, vector<1x2x384xf32>
    %284 = vector.shape_cast %283 : vector<1x2x384xf32> to vector<2x384xf32>
    %cst_104 = arith.constant dense<0.000000e+00> : vector<2x384xf32>
    %285 = tpu.matmul %279, %110, %cst_104 {dimension_numbers = #tpu.dot_dimension_numbers<[1], [0], [0], [1], [0, 0, 1, 1], [], []>} : vector<2x128xf32>, vector<128x384xf32>, vector<2x384xf32> -> vector<2x384xf32>
    %286 = vector.broadcast %111 : vector<1x384xf32> to vector<2x384xf32>
    %287 = arith.addf %285, %286 : vector<2x384xf32>
    %288 = vector.extract_strided_slice %284 {offsets = [0, 0], sizes = [2, 128], strides = [1, 1]} : vector<2x384xf32> to vector<2x128xf32>
    %289 = vector.extract_strided_slice %287 {offsets = [0, 0], sizes = [2, 128], strides = [1, 1]} : vector<2x384xf32> to vector<2x128xf32>
    %290 = arith.addf %288, %289 : vector<2x128xf32>
    %291 = arith.negf %290 : vector<2x128xf32>
    %292 = math.exp %291 : vector<2x128xf32>
    %cst_105 = arith.constant 1.000000e+00 : f32
    %293 = vector.broadcast %cst_105 : f32 to vector<2x128xf32>
    %294 = arith.addf %293, %292 : vector<2x128xf32>
    %295 = arith.divf %293, %294 : vector<2x128xf32>
    %296 = vector.extract_strided_slice %284 {offsets = [0, 128], sizes = [2, 128], strides = [1, 1]} : vector<2x384xf32> to vector<2x128xf32>
    %297 = vector.extract_strided_slice %287 {offsets = [0, 128], sizes = [2, 128], strides = [1, 1]} : vector<2x384xf32> to vector<2x128xf32>
    %298 = arith.addf %296, %297 : vector<2x128xf32>
    %299 = arith.negf %298 : vector<2x128xf32>
    %300 = math.exp %299 : vector<2x128xf32>
    %cst_106 = arith.constant 1.000000e+00 : f32
    %301 = vector.broadcast %cst_106 : f32 to vector<2x128xf32>
    %302 = arith.addf %301, %300 : vector<2x128xf32>
    %303 = arith.divf %301, %302 : vector<2x128xf32>
    %304 = vector.extract_strided_slice %284 {offsets = [0, 256], sizes = [2, 128], strides = [1, 1]} : vector<2x384xf32> to vector<2x128xf32>
    %305 = vector.extract_strided_slice %287 {offsets = [0, 256], sizes = [2, 128], strides = [1, 1]} : vector<2x384xf32> to vector<2x128xf32>
    %306 = arith.mulf %295, %305 : vector<2x128xf32>
    %307 = arith.addf %304, %306 : vector<2x128xf32>
    %308 = math.tanh %307 : vector<2x128xf32>
    %cst_107 = arith.constant 1.000000e+00 : f32
    %309 = vector.broadcast %cst_107 : f32 to vector<2x128xf32>
    %310 = arith.subf %309, %303 : vector<2x128xf32>
    %311 = arith.mulf %310, %308 : vector<2x128xf32>
    %312 = arith.mulf %303, %279 : vector<2x128xf32>
    %313 = arith.addf %311, %312 : vector<2x128xf32>
    %c5_108 = arith.constant 5 : index
    %c0_109 = arith.constant 0 : index
    %c0_110 = arith.constant 0 : index
    %314 = vector.load %arg13[%c5_108, %c0_109, %c0_110] : memref<8x2x128xf32, #tpu.memory_space<vmem>>, vector<1x2x128xf32>
    %315 = vector.shape_cast %314 : vector<1x2x128xf32> to vector<2x128xf32>
    %316 = vector.shape_cast %313 : vector<2x128xf32> to vector<1x2x128xf32>
    tpu.vector_store %arg13[%c5_108, %c0_109, %c0_110], %316 {strides = array<i32>} : memref<8x2x128xf32, #tpu.memory_space<vmem>>, vector<1x2x128xf32>,
    %c6_111 = arith.constant 6 : index
    %c0_112 = arith.constant 0 : index
    %c0_113 = arith.constant 0 : index
    %317 = vector.load %arg12[%c6_111, %c0_112, %c0_113] : memref<8x2x384xf32, #tpu.memory_space<vmem>>, vector<1x2x384xf32>
    %318 = vector.shape_cast %317 : vector<1x2x384xf32> to vector<2x384xf32>
    %cst_114 = arith.constant dense<0.000000e+00> : vector<2x384xf32>
    %319 = tpu.matmul %313, %110, %cst_114 {dimension_numbers = #tpu.dot_dimension_numbers<[1], [0], [0], [1], [0, 0, 1, 1], [], []>} : vector<2x128xf32>, vector<128x384xf32>, vector<2x384xf32> -> vector<2x384xf32>
    %320 = vector.broadcast %111 : vector<1x384xf32> to vector<2x384xf32>
    %321 = arith.addf %319, %320 : vector<2x384xf32>
    %322 = vector.extract_strided_slice %318 {offsets = [0, 0], sizes = [2, 128], strides = [1, 1]} : vector<2x384xf32> to vector<2x128xf32>
    %323 = vector.extract_strided_slice %321 {offsets = [0, 0], sizes = [2, 128], strides = [1, 1]} : vector<2x384xf32> to vector<2x128xf32>
    %324 = arith.addf %322, %323 : vector<2x128xf32>
    %325 = arith.negf %324 : vector<2x128xf32>
    %326 = math.exp %325 : vector<2x128xf32>
    %cst_115 = arith.constant 1.000000e+00 : f32
    %327 = vector.broadcast %cst_115 : f32 to vector<2x128xf32>
    %328 = arith.addf %327, %326 : vector<2x128xf32>
    %329 = arith.divf %327, %328 : vector<2x128xf32>
    %330 = vector.extract_strided_slice %318 {offsets = [0, 128], sizes = [2, 128], strides = [1, 1]} : vector<2x384xf32> to vector<2x128xf32>
    %331 = vector.extract_strided_slice %321 {offsets = [0, 128], sizes = [2, 128], strides = [1, 1]} : vector<2x384xf32> to vector<2x128xf32>
    %332 = arith.addf %330, %331 : vector<2x128xf32>
    %333 = arith.negf %332 : vector<2x128xf32>
    %334 = math.exp %333 : vector<2x128xf32>
    %cst_116 = arith.constant 1.000000e+00 : f32
    %335 = vector.broadcast %cst_116 : f32 to vector<2x128xf32>
    %336 = arith.addf %335, %334 : vector<2x128xf32>
    %337 = arith.divf %335, %336 : vector<2x128xf32>
    %338 = vector.extract_strided_slice %318 {offsets = [0, 256], sizes = [2, 128], strides = [1, 1]} : vector<2x384xf32> to vector<2x128xf32>
    %339 = vector.extract_strided_slice %321 {offsets = [0, 256], sizes = [2, 128], strides = [1, 1]} : vector<2x384xf32> to vector<2x128xf32>
    %340 = arith.mulf %329, %339 : vector<2x128xf32>
    %341 = arith.addf %338, %340 : vector<2x128xf32>
    %342 = math.tanh %341 : vector<2x128xf32>
    %cst_117 = arith.constant 1.000000e+00 : f32
    %343 = vector.broadcast %cst_117 : f32 to vector<2x128xf32>
    %344 = arith.subf %343, %337 : vector<2x128xf32>
    %345 = arith.mulf %344, %342 : vector<2x128xf32>
    %346 = arith.mulf %337, %313 : vector<2x128xf32>
    %347 = arith.addf %345, %346 : vector<2x128xf32>
    %c6_118 = arith.constant 6 : index
    %c0_119 = arith.constant 0 : index
    %c0_120 = arith.constant 0 : index
    %348 = vector.load %arg13[%c6_118, %c0_119, %c0_120] : memref<8x2x128xf32, #tpu.memory_space<vmem>>, vector<1x2x128xf32>
    %349 = vector.shape_cast %348 : vector<1x2x128xf32> to vector<2x128xf32>
    %350 = vector.shape_cast %347 : vector<2x128xf32> to vector<1x2x128xf32>
    tpu.vector_store %arg13[%c6_118, %c0_119, %c0_120], %350 {strides = array<i32>} : memref<8x2x128xf32, #tpu.memory_space<vmem>>, vector<1x2x128xf32>,
    %c7_121 = arith.constant 7 : index
    %c0_122 = arith.constant 0 : index
    %c0_123 = arith.constant 0 : index
    %351 = vector.load %arg12[%c7_121, %c0_122, %c0_123] : memref<8x2x384xf32, #tpu.memory_space<vmem>>, vector<1x2x384xf32>
    %352 = vector.shape_cast %351 : vector<1x2x384xf32> to vector<2x384xf32>
    %cst_124 = arith.constant dense<0.000000e+00> : vector<2x384xf32>
    %353 = tpu.matmul %347, %110, %cst_124 {dimension_numbers = #tpu.dot_dimension_numbers<[1], [0], [0], [1], [0, 0, 1, 1], [], []>} : vector<2x128xf32>, vector<128x384xf32>, vector<2x384xf32> -> vector<2x384xf32>
    %354 = vector.broadcast %111 : vector<1x384xf32> to vector<2x384xf32>
    %355 = arith.addf %353, %354 : vector<2x384xf32>
    %356 = vector.extract_strided_slice %352 {offsets = [0, 0], sizes = [2, 128], strides = [1, 1]} : vector<2x384xf32> to vector<2x128xf32>
    %357 = vector.extract_strided_slice %355 {offsets = [0, 0], sizes = [2, 128], strides = [1, 1]} : vector<2x384xf32> to vector<2x128xf32>
    %358 = arith.addf %356, %357 : vector<2x128xf32>
    %359 = arith.negf %358 : vector<2x128xf32>
    %360 = math.exp %359 : vector<2x128xf32>
    %cst_125 = arith.constant 1.000000e+00 : f32
    %361 = vector.broadcast %cst_125 : f32 to vector<2x128xf32>
    %362 = arith.addf %361, %360 : vector<2x128xf32>
    %363 = arith.divf %361, %362 : vector<2x128xf32>
    %364 = vector.extract_strided_slice %352 {offsets = [0, 128], sizes = [2, 128], strides = [1, 1]} : vector<2x384xf32> to vector<2x128xf32>
    %365 = vector.extract_strided_slice %355 {offsets = [0, 128], sizes = [2, 128], strides = [1, 1]} : vector<2x384xf32> to vector<2x128xf32>
    %366 = arith.addf %364, %365 : vector<2x128xf32>
    %367 = arith.negf %366 : vector<2x128xf32>
    %368 = math.exp %367 : vector<2x128xf32>
    %cst_126 = arith.constant 1.000000e+00 : f32
    %369 = vector.broadcast %cst_126 : f32 to vector<2x128xf32>
    %370 = arith.addf %369, %368 : vector<2x128xf32>
    %371 = arith.divf %369, %370 : vector<2x128xf32>
    %372 = vector.extract_strided_slice %352 {offsets = [0, 256], sizes = [2, 128], strides = [1, 1]} : vector<2x384xf32> to vector<2x128xf32>
    %373 = vector.extract_strided_slice %355 {offsets = [0, 256], sizes = [2, 128], strides = [1, 1]} : vector<2x384xf32> to vector<2x128xf32>
    %374 = arith.mulf %363, %373 : vector<2x128xf32>
    %375 = arith.addf %372, %374 : vector<2x128xf32>
    %376 = math.tanh %375 : vector<2x128xf32>
    %cst_127 = arith.constant 1.000000e+00 : f32
    %377 = vector.broadcast %cst_127 : f32 to vector<2x128xf32>
    %378 = arith.subf %377, %371 : vector<2x128xf32>
    %379 = arith.mulf %378, %376 : vector<2x128xf32>
    %380 = arith.mulf %371, %347 : vector<2x128xf32>
    %381 = arith.addf %379, %380 : vector<2x128xf32>
    %c7_128 = arith.constant 7 : index
    %c0_129 = arith.constant 0 : index
    %c0_130 = arith.constant 0 : index
    %382 = vector.load %arg13[%c7_128, %c0_129, %c0_130] : memref<8x2x128xf32, #tpu.memory_space<vmem>>, vector<1x2x128xf32>
    %383 = vector.shape_cast %382 : vector<1x2x128xf32> to vector<2x128xf32>
    %384 = vector.shape_cast %381 : vector<2x128xf32> to vector<1x2x128xf32>
    tpu.vector_store %arg13[%c7_128, %c0_129, %c0_130], %384 {strides = array<i32>} : memref<8x2x128xf32, #tpu.memory_space<vmem>>, vector<1x2x128xf32>,
    %c0_131 = arith.constant 0 : index
    %c0_132 = arith.constant 0 : index
    %c0_133 = arith.constant 0 : index
    %385 = vector.load %arg13[%c0_131, %c0_132, %c0_133] : memref<8x2x128xf32, #tpu.memory_space<vmem>>, vector<8x2x128xf32>
    %386 = vector.shape_cast %385 : vector<8x2x128xf32> to vector<16x128xf32>
    %c0_134 = arith.constant 0 : index
    %c0_135 = arith.constant 0 : index
    %387 = vector.load %arg6[%c0_134, %c0_135] : memref<128x128xf32, #tpu.memory_space<vmem>>, vector<128x128xf32>
    %c11 = arith.constant 11 : index
    %c0_136 = arith.constant 0 : index
    %388 = vector.load %arg10[%c11, %c0_136] : memref<21x384xf32, #tpu.memory_space<vmem>>, vector<1x128xf32>
    %c12 = arith.constant 12 : index
    %c0_137 = arith.constant 0 : index
    %389 = vector.load %arg10[%c12, %c0_137] : memref<21x384xf32, #tpu.memory_space<vmem>>, vector<1x128xf32>
    %c13 = arith.constant 13 : index
    %c0_138 = arith.constant 0 : index
    %390 = vector.load %arg10[%c13, %c0_138] : memref<21x384xf32, #tpu.memory_space<vmem>>, vector<1x128xf32>
    %cst_139 = arith.constant dense<0.000000e+00> : vector<16x128xf32>
    %391 = tpu.matmul %386, %387, %cst_139 {dimension_numbers = #tpu.dot_dimension_numbers<[1], [0], [0], [1], [0, 0, 1, 1], [], []>} : vector<16x128xf32>, vector<128x128xf32>, vector<16x128xf32> -> vector<16x128xf32>
    %392 = vector.broadcast %388 : vector<1x128xf32> to vector<16x128xf32>
    %393 = arith.addf %391, %392 : vector<16x128xf32>
    %cst_140 = arith.constant dense<0.000000e+00> : vector<16xf32>
    %394 = vector.multi_reduction <add>, %393, %cst_140 [1] : vector<16x128xf32> to vector<16xf32>
    %395 = vector.shape_cast %394 : vector<16xf32> to vector<16x1xf32>
    %cst_141 = arith.constant 1.280000e+02 : f32
    %396 = vector.broadcast %cst_141 : f32 to vector<16x1xf32>
    %397 = arith.divf %395, %396 : vector<16x1xf32>
    %398 = vector.broadcast %397 : vector<16x1xf32> to vector<16x128xf32>
    %399 = arith.subf %393, %398 : vector<16x128xf32>
    %400 = arith.mulf %399, %399 : vector<16x128xf32>
    %cst_142 = arith.constant dense<0.000000e+00> : vector<16xf32>
    %401 = vector.multi_reduction <add>, %400, %cst_142 [1] : vector<16x128xf32> to vector<16xf32>
    %402 = vector.shape_cast %401 : vector<16xf32> to vector<16x1xf32>
    %cst_143 = arith.constant 1.280000e+02 : f32
    %403 = vector.broadcast %cst_143 : f32 to vector<16x1xf32>
    %404 = arith.divf %402, %403 : vector<16x1xf32>
    %405 = vector.broadcast %397 : vector<16x1xf32> to vector<16x128xf32>
    %406 = arith.subf %393, %405 : vector<16x128xf32>
    %cst_144 = arith.constant 9.99999974E-6 : f32
    %407 = vector.broadcast %cst_144 : f32 to vector<16x1xf32>
    %408 = arith.addf %404, %407 : vector<16x1xf32>
    %409 = math.rsqrt %408 : vector<16x1xf32>
    %410 = vector.broadcast %409 : vector<16x1xf32> to vector<16x128xf32>
    %411 = arith.mulf %406, %410 : vector<16x128xf32>
    %412 = vector.broadcast %389 : vector<1x128xf32> to vector<16x128xf32>
    %413 = arith.mulf %411, %412 : vector<16x128xf32>
    %414 = vector.broadcast %390 : vector<1x128xf32> to vector<16x128xf32>
    %415 = arith.addf %413, %414 : vector<16x128xf32>
    %cst_145 = arith.constant 0.000000e+00 : f32
    %416 = vector.broadcast %cst_145 : f32 to vector<16x128xf32>
    %417 = arith.cmpf oge, %415, %416 : vector<16x128xf32>
    %cst_146 = arith.constant 0.00999999977 : f32
    %418 = vector.broadcast %cst_146 : f32 to vector<16x128xf32>
    %419 = arith.mulf %418, %415 : vector<16x128xf32>
    %420 = arith.select %417, %415, %419 : vector<16x128xi1>, vector<16x128xf32>
    %c0_147 = arith.constant 0 : index
    %c0_148 = arith.constant 0 : index
    %421 = vector.load %arg7[%c0_147, %c0_148] : memref<128x128xf32, #tpu.memory_space<vmem>>, vector<128x128xf32>
    %c14 = arith.constant 14 : index
    %c0_149 = arith.constant 0 : index
    %422 = vector.load %arg10[%c14, %c0_149] : memref<21x384xf32, #tpu.memory_space<vmem>>, vector<1x128xf32>
    %c15 = arith.constant 15 : index
    %c0_150 = arith.constant 0 : index
    %423 = vector.load %arg10[%c15, %c0_150] : memref<21x384xf32, #tpu.memory_space<vmem>>, vector<1x128xf32>
    %c16 = arith.constant 16 : index
    %c0_151 = arith.constant 0 : index
    %424 = vector.load %arg10[%c16, %c0_151] : memref<21x384xf32, #tpu.memory_space<vmem>>, vector<1x128xf32>
    %cst_152 = arith.constant dense<0.000000e+00> : vector<16x128xf32>
    %425 = tpu.matmul %420, %421, %cst_152 {dimension_numbers = #tpu.dot_dimension_numbers<[1], [0], [0], [1], [0, 0, 1, 1], [], []>} : vector<16x128xf32>, vector<128x128xf32>, vector<16x128xf32> -> vector<16x128xf32>
    %426 = vector.broadcast %422 : vector<1x128xf32> to vector<16x128xf32>
    %427 = arith.addf %425, %426 : vector<16x128xf32>
    %cst_153 = arith.constant dense<0.000000e+00> : vector<16xf32>
    %428 = vector.multi_reduction <add>, %427, %cst_153 [1] : vector<16x128xf32> to vector<16xf32>
    %429 = vector.shape_cast %428 : vector<16xf32> to vector<16x1xf32>
    %cst_154 = arith.constant 1.280000e+02 : f32
    %430 = vector.broadcast %cst_154 : f32 to vector<16x1xf32>
    %431 = arith.divf %429, %430 : vector<16x1xf32>
    %432 = vector.broadcast %431 : vector<16x1xf32> to vector<16x128xf32>
    %433 = arith.subf %427, %432 : vector<16x128xf32>
    %434 = arith.mulf %433, %433 : vector<16x128xf32>
    %cst_155 = arith.constant dense<0.000000e+00> : vector<16xf32>
    %435 = vector.multi_reduction <add>, %434, %cst_155 [1] : vector<16x128xf32> to vector<16xf32>
    %436 = vector.shape_cast %435 : vector<16xf32> to vector<16x1xf32>
    %cst_156 = arith.constant 1.280000e+02 : f32
    %437 = vector.broadcast %cst_156 : f32 to vector<16x1xf32>
    %438 = arith.divf %436, %437 : vector<16x1xf32>
    %439 = vector.broadcast %431 : vector<16x1xf32> to vector<16x128xf32>
    %440 = arith.subf %427, %439 : vector<16x128xf32>
    %cst_157 = arith.constant 9.99999974E-6 : f32
    %441 = vector.broadcast %cst_157 : f32 to vector<16x1xf32>
    %442 = arith.addf %438, %441 : vector<16x1xf32>
    %443 = math.rsqrt %442 : vector<16x1xf32>
    %444 = vector.broadcast %443 : vector<16x1xf32> to vector<16x128xf32>
    %445 = arith.mulf %440, %444 : vector<16x128xf32>
    %446 = vector.broadcast %423 : vector<1x128xf32> to vector<16x128xf32>
    %447 = arith.mulf %445, %446 : vector<16x128xf32>
    %448 = vector.broadcast %424 : vector<1x128xf32> to vector<16x128xf32>
    %449 = arith.addf %447, %448 : vector<16x128xf32>
    %cst_158 = arith.constant 0.000000e+00 : f32
    %450 = vector.broadcast %cst_158 : f32 to vector<16x128xf32>
    %451 = arith.cmpf oge, %449, %450 : vector<16x128xf32>
    %cst_159 = arith.constant 0.00999999977 : f32
    %452 = vector.broadcast %cst_159 : f32 to vector<16x128xf32>
    %453 = arith.mulf %452, %449 : vector<16x128xf32>
    %454 = arith.select %451, %449, %453 : vector<16x128xi1>, vector<16x128xf32>
    %c0_160 = arith.constant 0 : index
    %c0_161 = arith.constant 0 : index
    %455 = vector.load %arg8[%c0_160, %c0_161] : memref<128x128xf32, #tpu.memory_space<vmem>>, vector<128x128xf32>
    %c17 = arith.constant 17 : index
    %c0_162 = arith.constant 0 : index
    %456 = vector.load %arg10[%c17, %c0_162] : memref<21x384xf32, #tpu.memory_space<vmem>>, vector<1x128xf32>
    %c18 = arith.constant 18 : index
    %c0_163 = arith.constant 0 : index
    %457 = vector.load %arg10[%c18, %c0_163] : memref<21x384xf32, #tpu.memory_space<vmem>>, vector<1x128xf32>
    %c19 = arith.constant 19 : index
    %c0_164 = arith.constant 0 : index
    %458 = vector.load %arg10[%c19, %c0_164] : memref<21x384xf32, #tpu.memory_space<vmem>>, vector<1x128xf32>
    %cst_165 = arith.constant dense<0.000000e+00> : vector<16x128xf32>
    %459 = tpu.matmul %454, %455, %cst_165 {dimension_numbers = #tpu.dot_dimension_numbers<[1], [0], [0], [1], [0, 0, 1, 1], [], []>} : vector<16x128xf32>, vector<128x128xf32>, vector<16x128xf32> -> vector<16x128xf32>
    %460 = vector.broadcast %456 : vector<1x128xf32> to vector<16x128xf32>
    %461 = arith.addf %459, %460 : vector<16x128xf32>
    %cst_166 = arith.constant dense<0.000000e+00> : vector<16xf32>
    %462 = vector.multi_reduction <add>, %461, %cst_166 [1] : vector<16x128xf32> to vector<16xf32>
    %463 = vector.shape_cast %462 : vector<16xf32> to vector<16x1xf32>
    %cst_167 = arith.constant 1.280000e+02 : f32
    %464 = vector.broadcast %cst_167 : f32 to vector<16x1xf32>
    %465 = arith.divf %463, %464 : vector<16x1xf32>
    %466 = vector.broadcast %465 : vector<16x1xf32> to vector<16x128xf32>
    %467 = arith.subf %461, %466 : vector<16x128xf32>
    %468 = arith.mulf %467, %467 : vector<16x128xf32>
    %cst_168 = arith.constant dense<0.000000e+00> : vector<16xf32>
    %469 = vector.multi_reduction <add>, %468, %cst_168 [1] : vector<16x128xf32> to vector<16xf32>
    %470 = vector.shape_cast %469 : vector<16xf32> to vector<16x1xf32>
    %cst_169 = arith.constant 1.280000e+02 : f32
    %471 = vector.broadcast %cst_169 : f32 to vector<16x1xf32>
    %472 = arith.divf %470, %471 : vector<16x1xf32>
    %473 = vector.broadcast %465 : vector<16x1xf32> to vector<16x128xf32>
    %474 = arith.subf %461, %473 : vector<16x128xf32>
    %cst_170 = arith.constant 9.99999974E-6 : f32
    %475 = vector.broadcast %cst_170 : f32 to vector<16x1xf32>
    %476 = arith.addf %472, %475 : vector<16x1xf32>
    %477 = math.rsqrt %476 : vector<16x1xf32>
    %478 = vector.broadcast %477 : vector<16x1xf32> to vector<16x128xf32>
    %479 = arith.mulf %474, %478 : vector<16x128xf32>
    %480 = vector.broadcast %457 : vector<1x128xf32> to vector<16x128xf32>
    %481 = arith.mulf %479, %480 : vector<16x128xf32>
    %482 = vector.broadcast %458 : vector<1x128xf32> to vector<16x128xf32>
    %483 = arith.addf %481, %482 : vector<16x128xf32>
    %cst_171 = arith.constant 0.000000e+00 : f32
    %484 = vector.broadcast %cst_171 : f32 to vector<16x128xf32>
    %485 = arith.cmpf oge, %483, %484 : vector<16x128xf32>
    %cst_172 = arith.constant 0.00999999977 : f32
    %486 = vector.broadcast %cst_172 : f32 to vector<16x128xf32>
    %487 = arith.mulf %486, %483 : vector<16x128xf32>
    %488 = arith.select %485, %483, %487 : vector<16x128xi1>, vector<16x128xf32>
    %c0_173 = arith.constant 0 : index
    %c0_174 = arith.constant 0 : index
    %489 = vector.load %arg9[%c0_173, %c0_174] : memref<128x256xf32, #tpu.memory_space<vmem>>, vector<128x256xf32>
    %cst_175 = arith.constant dense<0.000000e+00> : vector<16x256xf32>
    %490 = tpu.matmul %488, %489, %cst_175 {dimension_numbers = #tpu.dot_dimension_numbers<[1], [0], [0], [1], [0, 0, 1, 1], [], []>} : vector<16x128xf32>, vector<128x256xf32>, vector<16x256xf32> -> vector<16x256xf32>
    %c20 = arith.constant 20 : index
    %c0_176 = arith.constant 0 : index
    %491 = vector.load %arg10[%c20, %c0_176] : memref<21x384xf32, #tpu.memory_space<vmem>>, vector<1x256xf32>
    %492 = vector.broadcast %491 : vector<1x256xf32> to vector<16x256xf32>
    %493 = arith.addf %490, %492 : vector<16x256xf32>
    %494 = arith.negf %493 : vector<16x256xf32>
    %495 = math.exp %494 : vector<16x256xf32>
    %cst_177 = arith.constant 1.000000e+00 : f32
    %496 = vector.broadcast %cst_177 : f32 to vector<16x256xf32>
    %497 = arith.addf %496, %495 : vector<16x256xf32>
    %498 = arith.divf %496, %497 : vector<16x256xf32>
    %499 = math.log %498 : vector<16x256xf32>
    %cst_178 = arith.constant 2.30258512 : f32
    %500 = vector.broadcast %cst_178 : f32 to vector<16x256xf32>
    %501 = arith.mulf %500, %499 : vector<16x256xf32>
    %502 = math.exp %501 : vector<16x256xf32>
    %cst_179 = arith.constant 2.000000e+00 : f32
    %503 = vector.broadcast %cst_179 : f32 to vector<16x256xf32>
    %504 = arith.mulf %503, %502 : vector<16x256xf32>
    %cst_180 = arith.constant 1.000000e-18 : f32
    %505 = vector.broadcast %cst_180 : f32 to vector<16x256xf32>
    %506 = arith.addf %504, %505 : vector<16x256xf32>
    %c0_181 = arith.constant 0 : index
    %c0_182 = arith.constant 0 : index
    %507 = vector.load %arg11[%c0_181, %c0_182] : memref<16x256xf32, #tpu.memory_space<vmem>>, vector<16x256xf32>
    tpu.vector_store %arg11[%c0_181, %c0_182], %506 {strides = array<i32>} : memref<16x256xf32, #tpu.memory_space<vmem>>, vector<16x256xf32>,
    return
  }
}

</mosaic_0001>

<bundles_post_ra>
// kernel: decoder_forward.1
= control target key start
LH: loop header
LB: loop body
LE: loop exit
PB: predicated region body
PF: predicated region fallthrough
CT: control target
= control target key end

     0   :  { %16 = vsyncpa [#allocation5], 0  ;;  %s3561_s0 = inlined_call_operand.vmem [shape: f32[16,16], index: 0, kind: input, shape index: {}]   ;;  %s3562_s1 = inlined_call_operand.vmem [shape: f32[16,32], index: 1, kind: input, shape index: {}]   ;;  %s3563_s2 = inlined_call_operand.hbm [shape: f32[32,64], index: 2, kind: input, shape index: {}]   ;;  %s3564_s3 = inlined_call_operand.hbm [shape: f32[64,128], index: 3, kind: input, shape index: {}]   ;;  %s3565_s4 = inlined_call_operand.hbm [shape: f32[128,384], index: 4, kind: input, shape index: {}]   ;;  %s3566_s5 = inlined_call_operand.hbm [shape: f32[128,384], index: 5, kind: input, shape index: {}]   ;;  %s3567_s6 = inlined_call_operand.vmem [shape: f32[128,128], index: 6, kind: input, shape index: {}]   ;;  %s3568_s7 = inlined_call_operand.hbm [shape: f32[128,128], index: 7, kind: input, shape index: {}]   ;;  %s3569_s8 = inlined_call_operand.hbm [shape: f32[128,128], index: 8, kind: input, shape index: {}]   ;;  %s3570_s9 = inlined_call_operand.hbm [shape: f32[128,256], index: 9, kind: input, shape index: {}]   ;;  %s3571_s10 = inlined_call_operand.vmem [shape: f32[21,384], index: 10, kind: input, shape index: {}]   ;;  %s3572_s11 = inlined_call_operand.vmem [shape: f32[16,256], index: 11, kind: output, shape index: {}]  }
   0x1   :  { %17 = vsyncpa [#allocation7], 0 }
   0x2   :  { %18 = vsyncpa [#allocation10], 0 }
   0x3   :  { %19 = vsyncpa [#allocation13], 0  ;;  %s41_s19 = sshll.u32 %s3564_s3, 4  ;;  %s2528_s20 = smov [#allocation6]   ;;  %s42_s19 = int_to_ptr.hbm [resolvable:$true] %s41_s19 }
   0x4   :  { %s43_s21 = sshll.u32 %s2528_s20, 4  ;;  %s2529_s22 = smov 128   ;;  %s44_s21 = int_to_ptr.vmem [resolvable:$true] %s43_s21 }
   0x5   :  { %s2530_s23 = smov 8   ;;  %s67_s26 = sshll.u32 %s3566_s5, 4  ;;  %s68_s26 = int_to_ptr.hbm [resolvable:$true] %s67_s26 }
   0x6   :  { %49 = dma.hbm_to_vmem [thread:$0]  %s42_s19, 1024, %s44_s21, [#allocation7], %s2529_s22, %s2529_s22, %s2530_s23  }
   0x7   :  { %s2531_s27 = smov [#allocation9]   ;;  %s95_s3 = sshll.u32 %s3569_s8, 4  ;;  %s96_s3 = int_to_ptr.hbm [resolvable:$true] %s95_s3 }
   0x8   :  { %s69_s28 = sshll.u32 %s2531_s27, 4  ;;  %s2532_s12 = smov 384   ;;  %s70_s28 = int_to_ptr.vmem [resolvable:$true] %s69_s28 }
   0x9   :  { %s2533_s13 = smov 24   ;;  %s28_s16 = sshll.u32 %s3563_s2, 4  ;;  %s29_s16 = int_to_ptr.hbm [resolvable:$true] %s28_s16 }
   0xa   :  { %75 = dma.hbm_to_vmem [thread:$0]  %s68_s26, 6144, %s70_s28, [#allocation10], %s2532_s12, %s2532_s12, %s2533_s13  }
   0xb   :  { %s2534_s17 = smov [#allocation12]   ;;  %s2535_s5 = smov [#allocation4]  }
   0xc   :  { %s97_s18 = sshll.u32 %s2534_s17, 4  ;;  %s30_s19 = sshll.u32 %s2535_s5, 4  ;;  %s98_s18 = int_to_ptr.vmem [resolvable:$true] %s97_s18  ;;  %s31_s19 = int_to_ptr.vmem [resolvable:$true] %s30_s19 }
   0xd   :  { %103 = dma.hbm_to_vmem [thread:$0]  %s96_s3, 2048, %s98_s18, [#allocation13], %s2529_s22, %s2529_s22, %s2530_s23  }
   0xe   :  { %s54_s21 = sshll.u32 %s3565_s4, 4  ;;  %s82_s25 = sshll.u32 %s3568_s7, 4  ;;  %s55_s21 = int_to_ptr.hbm [resolvable:$true] %s54_s21  ;;  %s83_s25 = int_to_ptr.hbm [resolvable:$true] %s82_s25 }
   0xf   :  { %36 = dma.hbm_to_vmem [thread:$0]  %s29_s16, 512, %s31_s19, [#allocation5], %s2529_s22, %s2529_s22, %s2530_s23  }
  0x10   :  { %s2536_s26 = smov [#allocation8]   ;;  %s2537_s28 = smov [#allocation11]  }
  0x11   :  { %s56_s27 = sshll.u32 %s2536_s26, 4  ;;  %s84_s29 = sshll.u32 %s2537_s28, 4  ;;  %s57_s27 = int_to_ptr.vmem [resolvable:$true] %s56_s27  ;;  %s85_s29 = int_to_ptr.vmem [resolvable:$true] %s84_s29 }
  0x12   :  { %62 = dma.hbm_to_vmem [thread:$0]  %s55_s21, 6144, %s57_s27, [#allocation7], %s2532_s12, %s2532_s12, %s2533_s13  }
  0x13   :  { %s108_s4 = sshll.u32 %s3570_s9, 4  ;;  %s2538_s14 = smov [#allocation14]   ;;  %s109_s4 = int_to_ptr.hbm [resolvable:$true] %s108_s4 }
  0x14   :  { %90 = dma.hbm_to_vmem [thread:$0]  %s83_s25, 2048, %s85_s29, [#allocation10], %s2529_s22, %s2529_s22, %s2530_s23  }
  0x15   :  { %s110_s15 = sshll.u32 %s2538_s14, 4  ;;  %s2539_s7 = smov 256   ;;  %s111_s15 = int_to_ptr.vmem [resolvable:$true] %s110_s15 }
  0x16   :  { %s2540_s16 = smov 16  }
  0x17   :  { %116 = dma.hbm_to_vmem [thread:$0]  %s109_s4, 4096, %s111_s15, [#allocation13], %s2539_s7, %s2539_s7, %s2540_s16  }
  0x18   :  { %2520 = dma.done.wait [#allocation5], 512  }
  0x19   :  { %2521 = vsyncadd [#allocation5], 4294966784 }
  0x1a   :  { %2522 = dma.done.wait [#allocation7], 7168  }
  0x1b   :  { %2523 = vsyncadd [#allocation7], 4294960128 }
  0x1c   :  { %2524 = dma.done.wait [#allocation10], 8192  }
  0x1d   :  { %2525 = vsyncadd [#allocation10], 4294959104 }
  0x1e   :  { %2526 = dma.done.wait [#allocation13], 6144  }
  0x1f   :  { %2527 = vsyncadd [#allocation13], 4294961152  ;;  %v150_v0 = vld [vmem:[%s3562_s1 + $0x8] sm:$0xff]  ;;  %v149_v1 = vld [vmem:[%s3562_s1] sm:$0xff]  ;;  %vm154_vm0 = vcmask 130048   ;;  %vm184_vm1 = vcmask 261120  }
  0x20   :  { %175 = vmatpush.msra.mxu0 %v150_v0  ;;  %v147_v2 = vld [vmem:[%s3561_s0] sm:$0xff]  ;;  %v148_v3 = vld [vmem:[%s3561_s0 + $0x8] sm:$0xff]  ;;  %v2541_v11 = vmov 32.0   ;;  %v248_v29 = vld [vmem:[#allocation4 + $0x10] sm:$0xff]  ;;  %vm282_vm11 = vcmask 523264  }
  0x21   :  { %v151_v4 = vld [vmem:[%s3571_s10] ss:$0 sm:$0xff]  ;;  %2162 = vrcp.f32 %v2541_v11  ;;  %v247_v30 = vld [vmem:[#allocation4 + $0x8] sm:$0xff]  ;;  %v246_v31 = vld [vmem:[#allocation4] sm:$0xff] }
  0x22   :  { %176 = vmatpush.msra.mxu0 %v149_v1  ;;  %v249_v28 = vld [vmem:[#allocation4 + $0x18] sm:$0xff] }
  0x23   :  { %2116 = vmatmul.msk.f32.vlgmr.msra.gmra.mxu0 %vm154_vm0, %v147_v2  ;;  %271 = vmatpush.msra.mxu1 %v249_v28  ;;  %v152_v48 = vld [vmem:[%s3571_s10 + $0x1] ss:$0 sm:$0xff]  ;;  %v153_v51 = vld [vmem:[%s3571_s10 + $0x2] ss:$0 sm:$0xff]  ;;  %v250_v0 = vld [vmem:[%s3571_s10 + $0x3] ss:$0 sm:$0xff] }
  0x24   :  { %v347_v28 = vld [vmem:[#allocation6 + $0x18] sm:$0xff] }
  0x25   :  { %272 = vmatpush.msra.mxu1 %v248_v29  ;;  %v346_v29 = vld [vmem:[#allocation6 + $0x10] sm:$0xff] }
  0x27   :  { %v2163_v12 = vpop.eup %2162  ;;  %273 = vmatpush.msra.mxu1 %v247_v30  ;;  %v345_v30 = vld [vmem:[#allocation6 + $0x8] sm:$0xff] }
  0x28   :  { %v192_v13 = vmul.f32 32.0, %v2163_v12  ;;  %vm196_vm2 = vweird.f32 %v2163_v12 }
  0x29   :  { %274 = vmatpush.msra.mxu1 %v246_v31  ;;  %v344_v31 = vld [vmem:[#allocation6] sm:$0xff] }
  0x2a   :  { %v193_v14 = vsub.f32 1.0, %v192_v13 }
  0x2b   :  { %2117 = vmatmul.msk.f32.gmra.mxu0 %vm154_vm0, %v148_v3 }
  0x2c   :  { %v194_v15 = vmul.f32 %v2163_v12, %v193_v14 }
  0x2e   :  { %v195_v16 = vadd.f32 %v2163_v12, %v194_v15 }
  0x30   :  { %v197_v17 = vsel %vm196_vm2, %v2163_v12, %v195_v16 }
  0xa0   :  { %v178_v5 = vpop.f32.mrf.mxu0 }
  0xa1   :  { %v179_v6 = vadd.f32 %v178_v5, %v151_v4 }
  0xa3   :  { %v185_v7 = vsel %vm184_vm1, %v179_v6, 0.0 }
  0xa4   :  { %186 = vadd.xlane.f32.xlu0 %v185_v7  ;;  %v2542_v7 = vmov 64.0  }
  0xa8   :  { %v181_v8 = vpop.f32.mrf.mxu0 }
  0xa9   :  { %v182_v9 = vadd.f32 %v181_v8, %v151_v4 }
  0xab   :  { %v188_v10 = vsel %vm184_vm1, %v182_v9, 0.0 }
  0xac   :  { %189 = vadd.xlane.f32.xlu0 %v188_v10 }
 0x117   :  { %v187_v18 = vpop.xlane.xlu0 %186 }
 0x118   :  { %v198_v19 = vmul.f32 %v197_v17, %v187_v18 }
 0x11a   :  { %v200_v20 = vsub.f32 %v179_v6, %v198_v19 }
 0x11c   :  { %v202_v21 = vmul.f32 %v200_v20, %v200_v20 }
 0x11e   :  { %v204_v22 = vsel %vm184_vm1, %v202_v21, 0.0 }
 0x11f   :  { %205 = vadd.xlane.f32.xlu1 %v204_v22  ;;  %v190_v23 = vpop.xlane.xlu0 %189 }
 0x120   :  { %v199_v24 = vmul.f32 %v197_v17, %v190_v23 }
 0x122   :  { %v201_v25 = vsub.f32 %v182_v9, %v199_v24  ;;  %v351_v24 = vld [vmem:[#allocation6 + $0x38] sm:$0xff] }
 0x123   :  { %369 = vmatpush.msra.mxu2 %v351_v24 }
 0x124   :  { %v203_v26 = vmul.f32 %v201_v25, %v201_v25 }
 0x126   :  { %v207_v27 = vsel %vm184_vm1, %v203_v26, 0.0  ;;  %v349_v26 = vld [vmem:[#allocation6 + $0x28] sm:$0xff] }
 0x127   :  { %208 = vadd.xlane.f32.xlu1 %v207_v27  ;;  %v348_v27 = vld [vmem:[#allocation6 + $0x20] sm:$0xff] }
 0x192   :  { %v206_v32 = vpop.xlane.xlu1 %205 }
 0x193   :  { %v210_v33 = vmul.f32 %v206_v32, %v197_v17 }
 0x195   :  { %v212_v34 = vadd.f32 1e-05, %v210_v33 }
 0x197   :  { %2164 = vrsqrt.f32 %v212_v34  ;;  %vm220_vm4 = vweird.f32 %v212_v34 }
 0x19a   :  { %v209_v35 = vpop.xlane.xlu1 %208 }
 0x19b   :  { %v211_v36 = vmul.f32 %v209_v35, %v197_v17 }
 0x19d   :  { %v2165_v37 = vpop.eup %2164  ;;  %v213_v38 = vadd.f32 1e-05, %v211_v36 }
 0x19e   :  { %v215_v39 = vmul.f32 %v2165_v37, %v212_v34  ;;  %vm221_vm3 = vweird.f32 %v2165_v37 }
 0x19f   :  { %2166 = vrsqrt.f32 %v213_v38  ;;  %vm222_vm5 = vmor %vm220_vm4, %vm221_vm3  ;;  %vm230_vm7 = vweird.f32 %v213_v38 }
 0x1a0   :  { %v216_v40 = vmul.f32 %v2165_v37, %v215_v39  ;;  %2168 = vrcp.f32 %v2542_v7 }
 0x1a2   :  { %v217_v41 = vmul.f32 0.5, %v216_v40 }
 0x1a4   :  { %v218_v42 = vsub.f32 1.5, %v217_v41 }
 0x1a5   :  { %v2167_v43 = vpop.eup %2166 }
 0x1a6   :  { %v219_v44 = vmul.f32 %v2165_v37, %v218_v42  ;;  %v225_v45 = vmul.f32 %v2167_v43, %v213_v38  ;;  %vm231_vm6 = vweird.f32 %v2167_v43  ;;  %v2169_v8 = vpop.eup %2168 }
 0x1a7   :  { %vm232_vm8 = vmor %vm230_vm7, %vm231_vm6  ;;  %v290_v9 = vmul.f32 64.0, %v2169_v8  ;;  %vm294_vm12 = vweird.f32 %v2169_v8 }
 0x1a8   :  { %v223_v46 = vsel %vm222_vm5, %v2165_v37, %v219_v44  ;;  %v226_v47 = vmul.f32 %v2167_v43, %v225_v45 }
 0x1a9   :  { %v234_v49 = vmul.f32 %v223_v46, %v200_v20  ;;  %v291_v10 = vsub.f32 1.0, %v290_v9  ;;  %v483_v9 = vld [vmem:[#allocation8 + $0x150] sm:$0xff] }
 0x1aa   :  { %v227_v50 = vmul.f32 0.5, %v226_v47 }
 0x1ab   :  { %v236_v52 = vmul.f32 %v234_v49, %v152_v48  ;;  %v292_v11 = vmul.f32 %v2169_v8, %v291_v10  ;;  %v480_v10 = vld [vmem:[#allocation8 + $0x138] sm:$0xff] }
 0x1ac   :  { %v228_v53 = vsub.f32 1.5, %v227_v50 }
 0x1ad   :  { %v238_v54 = vadd.f32 %v236_v52, %v153_v51  ;;  %v293_v12 = vadd.f32 %v2169_v8, %v292_v11 }
 0x1ae   :  { %v229_v55 = vmul.f32 %v2167_v43, %v228_v53 }
 0x1af   :  { %vm240_vm9 = vcmp.ge.f32.partialorder %v238_v54, 0.0  ;;  %v242_v56 = vmul.f32 0.01, %v238_v54  ;;  %v295_v13 = vsel %vm294_vm12, %v2169_v8, %v293_v12  ;;  %v486_v8 = vld [vmem:[#allocation8 + $0x168] sm:$0xff]  ;;  %v477_v12 = vld [vmem:[#allocation8 + $0x120] sm:$0xff] }
 0x1b0   :  { %v233_v57 = vsel %vm232_vm8, %v2167_v43, %v229_v55  ;;  %498 = vmatpush.msra.mxu3 %v486_v8  ;;  %v452_v8 = vld [vmem:[#allocation8 + $0x58] sm:$0xff] }
 0x1b1   :  { %v235_v58 = vmul.f32 %v233_v57, %v201_v25  ;;  %v244_v59 = vsel %vm240_vm9, %v238_v54, %v242_v56  ;;  %v350_v25 = vld [vmem:[#allocation6 + $0x30] sm:$0xff] }
 0x1b2   :  { %2118 = vmatmul.msk.f32.vlgmr.msra.gmra.mxu1 %vm184_vm1, %v244_v59  ;;  %370 = vmatpush.msra.mxu2 %v350_v25 }
 0x1b3   :  { %v237_v60 = vmul.f32 %v235_v58, %v152_v48  ;;  %v251_v48 = vld [vmem:[%s3571_s10 + $0x4] ss:$0 sm:$0xff]  ;;  %499 = vmatpush.msra.mxu3 %v483_v9  ;;  %v2728_v9 = vld [vmem:[#allocation9 + $0xc0] sm:$0xff] }
 0x1b4   :  { %371 = vmatpush.msra.mxu2 %v349_v26 }
 0x1b5   :  { %v239_v61 = vadd.f32 %v237_v60, %v153_v51  ;;  %v252_v51 = vld [vmem:[%s3571_s10 + $0x5] ss:$0 sm:$0xff]  ;;  %500 = vmatpush.msra.mxu3 %v480_v10  ;;  %v2730_v10 = vld [vmem:[#allocation9 + $0x110] sm:$0xff] }
 0x1b6   :  { %372 = vmatpush.msra.mxu2 %v348_v27 }
 0x1b7   :  { %vm241_vm10 = vcmp.ge.f32.partialorder %v239_v61, 0.0  ;;  %v243_v62 = vmul.f32 0.01, %v239_v61  ;;  %501 = vmatpush.msra.mxu3 %v477_v12  ;;  %v449_v12 = vld [vmem:[#allocation8 + $0x40] sm:$0xff] }
 0x1b8   :  { %373 = vmatpush.msra.mxu2 %v347_v28  ;;  %v487_v28 = vld [vmem:[#allocation8 + $0x170] sm:$0xff] }
 0x1b9   :  { %v245_v63 = vsel %vm241_vm10, %v239_v61, %v243_v62  ;;  %521 = vmatpush.msrb.mxu0 %v487_v28  ;;  %v2753_v28 = vld [vmem:[#allocation9 + $0x60] sm:$0xff] }
 0x1ba   :  { %2119 = vmatmul.msk.f32.gmra.mxu1 %vm184_vm1, %v245_v63  ;;  %374 = vmatpush.msra.mxu2 %v346_v29  ;;  %v488_v29 = vld [vmem:[#allocation8 + $0x178] sm:$0xff] }
 0x1bb   :  { %544 = vmatpush.msrb.mxu1 %v488_v29  ;;  %v2755_v29 = vld [vmem:[#allocation9 + $0xb0] sm:$0xff] }
 0x1bc   :  { %375 = vmatpush.msra.mxu2 %v345_v30  ;;  %v462_v30 = vld [vmem:[#allocation8 + $0xa8] sm:$0xff] }
 0x1be   :  { %376 = vmatpush.msra.mxu2 %v344_v31  ;;  %v484_v31 = vld [vmem:[#allocation8 + $0x158] sm:$0xff] }
 0x1bf   :  { %522 = vmatpush.msrb.mxu0 %v484_v31  ;;  %v2762_v31 = vld [vmem:[#allocation9 + $0x98] sm:$0xff] }
 0x22f   :  { %v276_v1 = vpop.f32.mrf.mxu1 }
 0x230   :  { %v277_v2 = vadd.f32 %v276_v1, %v250_v0 }
 0x232   :  { %v283_v3 = vsel %vm282_vm11, %v277_v2, 0.0 }
 0x233   :  { %284 = vadd.xlane.f32.xlu2 %v283_v3 }
 0x237   :  { %v279_v4 = vpop.f32.mrf.mxu1 }
 0x238   :  { %v280_v5 = vadd.f32 %v279_v4, %v250_v0  ;;  %v352_v0 = vld [vmem:[%s3571_s10 + $0x6] ss:$0 sm:$0xff] }
 0x23a   :  { %v286_v6 = vsel %vm282_vm11, %v280_v5, 0.0 }
 0x23b   :  { %287 = vadd.xlane.f32.xlu2 %v286_v6 }
 0x2a6   :  { %v285_v14 = vpop.xlane.xlu2 %284 }
 0x2a7   :  { %v296_v15 = vmul.f32 %v295_v13, %v285_v14 }
 0x2a9   :  { %v298_v16 = vsub.f32 %v277_v2, %v296_v15  ;;  %v471_v15 = vld [vmem:[#allocation8 + $0xf0] sm:$0xff] }
 0x2ab   :  { %v300_v17 = vmul.f32 %v298_v16, %v298_v16 }
 0x2ad   :  { %v302_v18 = vsel %vm282_vm11, %v300_v17, 0.0 }
 0x2ae   :  { %303 = vadd.xlane.f32.xlu0 %v302_v18  ;;  %v288_v19 = vpop.xlane.xlu2 %287  ;;  %v465_v18 = vld [vmem:[#allocation8 + $0xc0] sm:$0xff] }
 0x2af   :  { %v297_v20 = vmul.f32 %v295_v13, %v288_v19 }
 0x2b1   :  { %v299_v21 = vsub.f32 %v280_v5, %v297_v20  ;;  %v2543_v5 = vmov 128.0  }
 0x2b3   :  { %v301_v22 = vmul.f32 %v299_v21, %v299_v21 }
 0x2b5   :  { %v305_v23 = vsel %vm282_vm11, %v301_v22, 0.0 }
 0x2b6   :  { %306 = vadd.xlane.f32.xlu1 %v305_v23 }
 0x321   :  { %v304_v32 = vpop.xlane.xlu0 %303 }
 0x322   :  { %v308_v33 = vmul.f32 %v304_v32, %v295_v13  ;;  %v485_v32 = vld [vmem:[#allocation8 + $0x160] sm:$0xff] }
 0x323   :  { %545 = vmatpush.msrb.mxu1 %v485_v32 }
 0x324   :  { %v310_v34 = vadd.f32 1e-05, %v308_v33  ;;  %v459_v33 = vld [vmem:[#allocation8 + $0x90] sm:$0xff] }
 0x326   :  { %2170 = vrsqrt.f32 %v310_v34  ;;  %vm318_vm14 = vweird.f32 %v310_v34 }
 0x329   :  { %v307_v35 = vpop.xlane.xlu1 %306 }
 0x32a   :  { %v309_v36 = vmul.f32 %v307_v35, %v295_v13  ;;  %v474_v13 = vld [vmem:[#allocation8 + $0x108] sm:$0xff] }
 0x32b   :  { %502 = vmatpush.msra.mxu3 %v474_v13  ;;  %v482_v35 = vld [vmem:[#allocation8 + $0x148] sm:$0xff] }
 0x32c   :  { %v2171_v37 = vpop.eup %2170  ;;  %v311_v38 = vadd.f32 1e-05, %v309_v36  ;;  %546 = vmatpush.msrb.mxu1 %v482_v35  ;;  %v456_v36 = vld [vmem:[#allocation8 + $0x78] sm:$0xff]  ;;  %v2734_v13 = vld [vmem:[#allocation9 + $0xa8] sm:$0xff] }
 0x32d   :  { %v313_v39 = vmul.f32 %v2171_v37, %v310_v34  ;;  %vm319_vm13 = vweird.f32 %v2171_v37  ;;  %503 = vmatpush.msra.mxu3 %v471_v15  ;;  %v481_v34 = vld [vmem:[#allocation8 + $0x140] sm:$0xff]  ;;  %v2771_v35 = vld [vmem:[#allocation9 + $0x18] sm:$0xff] }
 0x32e   :  { %2172 = vrsqrt.f32 %v311_v38  ;;  %vm320_vm15 = vmor %vm318_vm14, %vm319_vm13  ;;  %vm328_vm1 = vweird.f32 %v311_v38  ;;  %523 = vmatpush.msrb.mxu0 %v481_v34  ;;  %v445_v15 = vld [vmem:[#allocation8 + $0x20] sm:$0xff]  ;;  %3603 = vst [vmem:[#allocation21_spill] sm:$0xff] %v2771_v35  ;;  %vm577_vm14 = vcmask 1041408  }
 0x32f   :  { %v314_v40 = vmul.f32 %v2171_v37, %v313_v39  ;;  %2174 = vrcp.f32 %v2543_v5  ;;  %v453_v39 = vld [vmem:[#allocation8 + $0x60] sm:$0xff]  ;;  %v2722_v5 = vld [vmem:[#allocation9 + $0xd8] sm:$0xff] }
 0x330   :  { %v2766_v34 = vld [vmem:[#allocation9 + $0x80] sm:$0xff] }
 0x331   :  { %v315_v41 = vmul.f32 0.5, %v314_v40  ;;  %v475_v40 = vld [vmem:[#allocation8 + $0x110] sm:$0xff] }
 0x333   :  { %v316_v42 = vsub.f32 1.5, %v315_v41  ;;  %v476_v41 = vld [vmem:[#allocation8 + $0x118] sm:$0xff] }
 0x334   :  { %v2173_v43 = vpop.eup %2172 }
 0x335   :  { %v317_v44 = vmul.f32 %v2171_v37, %v316_v42  ;;  %v323_v45 = vmul.f32 %v2173_v43, %v311_v38  ;;  %vm329_vm0 = vweird.f32 %v2173_v43  ;;  %v2175_v6 = vpop.eup %2174  ;;  %v479_v38 = vld [vmem:[#allocation8 + $0x130] sm:$0xff]  ;;  %v450_v42 = vld [vmem:[#allocation8 + $0x48] sm:$0xff] }
 0x336   :  { %vm330_vm2 = vmor %vm328_vm1, %vm329_vm0  ;;  %v389_v7 = vmul.f32 128.0, %v2175_v6  ;;  %vm393_vm5 = vweird.f32 %v2175_v6  ;;  %547 = vmatpush.msrb.mxu1 %v479_v38  ;;  %vm586_vm0 = vcmask 1045508   ;;  %vm590_vm1 = vcmask 1045504  }
 0x337   :  { %v321_v46 = vsel %vm320_vm15, %v2171_v37, %v317_v44  ;;  %v324_v47 = vmul.f32 %v2173_v43, %v323_v45  ;;  %v478_v37 = vld [vmem:[#allocation8 + $0x128] sm:$0xff]  ;;  %v473_v44 = vld [vmem:[#allocation8 + $0x100] sm:$0xff]  ;;  %vm581_vm15 = vcmask 1043458  }
 0x338   :  { %v332_v49 = vmul.f32 %v321_v46, %v298_v16  ;;  %v390_v11 = vsub.f32 1.0, %v389_v7  ;;  %v468_v16 = vld [vmem:[#allocation8 + $0xd8] sm:$0xff]  ;;  %524 = vmatpush.msrb.mxu0 %v478_v37  ;;  %548 = vmatpush.msrb.mxu1 %v476_v41  ;;  %v2695_v45 = vld [vmem:[#allocation9 + $0x168] sm:$0xff]  ;;  %v447_v46 = vld [vmem:[#allocation8 + $0x30] sm:$0xff] }
 0x339   :  { %v325_v50 = vmul.f32 0.5, %v324_v47  ;;  %504 = vmatpush.msra.mxu3 %v468_v16  ;;  %679 = vmatpush.msrb.mxu2 %v2695_v45  ;;  %v469_v47 = vld [vmem:[#allocation8 + $0xe0] sm:$0xff]  ;;  %v451_v7 = vld [vmem:[#allocation8 + $0x50] sm:$0xff]  ;;  %v446_v16 = vld [vmem:[#allocation8 + $0x28] sm:$0xff] }
 0x33a   :  { %v334_v52 = vmul.f32 %v332_v49, %v251_v48  ;;  %v391_v14 = vmul.f32 %v2175_v6, %v390_v11  ;;  %525 = vmatpush.msrb.mxu0 %v475_v40  ;;  %549 = vmatpush.msrb.mxu1 %v473_v44  ;;  %v2698_v49 = vld [vmem:[#allocation9 + $0x150] sm:$0xff]  ;;  %v448_v11 = vld [vmem:[#allocation8 + $0x38] sm:$0xff] }
 0x33b   :  { %v326_v53 = vsub.f32 1.5, %v325_v50  ;;  %505 = vmatpush.msra.mxu3 %v465_v18  ;;  %v444_v50 = vld [vmem:[#allocation8 + $0x18] sm:$0xff]  ;;  %680 = vmatpush.msrb.mxu2 %v2698_v49  ;;  %v2742_v18 = vld [vmem:[#allocation9 + $0xe0] sm:$0xff]  ;;  %v2784_v40 = vld [vmem:[#allocation9 + $0x50] sm:$0xff] }
 0x33c   :  { %v336_v54 = vadd.f32 %v334_v52, %v252_v51  ;;  %v392_v17 = vadd.f32 %v2175_v6, %v391_v14  ;;  %v467_v52 = vld [vmem:[#allocation8 + $0xd0] sm:$0xff]  ;;  %v2736_v14 = vld [vmem:[#allocation9 + $0xf8] sm:$0xff] }
 0x33d   :  { %v327_v55 = vmul.f32 %v2173_v43, %v326_v53  ;;  %506 = vmatpush.msra.mxu3 %v462_v30  ;;  %v2701_v53 = vld [vmem:[#allocation9 + $0x138] sm:$0xff]  ;;  %v2757_v30 = vld [vmem:[#allocation9 + $0x48] sm:$0xff] }
 0x33e   :  { %vm338_vm3 = vcmp.ge.f32.partialorder %v336_v54, 0.0  ;;  %v340_v56 = vmul.f32 0.01, %v336_v54  ;;  %v2683_v19 = vsel %vm393_vm5, %v2175_v6, %v392_v17  ;;  %681 = vmatpush.msrb.mxu2 %v2701_v53  ;;  %v2724_v6 = vld [vmem:[#allocation9 + $0x128] sm:$0xff]  ;;  %v2740_v17 = vld [vmem:[#allocation9 + $0x90] sm:$0xff]  ;;  %v2786_v41 = vld [vmem:[#allocation9 + $0x38] sm:$0xff] }
 0x33f   :  { %v331_v57 = vsel %vm330_vm2, %v2173_v43, %v327_v55  ;;  %3601 = vst [vmem:[#allocation19_spill] sm:$0xff] %v2683_v19  ;;  %507 = vmatpush.msra.mxu3 %v459_v33  ;;  %v472_v43 = vld [vmem:[#allocation8 + $0xf8] sm:$0xff]  ;;  %v463_v55 = vld [vmem:[#allocation8 + $0xb0] sm:$0xff]  ;;  %vm579_vm2 = vcmask 1043456  }
 0x340   :  { %v333_v58 = vmul.f32 %v331_v57, %v299_v21  ;;  %v342_v59 = vsel %vm338_vm3, %v336_v54, %v340_v56  ;;  %526 = vmatpush.msrb.mxu0 %v472_v43  ;;  %v441_v54 = vld [vmem:[#allocation8] sm:$0xff]  ;;  %v464_v56 = vld [vmem:[#allocation8 + $0xb8] sm:$0xff]  ;;  %v2764_v33 = vld [vmem:[#allocation9 + $0x30] sm:$0xff]  ;;  %3605 = vst [vmem:[#allocation23_spill] sm:$0xff] %v2786_v41  ;;  %vm583_vm3 = vcmask 1045506  }
 0x341   :  { %2120 = vmatmul.msk.f32.vlgmr.msra.gmra.mxu2 %vm282_vm11, %v342_v59  ;;  %508 = vmatpush.msra.mxu3 %v456_v36  ;;  %v2704_v57 = vld [vmem:[#allocation9 + $0x120] sm:$0xff]  ;;  %v460_v59 = vld [vmem:[#allocation8 + $0x98] sm:$0xff]  ;;  %3602 = vst [vmem:[#allocation20_spill] sm:$0xff] %v2764_v33  ;;  %v2773_v36 = vld [vmem:[#allocation9 + $0x68] sm:$0xff] }
 0x342   :  { %v335_v60 = vmul.f32 %v333_v58, %v251_v48  ;;  %v470_v48 = vld [vmem:[#allocation8 + $0xe8] sm:$0xff]  ;;  %527 = vmatpush.msrb.mxu0 %v469_v47  ;;  %v2706_v58 = vld [vmem:[#allocation9 + $0x170] sm:$0xff]  ;;  %682 = vmatpush.msrb.mxu2 %v2704_v57  ;;  %v2796_v47 = vld [vmem:[#allocation9 + $0x20] sm:$0xff] }
 0x343   :  { %509 = vmatpush.msra.mxu3 %v453_v39  ;;  %550 = vmatpush.msrb.mxu1 %v470_v48  ;;  %v2782_v39 = vld [vmem:[#allocation9] sm:$0xff]  ;;  %3606 = vst [vmem:[#allocation24_spill] sm:$0xff] %v2796_v47 }
 0x344   :  { %v337_v61 = vadd.f32 %v335_v60, %v252_v51  ;;  %v466_v51 = vld [vmem:[#allocation8 + $0xc8] sm:$0xff]  ;;  %v461_v60 = vld [vmem:[#allocation8 + $0xa0] sm:$0xff]  ;;  %3604 = vst [vmem:[#allocation22_spill] sm:$0xff] %v2782_v39 }
 0x345   :  { %510 = vmatpush.msra.mxu3 %v450_v42  ;;  %528 = vmatpush.msrb.mxu0 %v466_v51  ;;  %v2791_v42 = vld [vmem:[#allocation9 + $0x178] sm:$0xff] }
 0x346   :  { %vm339_vm4 = vcmp.ge.f32.partialorder %v337_v61, 0.0  ;;  %v341_v62 = vmul.f32 0.01, %v337_v61  ;;  %551 = vmatpush.msrb.mxu1 %v467_v52 }
 0x347   :  { %511 = vmatpush.msra.mxu3 %v447_v46  ;;  %529 = vmatpush.msrb.mxu0 %v463_v55  ;;  %v2544_v46 = vmov 0.0   ;;  %v2811_v55 = vld [vmem:[#allocation9 + $0x148] sm:$0xff] }
 0x348   :  { %v343_v63 = vsel %vm339_vm4, %v337_v61, %v341_v62  ;;  %552 = vmatpush.msrb.mxu1 %v464_v56  ;;  %v2710_v61 = vld [vmem:[#allocation9 + $0x108] sm:$0xff]  ;;  %v2712_v62 = vld [vmem:[#allocation9 + $0x158] sm:$0xff] }
 0x349   :  { %2121 = vmatmul.msk.f32.gmra.mxu2 %vm282_vm11, %v343_v63  ;;  %512 = vmatpush.msra.mxu3 %v444_v50  ;;  %v457_v63 = vld [vmem:[#allocation8 + $0x80] sm:$0xff]  ;;  %v2802_v50 = vld [vmem:[#allocation9 + $0x8] sm:$0xff] }
 0x34a   :  { %530 = vmatpush.msrb.mxu0 %v460_v59  ;;  %553 = vmatpush.msrb.mxu1 %v461_v60  ;;  %3607 = vst [vmem:[#allocation25_spill] sm:$0xff] %v2802_v50  ;;  %v2816_v59 = vld [vmem:[#allocation9 + $0x130] sm:$0xff] }
 0x34b   :  { %513 = vmatpush.msra.mxu3 %v441_v54  ;;  %683 = vmatpush.msrb.mxu2 %v2710_v61  ;;  %v2809_v54 = vld [vmem:[#allocation9 + $0x160] sm:$0xff] }
 0x34c   :  { %531 = vmatpush.msrb.mxu0 %v457_v63 }
 0x34d   :  { %699 = vmatpush.msrb.mxu3 %v2706_v58 }
 0x34f   :  { %700 = vmatpush.msrb.mxu3 %v2712_v62 }
 0x3c4   :  { %v378_v1 = vpop.f32.mrf.mxu2 }
 0x3c5   :  { %v379_v2 = vadd.f32 %v378_v1, %v352_v0  ;;  %v2716_v1 = vld [vmem:[#allocation9 + $0xf0] sm:$0xff] }
 0x3c6   :  { %684 = vmatpush.msrb.mxu2 %v2716_v1 }
 0x3c7   :  { %384 = vadd.xlane.f32.xlu2 %v379_v2 }
 0x3c8   :  { %685 = vmatpush.msrb.mxu2 %v2722_v5 }
 0x3ca   :  { %686 = vmatpush.msrb.mxu2 %v2728_v9 }
 0x3cc   :  { %v381_v3 = vpop.f32.mrf.mxu2  ;;  %687 = vmatpush.msrb.mxu2 %v2734_v13 }
 0x3cd   :  { %v382_v4 = vadd.f32 %v381_v3, %v352_v0  ;;  %v458_v0 = vld [vmem:[#allocation8 + $0x88] sm:$0xff] }
 0x3ce   :  { %554 = vmatpush.msrb.mxu1 %v458_v0  ;;  %v454_v3 = vld [vmem:[#allocation8 + $0x68] sm:$0xff]  ;;  %688 = vmatpush.msrb.mxu2 %v2740_v17 }
 0x3cf   :  { %386 = vadd.xlane.f32.xlu0 %v382_v4  ;;  %532 = vmatpush.msrb.mxu0 %v454_v3  ;;  %v2822_v3 = vld [vmem:[#allocation9 + $0x118] sm:$0xff] }
 0x3d1   :  { %533 = vmatpush.msrb.mxu0 %v451_v7 }
 0x3d3   :  { %534 = vmatpush.msrb.mxu0 %v448_v11  ;;  %v2830_v11 = vld [vmem:[#allocation9 + $0x100] sm:$0xff] }
 0x3d5   :  { %535 = vmatpush.msrb.mxu0 %v445_v15 }
 0x43a   :  { %v385_v20 = vpop.xlane.xlu2 %384 }
 0x43b   :  { %v395_v21 = vmul.f32 %v2683_v19, %v385_v20  ;;  %v442_v20 = vld [vmem:[#allocation8 + $0x8] sm:$0xff] }
 0x43c   :  { %536 = vmatpush.msrb.mxu0 %v442_v20  ;;  %v2839_v20 = vld [vmem:[#allocation9 + $0xe8] sm:$0xff] }
 0x43d   :  { %v2686_v22 = vsub.f32 %v379_v2, %v395_v21  ;;  %v2718_v2 = vld [vmem:[#allocation9 + $0x140] sm:$0xff]  ;;  %v443_v21 = vld [vmem:[#allocation8 + $0x10] sm:$0xff] }
 0x43e   :  { %701 = vmatpush.msrb.mxu3 %v2718_v2  ;;  %719 = vmatpush.msra.mxu0 %v2791_v42 }
 0x43f   :  { %v399_v23 = vmul.f32 %v2686_v22, %v2686_v22 }
 0x440   :  { %702 = vmatpush.msrb.mxu3 %v2724_v6  ;;  %720 = vmatpush.msra.mxu0 %v2809_v54 }
 0x441   :  { %401 = vadd.xlane.f32.xlu1 %v399_v23  ;;  %v2746_v23 = vld [vmem:[#allocation9 + $0x78] sm:$0xff] }
 0x442   :  { %v387_v24 = vpop.xlane.xlu0 %386  ;;  %703 = vmatpush.msrb.mxu3 %v2730_v10  ;;  %689 = vmatpush.msrb.mxu2 %v2746_v23 }
 0x443   :  { %v396_v25 = vmul.f32 %v2683_v19, %v387_v24  ;;  %v2748_v24 = vld [vmem:[#allocation9 + $0xc8] sm:$0xff]  ;;  %721 = vmatpush.msra.mxu0 %v2811_v55 }
 0x444   :  { %704 = vmatpush.msrb.mxu3 %v2736_v14  ;;  %690 = vmatpush.msrb.mxu2 %v2753_v28 }
 0x445   :  { %v2691_v26 = vsub.f32 %v382_v4, %v396_v25  ;;  %v455_v4 = vld [vmem:[#allocation8 + $0x70] sm:$0xff]  ;;  %722 = vmatpush.msra.mxu0 %v2816_v59 }
 0x446   :  { %555 = vmatpush.msrb.mxu1 %v455_v4  ;;  %705 = vmatpush.msrb.mxu3 %v2742_v18 }
 0x447   :  { %v400_v27 = vmul.f32 %v2691_v26, %v2691_v26  ;;  %691 = vmatpush.msrb.mxu2 %v2757_v30  ;;  %723 = vmatpush.msra.mxu0 %v2822_v3 }
 0x448   :  { %556 = vmatpush.msrb.mxu1 %v452_v8  ;;  %706 = vmatpush.msrb.mxu3 %v2748_v24  ;;  %v353_v8 = vld [vmem:[%s3571_s10 + $0x7] ss:$0 sm:$0xff] }
 0x449   :  { %403 = vadd.xlane.f32.xlu2 %v400_v27  ;;  %692 = vmatpush.msrb.mxu2 %v2764_v33 }
 0x44a   :  { %557 = vmatpush.msrb.mxu1 %v449_v12  ;;  %707 = vmatpush.msrb.mxu3 %v2755_v29 }
 0x44b   :  { %693 = vmatpush.msrb.mxu2 %v2771_v35  ;;  %724 = vmatpush.msra.mxu0 %v2830_v11 }
 0x44c   :  { %558 = vmatpush.msrb.mxu1 %v446_v16  ;;  %708 = vmatpush.msrb.mxu3 %v2762_v31  ;;  %v354_v16 = vld [vmem:[%s3571_s10 + $0x18] ss:$0 sm:$0xff] }
 0x44d   :  { %694 = vmatpush.msrb.mxu2 %v2782_v39  ;;  %725 = vmatpush.msra.mxu0 %v2839_v20 }
 0x44e   :  { %559 = vmatpush.msrb.mxu1 %v443_v21  ;;  %709 = vmatpush.msrb.mxu3 %v2766_v34 }
 0x44f   :  { %695 = vmatmul.f32.vlgmr.msrb.gmra.mxu2 %v2544_v46 }
 0x450   :  { %794 = vmatpush.msra.mxu1 %v2695_v45  ;;  %710 = vmatpush.msrb.mxu3 %v2773_v36 }
 0x451   :  { %814 = vmatpush.msra.mxu2 %v2706_v58 }
 0x452   :  { %795 = vmatpush.msra.mxu1 %v2698_v49  ;;  %711 = vmatpush.msrb.mxu3 %v2784_v40 }
 0x453   :  { %815 = vmatpush.msra.mxu2 %v2712_v62 }
 0x454   :  { %796 = vmatpush.msra.mxu1 %v2701_v53  ;;  %712 = vmatpush.msrb.mxu3 %v2786_v41 }
 0x455   :  { %816 = vmatpush.msra.mxu2 %v2718_v2 }
 0x456   :  { %797 = vmatpush.msra.mxu1 %v2704_v57  ;;  %713 = vmatpush.msrb.mxu3 %v2796_v47 }
 0x457   :  { %817 = vmatpush.msra.mxu2 %v2724_v6 }
 0x458   :  { %798 = vmatpush.msra.mxu1 %v2710_v61  ;;  %714 = vmatpush.msrb.mxu3 %v2802_v50 }
 0x459   :  { %818 = vmatpush.msra.mxu2 %v2730_v10 }
 0x45a   :  { %799 = vmatpush.msra.mxu1 %v2716_v1 }
 0x45b   :  { %819 = vmatpush.msra.mxu2 %v2736_v14 }
 0x45c   :  { %800 = vmatpush.msra.mxu1 %v2722_v5 }
 0x45d   :  { %820 = vmatpush.msra.mxu2 %v2742_v18 }
 0x45e   :  { %801 = vmatpush.msra.mxu1 %v2728_v9 }
 0x45f   :  { %821 = vmatpush.msra.mxu2 %v2748_v24 }
 0x460   :  { %802 = vmatpush.msra.mxu1 %v2734_v13 }
 0x461   :  { %822 = vmatpush.msra.mxu2 %v2755_v29 }
 0x462   :  { %803 = vmatpush.msra.mxu1 %v2740_v17 }
 0x463   :  { %823 = vmatpush.msra.mxu2 %v2762_v31 }
 0x464   :  { %804 = vmatpush.msra.mxu1 %v2746_v23 }
 0x465   :  { %824 = vmatpush.msra.mxu2 %v2766_v34 }
 0x466   :  { %805 = vmatpush.msra.mxu1 %v2753_v28 }
 0x467   :  { %825 = vmatpush.msra.mxu2 %v2773_v36 }
 0x468   :  { %806 = vmatpush.msra.mxu1 %v2757_v30 }
 0x469   :  { %826 = vmatpush.msra.mxu2 %v2784_v40 }
 0x46a   :  { %807 = vmatpush.msra.mxu1 %v2764_v33 }
 0x46b   :  { %827 = vmatpush.msra.mxu2 %v2786_v41 }
 0x46c   :  { %808 = vmatpush.msra.mxu1 %v2771_v35 }
 0x46d   :  { %828 = vmatpush.msra.mxu2 %v2796_v47 }
 0x46e   :  { %809 = vmatpush.msra.mxu1 %v2782_v39 }
 0x46f   :  { %829 = vmatpush.msra.mxu2 %v2802_v50 }
 0x471   :  { %950 = vmatpush.msrb.mxu2 %v2791_v42 }
 0x473   :  { %951 = vmatpush.msrb.mxu2 %v2809_v54 }
 0x475   :  { %952 = vmatpush.msrb.mxu2 %v2811_v55 }
 0x477   :  { %953 = vmatpush.msrb.mxu2 %v2816_v59 }
 0x479   :  { %954 = vmatpush.msrb.mxu2 %v2822_v3 }
 0x47b   :  { %955 = vmatpush.msrb.mxu2 %v2830_v11 }
 0x47d   :  { %956 = vmatpush.msrb.mxu2 %v2839_v20 }
 0x4b4   :  { %v402_v25 = vpop.xlane.xlu1 %401 }
 0x4b5   :  { %v405_v27 = vmul.f32 %v402_v25, %v2683_v19 }
 0x4b7   :  { %v407_v32 = vadd.f32 1e-05, %v405_v27 }
 0x4b9   :  { %2176 = vrsqrt.f32 %v407_v32  ;;  %vm415_vm7 = vweird.f32 %v407_v32 }
 0x4bc   :  { %v404_v37 = vpop.xlane.xlu2 %403 }
 0x4bd   :  { %v406_v38 = vmul.f32 %v404_v37, %v2683_v19  ;;  %v2850_v37 = vld [vmem:[#allocation9 + $0xb8] sm:$0xff] }
 0x4bf   :  { %v2177_v43 = vpop.eup %2176  ;;  %v2793_v44 = vadd.f32 1e-05, %v406_v38 }
 0x4c0   :  { %v410_v48 = vmul.f32 %v2177_v43, %v407_v32  ;;  %vm416_vm6 = vweird.f32 %v2177_v43 }
 0x4c1   :  { %2178 = vrsqrt.f32 %v2793_v44  ;;  %vm417_vm8 = vmor %vm415_vm7, %vm416_vm6  ;;  %vm425_vm10 = vweird.f32 %v2793_v44 }
 0x4c2   :  { %v411_v51 = vmul.f32 %v2177_v43, %v410_v48  ;;  %v2855_v48 = vld [vmem:[#allocation9 + $0xa0] sm:$0xff] }
 0x4c4   :  { %v412_v52 = vmul.f32 0.5, %v411_v51 }
 0x4c6   :  { %v413_v56 = vsub.f32 1.5, %v412_v52 }
 0x4c7   :  { %v2179_v60 = vpop.eup %2178 }
 0x4c8   :  { %v414_v63 = vmul.f32 %v2177_v43, %v413_v56  ;;  %v420_v0 = vmul.f32 %v2179_v60, %v2793_v44  ;;  %vm426_vm9 = vweird.f32 %v2179_v60  ;;  %v2861_v44 = vld [vmem:[#allocation9 + $0x88] sm:$0xff] }
 0x4c9   :  { %vm427_vm11 = vmor %vm425_vm10, %vm426_vm9 }
 0x4ca   :  { %v418_v4 = vsel %vm417_vm8, %v2177_v43, %v414_v63  ;;  %v421_v7 = vmul.f32 %v2179_v60, %v420_v0  ;;  %v2870_v63 = vld [vmem:[#allocation9 + $0x58] sm:$0xff] }
 0x4cb   :  { %v429_v12 = vmul.f32 %v418_v4, %v2686_v22  ;;  %v2844_v22 = vld [vmem:[#allocation9 + $0xd0] sm:$0xff]  ;;  %v2876_v4 = vld [vmem:[#allocation9 + $0x40] sm:$0xff] }
 0x4cc   :  { %v422_v15 = vmul.f32 0.5, %v421_v7  ;;  %726 = vmatpush.msra.mxu0 %v2844_v22  ;;  %3608 = vst [vmem:[#allocation26_spill] sm:$0xff] %v2876_v4  ;;  %957 = vmatpush.msrb.mxu2 %v2844_v22 }
 0x4cd   :  { %v431_v21 = vmul.f32 %v429_v12, %v353_v8  ;;  %v2885_v12 = vld [vmem:[#allocation9 + $0x10] sm:$0xff] }
 0x4ce   :  { %v423_v25 = vsub.f32 1.5, %v422_v15  ;;  %727 = vmatpush.msra.mxu0 %v2850_v37  ;;  %3610 = vst [vmem:[#allocation28_spill] sm:$0xff] %v2885_v12  ;;  %958 = vmatpush.msrb.mxu2 %v2850_v37 }
 0x4cf   :  { %v433_v27 = vadd.f32 %v431_v21, %v354_v16 }
 0x4d0   :  { %v424_v32 = vmul.f32 %v2179_v60, %v423_v25  ;;  %728 = vmatpush.msra.mxu0 %v2855_v48  ;;  %959 = vmatpush.msrb.mxu2 %v2855_v48 }
 0x4d1   :  { %vm435_vm12 = vcmp.ge.f32.partialorder %v433_v27, 0.0  ;;  %v437_v38 = vmul.f32 0.01, %v433_v27 }
 0x4d2   :  { %v428_v43 = vsel %vm427_vm11, %v2179_v60, %v424_v32  ;;  %v2864_v60 = vld [vmem:[#allocation9 + $0x70] sm:$0xff]  ;;  %729 = vmatpush.msra.mxu0 %v2861_v44  ;;  %960 = vmatpush.msrb.mxu2 %v2861_v44 }
 0x4d3   :  { %v430_v51 = vmul.f32 %v428_v43, %v2691_v26  ;;  %v439_v52 = vsel %vm435_vm12, %v433_v27, %v437_v38  ;;  %v2991_v43 = vld [vmem:[%s3571_s10 + $0x1a] ss:$8 sm:$0x7] }
 0x4d4   :  { %514 = vmatmul.f32.vlgmr.msra.gmra.mxu3 %v439_v52  ;;  %537 = vmatmul.f32.vlgmr.msrb.gmra.mxu0 %v439_v52 }
 0x4d5   :  { %560 = vmatmul.f32.vlgmr.msrb.gmra.mxu1 %v439_v52  ;;  %v432_v56 = vmul.f32 %v430_v51, %v353_v8  ;;  %834 = vmatpush.msra.mxu3 %v2791_v42  ;;  %v2882_v8 = vld [vmem:[#allocation9 + $0x28] sm:$0xff] }
 0x4d6   :  { %730 = vmatpush.msra.mxu0 %v2864_v60  ;;  %930 = vmatpush.msrb.mxu1 %v2706_v58  ;;  %3609 = vst [vmem:[#allocation27_spill] sm:$0xff] %v2882_v8 }
 0x4d7   :  { %v434_v26 = vadd.f32 %v432_v56, %v354_v16  ;;  %835 = vmatpush.msra.mxu3 %v2809_v54  ;;  %961 = vmatpush.msrb.mxu2 %v2864_v60 }
 0x4d8   :  { %731 = vmatpush.msra.mxu0 %v2870_v63  ;;  %931 = vmatpush.msrb.mxu1 %v2712_v62 }
 0x4d9   :  { %vm436_vm13 = vcmp.ge.f32.partialorder %v434_v26, 0.0  ;;  %v438_v0 = vmul.f32 0.01, %v434_v26  ;;  %836 = vmatpush.msra.mxu3 %v2811_v55  ;;  %962 = vmatpush.msrb.mxu2 %v2870_v63 }
 0x4da   :  { %732 = vmatpush.msra.mxu0 %v2876_v4  ;;  %932 = vmatpush.msrb.mxu1 %v2718_v2 }
 0x4db   :  { %v440_v7 = vsel %vm436_vm13, %v434_v26, %v438_v0  ;;  %837 = vmatpush.msra.mxu3 %v2816_v59  ;;  %963 = vmatpush.msrb.mxu2 %v2876_v4 }
 0x4dc   :  { %517 = vmatmul.f32.gmra.mxu3 %v440_v7  ;;  %540 = vmatmul.f32.gmra.mxu0 %v440_v7 }
 0x4dd   :  { %563 = vmatmul.f32.gmra.mxu1 %v440_v7  ;;  %733 = vmatpush.msra.mxu0 %v2882_v8  ;;  %v2994_v7 = vperm.slane %v2991_v43, 0 }
 0x4de   :  { %838 = vmatpush.msra.mxu3 %v2822_v3  ;;  %933 = vmatpush.msrb.mxu1 %v2724_v6 }
 0x4df   :  { %734 = vmatpush.msra.mxu0 %v2885_v12  ;;  %964 = vmatpush.msrb.mxu2 %v2882_v8  ;;  %3611 = vst [vmem:[#allocation29_spill] sm:$0xff] %v2994_v7 }
 0x4e0   :  { %839 = vmatpush.msra.mxu3 %v2830_v11  ;;  %934 = vmatpush.msrb.mxu1 %v2730_v10 }
 0x4e1   :  { %910 = vmatpush.msrb.mxu0 %v2695_v45  ;;  %965 = vmatpush.msrb.mxu2 %v2885_v12 }
 0x4e2   :  { %840 = vmatpush.msra.mxu3 %v2839_v20  ;;  %935 = vmatpush.msrb.mxu1 %v2736_v14 }
 0x4e3   :  { %911 = vmatpush.msrb.mxu0 %v2698_v49 }
 0x4e4   :  { %715 = vmatmul.f32.vlgmr.msrb.gmra.mxu3 %v2544_v46  ;;  %735 = vmatmul.f32.vlgmr.msra.gmra.mxu0 %v2544_v46  ;;  %v2122_v46 = vld [vmem:[%s3571_s10 + $0x19] ss:$8 sm:$0x7] }
 0x4e5   :  { %841 = vmatpush.msra.mxu3 %v2844_v22  ;;  %912 = vmatpush.msrb.mxu0 %v2701_v53  ;;  %v493_v15 = vperm.slane %v2122_v46, 1  ;;  %v494_v21 = vperm.slane %v2122_v46, 2  ;;  %v492_v32 = vperm.slane %v2122_v46, 0 }
 0x4e6   :  { %936 = vmatpush.msrb.mxu1 %v2742_v18 }
 0x4e7   :  { %842 = vmatpush.msra.mxu3 %v2850_v37  ;;  %913 = vmatpush.msrb.mxu0 %v2704_v57 }
 0x4e8   :  { %937 = vmatpush.msrb.mxu1 %v2748_v24 }
 0x4e9   :  { %843 = vmatpush.msra.mxu3 %v2855_v48  ;;  %914 = vmatpush.msrb.mxu0 %v2710_v61 }
 0x4ea   :  { %938 = vmatpush.msrb.mxu1 %v2755_v29 }
 0x4eb   :  { %844 = vmatpush.msra.mxu3 %v2861_v44  ;;  %915 = vmatpush.msrb.mxu0 %v2716_v1 }
 0x4ec   :  { %939 = vmatpush.msrb.mxu1 %v2762_v31 }
 0x4ed   :  { %845 = vmatpush.msra.mxu3 %v2864_v60  ;;  %916 = vmatpush.msrb.mxu0 %v2722_v5 }
 0x4ee   :  { %940 = vmatpush.msrb.mxu1 %v2766_v34 }
 0x4ef   :  { %846 = vmatpush.msra.mxu3 %v2870_v63  ;;  %917 = vmatpush.msrb.mxu0 %v2728_v9 }
 0x4f0   :  { %941 = vmatpush.msrb.mxu1 %v2773_v36 }
 0x4f1   :  { %847 = vmatpush.msra.mxu3 %v2876_v4  ;;  %918 = vmatpush.msrb.mxu0 %v2734_v13 }
 0x4f2   :  { %942 = vmatpush.msrb.mxu1 %v2784_v40 }
 0x4f3   :  { %848 = vmatpush.msra.mxu3 %v2882_v8  ;;  %919 = vmatpush.msrb.mxu0 %v2740_v17 }
 0x4f4   :  { %943 = vmatpush.msrb.mxu1 %v2786_v41 }
 0x4f5   :  { %849 = vmatpush.msra.mxu3 %v2885_v12  ;;  %920 = vmatpush.msrb.mxu0 %v2746_v23 }
 0x4f6   :  { %944 = vmatpush.msrb.mxu1 %v2796_v47 }
 0x4f7   :  { %921 = vmatpush.msrb.mxu0 %v2753_v28  ;;  %1026 = vmatpush.msrb.mxu3 %v2695_v45 }
 0x4f8   :  { %945 = vmatpush.msrb.mxu1 %v2802_v50 }
 0x4f9   :  { %922 = vmatpush.msrb.mxu0 %v2757_v30  ;;  %1027 = vmatpush.msrb.mxu3 %v2698_v49 }
 0x4fb   :  { %923 = vmatpush.msrb.mxu0 %v2764_v33  ;;  %1028 = vmatpush.msrb.mxu3 %v2701_v53 }
 0x4fd   :  { %924 = vmatpush.msrb.mxu0 %v2771_v35  ;;  %1029 = vmatpush.msrb.mxu3 %v2704_v57 }
 0x4ff   :  { %925 = vmatpush.msrb.mxu0 %v2782_v39  ;;  %1030 = vmatpush.msrb.mxu3 %v2710_v61 }
 0x501   :  { %1046 = vmatpush.msra.mxu0 %v2706_v58  ;;  %1031 = vmatpush.msrb.mxu3 %v2716_v1 }
 0x503   :  { %1047 = vmatpush.msra.mxu0 %v2712_v62  ;;  %1032 = vmatpush.msrb.mxu3 %v2722_v5 }
 0x505   :  { %1048 = vmatpush.msra.mxu0 %v2718_v2  ;;  %1033 = vmatpush.msrb.mxu3 %v2728_v9 }
 0x507   :  { %1049 = vmatpush.msra.mxu0 %v2724_v6  ;;  %1034 = vmatpush.msrb.mxu3 %v2734_v13 }
 0x509   :  { %1050 = vmatpush.msra.mxu0 %v2730_v10  ;;  %1035 = vmatpush.msrb.mxu3 %v2740_v17 }
 0x50b   :  { %1051 = vmatpush.msra.mxu0 %v2736_v14  ;;  %1036 = vmatpush.msrb.mxu3 %v2746_v23 }
 0x50d   :  { %1052 = vmatpush.msra.mxu0 %v2742_v18  ;;  %1037 = vmatpush.msrb.mxu3 %v2753_v28 }
 0x50f   :  { %1053 = vmatpush.msra.mxu0 %v2748_v24  ;;  %1038 = vmatpush.msrb.mxu3 %v2757_v30 }
 0x511   :  { %1054 = vmatpush.msra.mxu0 %v2755_v29  ;;  %1039 = vmatpush.msrb.mxu3 %v2764_v33  ;;  %v696_v33 = vpop.f32.mrf.mxu2 }
 0x513   :  { %1055 = vmatpush.msra.mxu0 %v2762_v31  ;;  %1040 = vmatpush.msrb.mxu3 %v2771_v35 }
 0x515   :  { %1056 = vmatpush.msra.mxu0 %v2766_v34  ;;  %1041 = vmatpush.msrb.mxu3 %v2782_v39 }
 0x517   :  { %1057 = vmatpush.msra.mxu0 %v2773_v36 }
 0x519   :  { %1058 = vmatpush.msra.mxu0 %v2784_v40 }
 0x51b   :  { %1059 = vmatpush.msra.mxu0 %v2786_v41 }
 0x51d   :  { %1060 = vmatpush.msra.mxu0 %v2796_v47 }
 0x51f   :  { %1061 = vmatpush.msra.mxu0 %v2802_v50 }
 0x551   :  { %v538_v16 = vpop.f32.mrf.mxu0 }
 0x552   :  { %v561_v25 = vpop.f32.mrf.mxu1  ;;  %v539_v27 = vadd.f32 %v538_v16, %v493_v15 }
 0x553   :  { %v562_v38 = vadd.f32 %v561_v25, %v494_v21 }
 0x554   :  { %v573_v52 = vrot.slane %v539_v27, 6 }
 0x555   :  { %v574_v26 = vrot.slane %v562_v38, 4 }
 0x557   :  { %v515_v51 = vpop.f32.mrf.mxu3 }
 0x558   :  { %v516_v56 = vadd.f32 %v515_v51, %v492_v32 }
 0x559   :  { %v541_v0 = vpop.f32.mrf.mxu0 }
 0x55a   :  { %v578_v46 = vsel %vm577_vm14, %v516_v56, %v573_v52  ;;  %v582_v16 = vsel %vm581_vm15, %v516_v56, %v573_v52  ;;  %v587_v25 = vsel %vm586_vm0, %v516_v56, %v573_v52  ;;  %v591_v19 = vsel %vm590_vm1, %v573_v52, %v516_v56  ;;  %v564_v50 = vpop.f32.mrf.mxu1 }
 0x55b   :  { %v580_v39 = vsel %vm579_vm2, %v578_v46, %v574_v26  ;;  %v584_v27 = vsel %vm583_vm3, %v582_v16, %v574_v26  ;;  %v588_v51 = vsel %vm579_vm2, %v574_v26, %v587_v25  ;;  %v592_v38 = vsel %vm583_vm3, %v574_v26, %v591_v19 }
 0x55c   :  { %v585_v12 = vrot.slane %v584_v27, 2  ;;  %v589_v47 = vrot.slane %v588_v51, 4  ;;  %v593_v35 = vrot.slane %v592_v38, 6  ;;  %613 = vst [vmem:[#allocation2] sm:$0x3f] %v580_v39  ;;  %v542_v8 = vadd.f32 %v541_v0, %v493_v15 }
 0x55d   :  { %v565_v41 = vadd.f32 %v564_v50, %v494_v21  ;;  %v697_v46 = vadd.f32 %v696_v33, %v2994_v7  ;;  %v3006_v25 = vperm.slane %v2991_v43, 1 }
 0x55e   :  { %614 = vst [vmem:[#allocation2 + $0x6] sm:$0x3f] %v585_v12  ;;  %v575_v52 = vrot.slane %v542_v8, 6 }
 0x55f   :  { %615 = vst [vmem:[#allocation2 + $0xc] sm:$0x3f] %v589_v47  ;;  %v518_v4 = vpop.f32.mrf.mxu3  ;;  %v576_v16 = vrot.slane %v565_v41, 4 }
 0x560   :  { %616 = vst [vmem:[#allocation2 + $0x12] sm:$0x3f] %v593_v35  ;;  %v519_v56 = vadd.f32 %v518_v4, %v492_v32 }
 0x561   :  { %3612 = vst [vmem:[#allocation30_spill] sm:$0xff] %v3006_v25 }
 0x562   :  { %v594_v19 = vsel %vm577_vm14, %v519_v56, %v575_v52  ;;  %v596_v26 = vsel %vm581_vm15, %v519_v56, %v575_v52  ;;  %v599_v39 = vsel %vm586_vm0, %v519_v56, %v575_v52  ;;  %v602_v50 = vsel %vm590_vm1, %v575_v52, %v519_v56 }
 0x563   :  { %v595_v47 = vsel %vm579_vm2, %v594_v19, %v576_v16  ;;  %v597_v35 = vsel %vm583_vm3, %v596_v26, %v576_v16  ;;  %v600_v4 = vsel %vm579_vm2, %v576_v16, %v599_v39  ;;  %v603_v33 = vsel %vm583_vm3, %v576_v16, %v602_v50  ;;  %v671_v41 = vld [vmem:[#allocation2] sm:$0x3f] }
 0x564   :  { %v598_v8 = vrot.slane %v597_v35, 2  ;;  %v601_v12 = vrot.slane %v600_v4, 4  ;;  %v604_v15 = vrot.slane %v603_v33, 6  ;;  %617 = vst [vmem:[#allocation2 + $0x18] sm:$0x3f] %v595_v47  ;;  %v739_v21 = vadd.f32 %v697_v46, %v671_v41  ;;  %v736_v35 = vpop.f32.mrf.mxu0 }
 0x565   :  { %v760_v51 = vrot.slane %v671_v41, 2  ;;  %v3018_v50 = vperm.slane %v2991_v43, 2  ;;  %v783_v43 = vrot.slane %v671_v41, 4 }
 0x566   :  { %618 = vst [vmem:[#allocation2 + $0x1e] sm:$0x3f] %v598_v8  ;;  %v2124_v32 = vmul.f32 -1.442695, %v739_v21 }
 0x567   :  { %619 = vst [vmem:[#allocation2 + $0x24] sm:$0x3f] %v601_v12  ;;  %v716_v0 = vpop.f32.mrf.mxu3  ;;  %v737_v21 = vadd.f32 %v736_v35, %v3018_v50 }
 0x568   :  { %620 = vst [vmem:[#allocation2 + $0x2a] sm:$0x3f] %v604_v15  ;;  %2180 = vpow2.f32 %v2124_v32  ;;  %v717_v27 = vadd.f32 %v716_v0, %v3006_v25  ;;  %v3623_v41 = vld [vmem:[#allocation30_spill] sm:$0xff] }
 0x56a   :  { %v762_v38 = vadd.f32 %v760_v51, %v717_v27 }
 0x56c   :  { %v2125_v52 = vmul.f32 -1.442695, %v762_v38 }
 0x56e   :  { %v2181_v56 = vpop.eup %2180  ;;  %2182 = vpow2.f32 %v2125_v52 }
 0x56f   :  { %v743_v16 = vadd.f32 1.0, %v2181_v56 }
 0x571   :  { %2184 = vrcp.f32 %v743_v16  ;;  %v755_v4 = vand.u32 2147483648, %v743_v16  ;;  %v753_v8 = vand.u32 2147483647, %v743_v16  ;;  %vm749_vm5 = vweird.f32 %v743_v16 }
 0x573   :  { %v756_v0 = vor.u32 1.1754944e-38, %v755_v4  ;;  %vm754_vm7 = vcmp.eq.f32.partialorder %v753_v8, 8.507059e+37 }
 0x574   :  { %v2183_v19 = vpop.eup %2182 }
 0x575   :  { %v766_v26 = vadd.f32 1.0, %v2183_v19 }
 0x577   :  { %v2185_v39 = vpop.eup %2184  ;;  %2186 = vrcp.f32 %v766_v26  ;;  %v778_v56 = vand.u32 2147483648, %v766_v26  ;;  %vm772_vm9 = vweird.f32 %v766_v26 }
 0x578   :  { %v745_v46 = vmul.f32 %v2185_v39, %v743_v16  ;;  %vm750_vm4 = vweird.f32 %v2185_v39 }
 0x579   :  { %vm751_vm6 = vmor %vm749_vm5, %vm750_vm4  ;;  %v779_v7 = vor.u32 1.1754944e-38, %v778_v56 }
 0x57a   :  { %v746_v47 = vsub.f32 1.0, %v745_v46  ;;  %v776_v46 = vand.u32 2147483647, %v766_v26 }
 0x57c   :  { %v747_v33 = vmul.f32 %v2185_v39, %v746_v47  ;;  %vm777_vm11 = vcmp.eq.f32.partialorder %v776_v46, 8.507059e+37 }
 0x57d   :  { %v2187_v12 = vpop.eup %2186 }
 0x57e   :  { %v768_v15 = vmul.f32 %v2187_v12, %v766_v26  ;;  %v748_v32 = vadd.f32 %v2185_v39, %v747_v33  ;;  %vm773_vm8 = vweird.f32 %v2187_v12 }
 0x57f   :  { %vm774_vm10 = vmor %vm772_vm9, %vm773_vm8 }
 0x580   :  { %v769_v27 = vsub.f32 1.0, %v768_v15  ;;  %v752_v51 = vsel %vm751_vm6, %v2185_v39, %v748_v32 }
 0x581   :  { %v757_v38 = vsel %vm754_vm7, %v756_v0, %v752_v51 }
 0x582   :  { %v770_v52 = vmul.f32 %v2187_v12, %v769_v27  ;;  %v782_v19 = vmul.f32 %v757_v38, %v737_v21 }
 0x584   :  { %v771_v47 = vadd.f32 %v2187_v12, %v770_v52  ;;  %v785_v25 = vadd.f32 %v783_v43, %v782_v19 }
 0x586   :  { %v775_v35 = vsel %vm774_vm10, %v2187_v12, %v771_v47  ;;  %2188 = vtanh.f32 %v785_v25 }
 0x587   :  { %v780_v16 = vsel %vm777_vm11, %v779_v7, %v775_v35 }
 0x588   :  { %v787_v4 = vsub.f32 1.0, %v780_v16  ;;  %v789_v8 = vmul.f32 0.0, %v780_v16 }
 0x58c   :  { %v2189_v33 = vpop.eup %2188 }
 0x58d   :  { %v788_v39 = vmul.f32 %v2189_v33, %v787_v4 }
 0x58f   :  { %v3021_v15 = vadd.f32 %v789_v8, %v788_v39 }
 0x591   :  { %791 = vst [vmem:[#allocation3] sm:$0x3] %v3021_v15  ;;  %810 = vmatmul.f32.vlgmr.msra.gmra.mxu1 %v3021_v15  ;;  %830 = vmatmul.f32.vlgmr.msra.gmra.mxu2 %v3021_v15 }
 0x592   :  { %850 = vmatmul.f32.vlgmr.msra.gmra.mxu3 %v3021_v15  ;;  %1066 = vmatpush.msra.mxu1 %v2791_v42 }
 0x593   :  { %1142 = vmatpush.msra.mxu2 %v2695_v45  ;;  %1162 = vmatpush.msra.mxu3 %v2706_v58  ;;  %v3613_v45 = vld [vmem:[#allocation26_spill] sm:$0xff]  ;;  %v3617_v58 = vld [vmem:[#allocation21_spill] sm:$0xff] }
 0x594   :  { %1067 = vmatpush.msra.mxu1 %v2809_v54 }
 0x595   :  { %1143 = vmatpush.msra.mxu2 %v2698_v49  ;;  %1163 = vmatpush.msra.mxu3 %v2712_v62  ;;  %v3614_v49 = vld [vmem:[#allocation20_spill] sm:$0xff] }
 0x596   :  { %1068 = vmatpush.msra.mxu1 %v2811_v55  ;;  %v3619_v62 = vld [vmem:[#allocation28_spill] sm:$0xff] }
 0x597   :  { %1144 = vmatpush.msra.mxu2 %v2701_v53  ;;  %1164 = vmatpush.msra.mxu3 %v2718_v2  ;;  %v3615_v53 = vld [vmem:[#allocation23_spill] sm:$0xff]  ;;  %v3621_v2 = vld [vmem:[#allocation25_spill] sm:$0xff] }
 0x598   :  { %1069 = vmatpush.msra.mxu1 %v2816_v59  ;;  %v1604_v7 = vld [vmem:[#allocation3] sm:$0x3] }
 0x599   :  { %1145 = vmatpush.msra.mxu2 %v2704_v57  ;;  %1165 = vmatpush.msra.mxu3 %v2724_v6  ;;  %1639 = vst [vmem:[#allocation1] ss:$4 sm:$0xff] %v1604_v7  ;;  %v3616_v57 = vld [vmem:[#allocation27_spill] sm:$0xff]  ;;  %v3622_v6 = vld [vmem:[#allocation29_spill] sm:$0xff] }
 0x59a   :  { %1070 = vmatpush.msra.mxu1 %v2822_v3 }
 0x59b   :  { %1146 = vmatpush.msra.mxu2 %v2710_v61  ;;  %1166 = vmatpush.msra.mxu3 %v2730_v10  ;;  %v3618_v61 = vld [vmem:[#allocation24_spill] sm:$0xff] }
 0x59c   :  { %1071 = vmatpush.msra.mxu1 %v2830_v11  ;;  %v793_v10 = vld [vmem:[#allocation2 + $0x6] sm:$0x3f] }
 0x59d   :  { %1147 = vmatpush.msra.mxu2 %v2716_v1  ;;  %1167 = vmatpush.msra.mxu3 %v2736_v14  ;;  %v3620_v1 = vld [vmem:[#allocation22_spill] sm:$0xff]  ;;  %v875_v12 = vrot.slane %v793_v10, 2 }
 0x59e   :  { %1072 = vmatpush.msra.mxu1 %v2839_v20 }
 0x59f   :  { %1148 = vmatpush.msra.mxu2 %v2722_v5  ;;  %1168 = vmatpush.msra.mxu3 %v2742_v18 }
 0x5a0   :  { %1073 = vmatpush.msra.mxu1 %v2844_v22 }
 0x5a1   :  { %1149 = vmatpush.msra.mxu2 %v2728_v9  ;;  %1169 = vmatpush.msra.mxu3 %v2748_v24 }
 0x5a2   :  { %1074 = vmatpush.msra.mxu1 %v2850_v37 }
 0x5a3   :  { %1150 = vmatpush.msra.mxu2 %v2734_v13  ;;  %1170 = vmatpush.msra.mxu3 %v2755_v29 }
 0x5a4   :  { %1075 = vmatpush.msra.mxu1 %v2855_v48 }
 0x5a5   :  { %1151 = vmatpush.msra.mxu2 %v2740_v17  ;;  %1171 = vmatpush.msra.mxu3 %v2762_v31 }
 0x5a6   :  { %1076 = vmatpush.msra.mxu1 %v2861_v44 }
 0x5a7   :  { %1152 = vmatpush.msra.mxu2 %v2746_v23  ;;  %1172 = vmatpush.msra.mxu3 %v2766_v34 }
 0x5a8   :  { %1077 = vmatpush.msra.mxu1 %v2864_v60 }
 0x5a9   :  { %1153 = vmatpush.msra.mxu2 %v2753_v28  ;;  %1173 = vmatpush.msra.mxu3 %v2773_v36 }
 0x5aa   :  { %1078 = vmatpush.msra.mxu1 %v2870_v63 }
 0x5ab   :  { %1154 = vmatpush.msra.mxu2 %v2757_v30  ;;  %1174 = vmatpush.msra.mxu3 %v2784_v40 }
 0x5ac   :  { %1079 = vmatpush.msra.mxu1 %v3613_v45 }
 0x5ad   :  { %1155 = vmatpush.msra.mxu2 %v3614_v49  ;;  %1175 = vmatpush.msra.mxu3 %v3615_v53 }
 0x5ae   :  { %1080 = vmatpush.msra.mxu1 %v3616_v57 }
 0x5af   :  { %1156 = vmatpush.msra.mxu2 %v3617_v58  ;;  %1176 = vmatpush.msra.mxu3 %v3618_v61 }
 0x5b0   :  { %1081 = vmatpush.msra.mxu1 %v3619_v62 }
 0x5b1   :  { %1157 = vmatpush.msra.mxu2 %v3620_v1  ;;  %1177 = vmatpush.msra.mxu3 %v3621_v2 }
 0x60e   :  { %v811_v5 = vpop.f32.mrf.mxu1 }
 0x60f   :  { %v812_v9 = vadd.f32 %v811_v5, %v3622_v6 }
 0x611   :  { %v854_v13 = vadd.f32 %v812_v9, %v793_v10 }
 0x613   :  { %v2126_v17 = vmul.f32 -1.442695, %v854_v13  ;;  %v898_v13 = vrot.slane %v793_v10, 4 }
 0x614   :  { %v831_v25 = vpop.f32.mrf.mxu2 }
 0x615   :  { %2190 = vpow2.f32 %v2126_v17  ;;  %v832_v26 = vadd.f32 %v831_v25, %v3623_v41  ;;  %v851_v16 = vpop.f32.mrf.mxu3 }
 0x616   :  { %v852_v7 = vadd.f32 %v851_v16, %v3018_v50  ;;  %v3107_v16 = vld [vmem:[#allocation9 + $0x120] sm:$0xff] }
 0x617   :  { %v877_v21 = vadd.f32 %v875_v12, %v832_v26 }
 0x619   :  { %v2127_v32 = vmul.f32 -1.442695, %v877_v21 }
 0x61b   :  { %v2191_v0 = vpop.eup %2190  ;;  %2192 = vpow2.f32 %v2127_v32 }
 0x61c   :  { %v858_v27 = vadd.f32 1.0, %v2191_v0 }
 0x61e   :  { %2194 = vrcp.f32 %v858_v27  ;;  %v870_v19 = vand.u32 2147483648, %v858_v27  ;;  %v868_v47 = vand.u32 2147483647, %v858_v27  ;;  %vm864_vm13 = vweird.f32 %v858_v27 }
 0x620   :  { %v871_v39 = vor.u32 1.1754944e-38, %v870_v19  ;;  %vm869_vm15 = vcmp.eq.f32.partialorder %v868_v47, 8.507059e+37  ;;  %v3096_v47 = vld [vmem:[#allocation9 + $0x158] sm:$0xff] }
 0x621   :  { %v2193_v51 = vpop.eup %2192 }
 0x622   :  { %v881_v38 = vadd.f32 1.0, %v2193_v51 }
 0x624   :  { %v2195_v43 = vpop.eup %2194  ;;  %2196 = vrcp.f32 %v881_v38  ;;  %v893_v25 = vand.u32 2147483648, %v881_v38  ;;  %v891_v12 = vand.u32 2147483647, %v881_v38  ;;  %vm887_vm1 = vweird.f32 %v881_v38 }
 0x625   :  { %v860_v52 = vmul.f32 %v2195_v43, %v858_v27  ;;  %vm865_vm12 = vweird.f32 %v2195_v43 }
 0x626   :  { %vm866_vm14 = vmor %vm864_vm13, %vm865_vm12  ;;  %v894_v0 = vor.u32 1.1754944e-38, %v893_v25  ;;  %vm892_vm3 = vcmp.eq.f32.partialorder %v891_v12, 8.507059e+37 }
 0x627   :  { %v861_v56 = vsub.f32 1.0, %v860_v52 }
 0x629   :  { %v862_v46 = vmul.f32 %v2195_v43, %v861_v56 }
 0x62a   :  { %v2197_v35 = vpop.eup %2196 }
 0x62b   :  { %v883_v4 = vmul.f32 %v2197_v35, %v881_v38  ;;  %v863_v33 = vadd.f32 %v2195_v43, %v862_v46  ;;  %vm888_vm0 = vweird.f32 %v2197_v35  ;;  %v3086_v38 = vld [vmem:[#allocation9 + $0x168] sm:$0xff]  ;;  %v3089_v46 = vld [vmem:[#allocation9 + $0x170] sm:$0xff] }
 0x62c   :  { %vm889_vm2 = vmor %vm887_vm1, %vm888_vm0 }
 0x62d   :  { %v884_v8 = vsub.f32 1.0, %v883_v4  ;;  %v867_v5 = vsel %vm866_vm14, %v2195_v43, %v863_v33  ;;  %v3110_v4 = vld [vmem:[#allocation9 + $0x128] sm:$0xff]  ;;  %v3117_v33 = vld [vmem:[#allocation9 + $0x110] sm:$0xff] }
 0x62e   :  { %v872_v9 = vsel %vm869_vm15, %v871_v39, %v867_v5  ;;  %v3126_v39 = vld [vmem:[#allocation9 + $0xd8] sm:$0xff] }
 0x62f   :  { %v885_v17 = vmul.f32 %v2197_v35, %v884_v8  ;;  %v897_v26 = vmul.f32 %v872_v9, %v852_v7 }
 0x631   :  { %v886_v21 = vadd.f32 %v2197_v35, %v885_v17  ;;  %v900_v32 = vadd.f32 %v898_v13, %v897_v26 }
 0x633   :  { %v890_v27 = vsel %vm889_vm2, %v2197_v35, %v886_v21  ;;  %2198 = vtanh.f32 %v900_v32  ;;  %v3103_v35 = vld [vmem:[#allocation9 + $0x140] sm:$0xff] }
 0x634   :  { %v895_v51 = vsel %vm892_vm3, %v894_v0, %v890_v27 }
 0x635   :  { %v902_v52 = vsub.f32 1.0, %v895_v51  ;;  %v904_v19 = vmul.f32 %v895_v51, %v3021_v15  ;;  %v3093_v15 = vld [vmem:[#allocation9 + $0x150] sm:$0xff] }
 0x639   :  { %v2199_v56 = vpop.eup %2198 }
 0x63a   :  { %v903_v43 = vmul.f32 %v2199_v56, %v902_v52 }
 0x63c   :  { %v3079_v10 = vadd.f32 %v904_v19, %v903_v43 }
 0x63e   :  { %907 = vst [vmem:[#allocation3 + $0x2] sm:$0x3] %v3079_v10  ;;  %926 = vmatmul.f32.vlgmr.msrb.gmra.mxu0 %v3079_v10  ;;  %946 = vmatmul.f32.vlgmr.msrb.gmra.mxu1 %v3079_v10 }
 0x63f   :  { %966 = vmatmul.f32.vlgmr.msrb.gmra.mxu2 %v3079_v10  ;;  %1182 = vmatpush.msrb.mxu0 %v2791_v42  ;;  %v3100_v42 = vld [vmem:[#allocation9 + $0x138] sm:$0xff] }
 0x640   :  { %1258 = vmatpush.msrb.mxu1 %v3086_v38  ;;  %1278 = vmatpush.msrb.mxu2 %v3089_v46 }
 0x641   :  { %1183 = vmatpush.msrb.mxu0 %v2809_v54 }
 0x642   :  { %1259 = vmatpush.msrb.mxu1 %v3093_v15  ;;  %1279 = vmatpush.msrb.mxu2 %v3096_v47 }
 0x643   :  { %1184 = vmatpush.msrb.mxu0 %v2811_v55  ;;  %v3114_v55 = vld [vmem:[#allocation9 + $0x108] sm:$0xff] }
 0x644   :  { %1260 = vmatpush.msrb.mxu1 %v3100_v42  ;;  %1280 = vmatpush.msrb.mxu2 %v3103_v35 }
 0x645   :  { %1185 = vmatpush.msrb.mxu0 %v2816_v59  ;;  %v1605_v54 = vld [vmem:[#allocation3 + $0x2] sm:$0x3] }
 0x646   :  { %1261 = vmatpush.msrb.mxu1 %v3107_v16  ;;  %1281 = vmatpush.msrb.mxu2 %v3110_v4  ;;  %1641 = vst [vmem:[#allocation1 + $0x1] ss:$4 sm:$0xff] %v1605_v54  ;;  %v3121_v59 = vld [vmem:[#allocation9 + $0xf0] sm:$0xff] }
 0x647   :  { %1186 = vmatpush.msrb.mxu0 %v2822_v3  ;;  %v3131_v3 = vld [vmem:[#allocation9 + $0xc0] sm:$0xff] }
 0x648   :  { %1262 = vmatpush.msrb.mxu1 %v3114_v55  ;;  %1282 = vmatpush.msrb.mxu2 %v3117_v33 }
 0x649   :  { %1187 = vmatpush.msrb.mxu0 %v2830_v11  ;;  %v3136_v11 = vld [vmem:[#allocation9 + $0xa8] sm:$0xff] }
 0x64a   :  { %1263 = vmatpush.msrb.mxu1 %v3121_v59  ;;  %1283 = vmatpush.msrb.mxu2 %v2736_v14  ;;  %v3141_v14 = vld [vmem:[#allocation9 + $0x90] sm:$0xff] }
 0x64b   :  { %1188 = vmatpush.msrb.mxu0 %v2839_v20 }
 0x64c   :  { %1264 = vmatpush.msrb.mxu1 %v3126_v39  ;;  %1284 = vmatpush.msrb.mxu2 %v2742_v18  ;;  %v909_v18 = vld [vmem:[#allocation2 + $0xc] sm:$0x3f] }
 0x64d   :  { %1189 = vmatpush.msrb.mxu0 %v2844_v22  ;;  %v1014_v52 = vrot.slane %v909_v18, 4 }
 0x64e   :  { %1265 = vmatpush.msrb.mxu1 %v3131_v3  ;;  %1285 = vmatpush.msrb.mxu2 %v2748_v24 }
 0x64f   :  { %1190 = vmatpush.msrb.mxu0 %v2850_v37 }
 0x650   :  { %1266 = vmatpush.msrb.mxu1 %v3136_v11  ;;  %1286 = vmatpush.msrb.mxu2 %v2755_v29 }
 0x651   :  { %1191 = vmatpush.msrb.mxu0 %v2855_v48 }
 0x652   :  { %1267 = vmatpush.msrb.mxu1 %v3141_v14  ;;  %1287 = vmatpush.msrb.mxu2 %v2762_v31 }
 0x653   :  { %1192 = vmatpush.msrb.mxu0 %v2861_v44 }
 0x654   :  { %1268 = vmatpush.msrb.mxu1 %v2746_v23  ;;  %1288 = vmatpush.msrb.mxu2 %v2766_v34 }
 0x655   :  { %1193 = vmatpush.msrb.mxu0 %v2864_v60 }
 0x656   :  { %1269 = vmatpush.msrb.mxu1 %v2753_v28  ;;  %1289 = vmatpush.msrb.mxu2 %v2773_v36 }
 0x657   :  { %1194 = vmatpush.msrb.mxu0 %v2870_v63 }
 0x658   :  { %1270 = vmatpush.msrb.mxu1 %v2757_v30  ;;  %1290 = vmatpush.msrb.mxu2 %v2784_v40  ;;  %v991_v30 = vrot.slane %v909_v18, 2 }
 0x659   :  { %1195 = vmatpush.msrb.mxu0 %v3613_v45 }
 0x65a   :  { %1271 = vmatpush.msrb.mxu1 %v3614_v49  ;;  %1291 = vmatpush.msrb.mxu2 %v3615_v53 }
 0x65b   :  { %1196 = vmatpush.msrb.mxu0 %v3616_v57 }
 0x65c   :  { %1272 = vmatpush.msrb.mxu1 %v3617_v58  ;;  %1292 = vmatpush.msrb.mxu2 %v3618_v61 }
 0x65d   :  { %1197 = vmatpush.msrb.mxu0 %v3619_v62 }
 0x65e   :  { %1273 = vmatpush.msrb.mxu1 %v3620_v1  ;;  %1293 = vmatpush.msrb.mxu2 %v3621_v2 }
 0x6bb   :  { %v927_v23 = vpop.f32.mrf.mxu0  ;;  %v947_v24 = vpop.f32.mrf.mxu1 }
 0x6bc   :  { %v928_v28 = vadd.f32 %v927_v23, %v3622_v6  ;;  %v948_v29 = vadd.f32 %v947_v24, %v3623_v41 }
 0x6be   :  { %v970_v31 = vadd.f32 %v928_v28, %v909_v18  ;;  %v993_v34 = vadd.f32 %v991_v30, %v948_v29  ;;  %v3173_v18 = vld [vmem:[#allocation9 + $0x178] sm:$0xff] }
 0x6c0   :  { %v2128_v36 = vmul.f32 -1.442695, %v970_v31  ;;  %v2129_v40 = vmul.f32 -1.442695, %v993_v34  ;;  %v3178_v34 = vld [vmem:[#allocation9 + $0x160] sm:$0xff] }
 0x6c2   :  { %2200 = vpow2.f32 %v2128_v36  ;;  %v967_v17 = vpop.f32.mrf.mxu2  ;;  %v3188_v36 = vld [vmem:[#allocation9 + $0x130] sm:$0xff] }
 0x6c3   :  { %2202 = vpow2.f32 %v2129_v40  ;;  %v968_v12 = vadd.f32 %v967_v17, %v3018_v50  ;;  %v3256_v17 = vld [vmem:[#allocation9 + $0x38] sm:$0xff] }
 0x6c8   :  { %v2201_v20 = vpop.eup %2200 }
 0x6c9   :  { %v2203_v22 = vpop.eup %2202  ;;  %v974_v37 = vadd.f32 1.0, %v2201_v20  ;;  %v3193_v20 = vld [vmem:[#allocation9 + $0x118] sm:$0xff] }
 0x6ca   :  { %v997_v49 = vadd.f32 1.0, %v2203_v22  ;;  %v3198_v22 = vld [vmem:[#allocation9 + $0x100] sm:$0xff] }
 0x6cb   :  { %2204 = vrcp.f32 %v974_v37  ;;  %v986_v7 = vand.u32 2147483648, %v974_v37  ;;  %v984_v9 = vand.u32 2147483647, %v974_v37  ;;  %vm980_vm5 = vweird.f32 %v974_v37 }
 0x6cc   :  { %2206 = vrcp.f32 %v997_v49  ;;  %v1009_v27 = vand.u32 2147483648, %v997_v49  ;;  %vm1003_vm9 = vweird.f32 %v997_v49  ;;  %v1007_v56 = vand.u32 2147483647, %v997_v49 }
 0x6cd   :  { %v987_v26 = vor.u32 1.1754944e-38, %v986_v7  ;;  %vm985_vm7 = vcmp.eq.f32.partialorder %v984_v9, 8.507059e+37  ;;  %v3232_v7 = vld [vmem:[#allocation9 + $0x78] sm:$0xff]  ;;  %v3239_v9 = vld [vmem:[#allocation9 + $0x60] sm:$0xff] }
 0x6ce   :  { %v1010_v54 = vor.u32 1.1754944e-38, %v1009_v27  ;;  %vm1008_vm11 = vcmp.eq.f32.partialorder %v1007_v56, 8.507059e+37 }
 0x6d1   :  { %v2205_v53 = vpop.eup %2204 }
 0x6d2   :  { %v2207_v58 = vpop.eup %2206  ;;  %v976_v61 = vmul.f32 %v2205_v53, %v974_v37  ;;  %vm981_vm4 = vweird.f32 %v2205_v53  ;;  %v3202_v37 = vld [vmem:[#allocation9 + $0xf8] sm:$0xff] }
 0x6d3   :  { %v999_v1 = vmul.f32 %v2207_v58, %v997_v49  ;;  %vm982_vm6 = vmor %vm980_vm5, %vm981_vm4  ;;  %vm1004_vm8 = vweird.f32 %v2207_v58  ;;  %v3205_v49 = vld [vmem:[#allocation9 + $0xe8] sm:$0xff] }
 0x6d4   :  { %v977_v2 = vsub.f32 1.0, %v976_v61  ;;  %vm1005_vm10 = vmor %vm1003_vm9, %vm1004_vm8  ;;  %v3216_v61 = vld [vmem:[#allocation9 + $0xc8] sm:$0xff] }
 0x6d5   :  { %v1000_v8 = vsub.f32 1.0, %v999_v1  ;;  %v3219_v1 = vld [vmem:[#allocation9 + $0xb8] sm:$0xff] }
 0x6d6   :  { %v978_v5 = vmul.f32 %v2205_v53, %v977_v2  ;;  %v3223_v2 = vld [vmem:[#allocation9 + $0xb0] sm:$0xff] }
 0x6d7   :  { %v1001_v13 = vmul.f32 %v2207_v58, %v1000_v8  ;;  %v3228_v8 = vld [vmem:[#allocation9 + $0x98] sm:$0xff] }
 0x6d8   :  { %v979_v25 = vadd.f32 %v2205_v53, %v978_v5  ;;  %v3235_v5 = vld [vmem:[#allocation9 + $0x80] sm:$0xff] }
 0x6d9   :  { %v1002_v0 = vadd.f32 %v2207_v58, %v1001_v13  ;;  %v3249_v13 = vld [vmem:[#allocation9 + $0x50] sm:$0xff] }
 0x6da   :  { %v983_v21 = vsel %vm982_vm6, %v2205_v53, %v979_v25  ;;  %v3209_v53 = vld [vmem:[#allocation9 + $0xe0] sm:$0xff] }
 0x6db   :  { %v988_v32 = vsel %vm985_vm7, %v987_v26, %v983_v21  ;;  %v1006_v19 = vsel %vm1005_vm10, %v2207_v58, %v1002_v0  ;;  %v3212_v58 = vld [vmem:[#allocation9 + $0xd0] sm:$0xff]  ;;  %v3263_v25 = vld [vmem:[#allocation9 + $0x20] sm:$0xff]  ;;  %v3270_v26 = vld [vmem:[#allocation9 + $0x8] sm:$0xff] }
 0x6dc   :  { %v1013_v51 = vmul.f32 %v988_v32, %v968_v12  ;;  %v1011_v23 = vsel %vm1008_vm11, %v1010_v54, %v1006_v19  ;;  %3625 = vst [vmem:[#allocation20_spill] sm:$0xff] %v3270_v26  ;;  %v1025_v12 = vld [vmem:[#allocation2 + $0x12] sm:$0x3f] }
 0x6dd   :  { %v1018_v24 = vsub.f32 1.0, %v1011_v23  ;;  %v1020_v30 = vmul.f32 %v1011_v23, %v3079_v10  ;;  %v3183_v10 = vld [vmem:[#allocation9 + $0x148] sm:$0xff]  ;;  %v1107_v32 = vrot.slane %v1025_v12, 2 }
 0x6de   :  { %v1016_v43 = vadd.f32 %v1014_v52, %v1013_v51 }
 0x6e0   :  { %2208 = vtanh.f32 %v1016_v43 }
 0x6e6   :  { %v2209_v28 = vpop.eup %2208 }
 0x6e7   :  { %v1019_v29 = vmul.f32 %v2209_v28, %v1018_v24 }
 0x6e9   :  { %v3167_v31 = vadd.f32 %v1020_v30, %v1019_v29 }
 0x6eb   :  { %1023 = vst [vmem:[#allocation3 + $0x4] sm:$0x3] %v3167_v31  ;;  %1042 = vmatmul.f32.vlgmr.msrb.gmra.mxu3 %v3167_v31  ;;  %1062 = vmatmul.f32.vlgmr.msra.gmra.mxu0 %v3167_v31 }
 0x6ec   :  { %1082 = vmatmul.f32.vlgmr.msra.gmra.mxu1 %v3167_v31  ;;  %1298 = vmatpush.msrb.mxu3 %v3173_v18 }
 0x6ed   :  { %1374 = vmatpush.msra.mxu0 %v3086_v38  ;;  %1394 = vmatpush.msra.mxu1 %v3089_v46 }
 0x6ee   :  { %1299 = vmatpush.msrb.mxu3 %v3178_v34 }
 0x6ef   :  { %1375 = vmatpush.msra.mxu0 %v3093_v15  ;;  %1395 = vmatpush.msra.mxu1 %v3096_v47 }
 0x6f0   :  { %1300 = vmatpush.msrb.mxu3 %v3183_v10 }
 0x6f1   :  { %1376 = vmatpush.msra.mxu0 %v3100_v42  ;;  %1396 = vmatpush.msra.mxu1 %v3103_v35 }
 0x6f2   :  { %1301 = vmatpush.msrb.mxu3 %v3188_v36  ;;  %v1606_v40 = vld [vmem:[#allocation3 + $0x4] sm:$0x3] }
 0x6f3   :  { %1377 = vmatpush.msra.mxu0 %v3107_v16  ;;  %1397 = vmatpush.msra.mxu1 %v3110_v4  ;;  %1643 = vst [vmem:[#allocation1 + $0x2] ss:$4 sm:$0xff] %v1606_v40 }
 0x6f4   :  { %1302 = vmatpush.msrb.mxu3 %v3193_v20 }
 0x6f5   :  { %1378 = vmatpush.msra.mxu0 %v3114_v55  ;;  %1398 = vmatpush.msra.mxu1 %v3117_v33 }
 0x6f6   :  { %1303 = vmatpush.msrb.mxu3 %v3198_v22 }
 0x6f7   :  { %1379 = vmatpush.msra.mxu0 %v3121_v59  ;;  %1399 = vmatpush.msra.mxu1 %v3202_v37 }
 0x6f8   :  { %1304 = vmatpush.msrb.mxu3 %v3205_v49 }
 0x6f9   :  { %1380 = vmatpush.msra.mxu0 %v3126_v39  ;;  %1400 = vmatpush.msra.mxu1 %v3209_v53 }
 0x6fa   :  { %1305 = vmatpush.msrb.mxu3 %v3212_v58 }
 0x6fb   :  { %1381 = vmatpush.msra.mxu0 %v3131_v3  ;;  %1401 = vmatpush.msra.mxu1 %v3216_v61 }
 0x6fc   :  { %1306 = vmatpush.msrb.mxu3 %v3219_v1 }
 0x6fd   :  { %1382 = vmatpush.msra.mxu0 %v3136_v11  ;;  %1402 = vmatpush.msra.mxu1 %v3223_v2 }
 0x6fe   :  { %1307 = vmatpush.msrb.mxu3 %v2855_v48  ;;  %v3242_v48 = vld [vmem:[#allocation9 + $0x68] sm:$0xff] }
 0x6ff   :  { %1383 = vmatpush.msra.mxu0 %v3141_v14  ;;  %1403 = vmatpush.msra.mxu1 %v3228_v8 }
 0x700   :  { %1308 = vmatpush.msrb.mxu3 %v2861_v44  ;;  %v3246_v44 = vld [vmem:[#allocation9 + $0x48] sm:$0xff] }
 0x701   :  { %1384 = vmatpush.msra.mxu0 %v3232_v7  ;;  %1404 = vmatpush.msra.mxu1 %v3235_v5 }
 0x702   :  { %1309 = vmatpush.msrb.mxu3 %v2864_v60  ;;  %v3253_v60 = vld [vmem:[#allocation9 + $0x30] sm:$0xff] }
 0x703   :  { %1385 = vmatpush.msra.mxu0 %v3239_v9  ;;  %1405 = vmatpush.msra.mxu1 %v3242_v48 }
 0x704   :  { %1310 = vmatpush.msrb.mxu3 %v2870_v63  ;;  %v3260_v63 = vld [vmem:[#allocation9 + $0x18] sm:$0xff] }
 0x705   :  { %1386 = vmatpush.msra.mxu0 %v3246_v44  ;;  %1406 = vmatpush.msra.mxu1 %v3249_v13 }
 0x706   :  { %1311 = vmatpush.msrb.mxu3 %v3613_v45  ;;  %v3267_v45 = vld [vmem:[#allocation9] sm:$0xff] }
 0x707   :  { %1387 = vmatpush.msra.mxu0 %v3253_v60  ;;  %1407 = vmatpush.msra.mxu1 %v3256_v17  ;;  %3624 = vst [vmem:[#allocation26_spill] sm:$0xff] %v3267_v45 }
 0x708   :  { %1312 = vmatpush.msrb.mxu3 %v3616_v57 }
 0x709   :  { %1388 = vmatpush.msra.mxu0 %v3260_v63  ;;  %1408 = vmatpush.msra.mxu1 %v3263_v25 }
 0x70a   :  { %1313 = vmatpush.msrb.mxu3 %v3619_v62 }
 0x70b   :  { %1389 = vmatpush.msra.mxu0 %v3267_v45  ;;  %1409 = vmatpush.msra.mxu1 %v3270_v26 }
 0x768   :  { %v1063_v57 = vpop.f32.mrf.mxu0 }
 0x769   :  { %v1064_v21 = vadd.f32 %v1063_v57, %v3623_v41 }
 0x76b   :  { %v1109_v0 = vadd.f32 %v1107_v32, %v1064_v21 }
 0x76d   :  { %v2131_v27 = vmul.f32 -1.442695, %v1109_v0 }
 0x76e   :  { %v1043_v51 = vpop.f32.mrf.mxu3 }
 0x76f   :  { %2210 = vpow2.f32 %v2131_v27  ;;  %v1044_v52 = vadd.f32 %v1043_v51, %v3622_v6  ;;  %v1083_v51 = vpop.f32.mrf.mxu1 }
 0x771   :  { %v1086_v62 = vadd.f32 %v1044_v52, %v1025_v12 }
 0x773   :  { %v2130_v56 = vmul.f32 -1.442695, %v1086_v62 }
 0x775   :  { %v2211_v43 = vpop.eup %2210  ;;  %2212 = vpow2.f32 %v2130_v56  ;;  %v1084_v56 = vadd.f32 %v1083_v51, %v3018_v50 }
 0x776   :  { %v1113_v19 = vadd.f32 1.0, %v2211_v43 }
 0x778   :  { %2214 = vrcp.f32 %v1113_v19  ;;  %v1125_v6 = vand.u32 2147483648, %v1113_v19  ;;  %vm1119_vm1 = vweird.f32 %v1113_v19 }
 0x77a   :  { %v1126_v45 = vor.u32 1.1754944e-38, %v1125_v6 }
 0x77b   :  { %v2213_v54 = vpop.eup %2212 }
 0x77c   :  { %v1090_v23 = vadd.f32 1.0, %v2213_v54 }
 0x77e   :  { %2216 = vrcp.f32 %v1090_v23  ;;  %v2215_v24 = vpop.eup %2214  ;;  %v1102_v21 = vand.u32 2147483648, %v1090_v23  ;;  %v1100_v0 = vand.u32 2147483647, %v1090_v23  ;;  %vm1096_vm13 = vweird.f32 %v1090_v23 }
 0x77f   :  { %v1115_v28 = vmul.f32 %v2215_v24, %v1113_v19  ;;  %vm1120_vm0 = vweird.f32 %v2215_v24 }
 0x780   :  { %v1103_v62 = vor.u32 1.1754944e-38, %v1102_v21  ;;  %vm1101_vm15 = vcmp.eq.f32.partialorder %v1100_v0, 8.507059e+37  ;;  %vm1121_vm2 = vmor %vm1119_vm1, %vm1120_vm0 }
 0x781   :  { %v1116_v40 = vsub.f32 1.0, %v1115_v28  ;;  %v1130_v28 = vrot.slane %v1025_v12, 4 }
 0x783   :  { %v1117_v27 = vmul.f32 %v2215_v24, %v1116_v40 }
 0x784   :  { %v2217_v29 = vpop.eup %2216 }
 0x785   :  { %v1092_v30 = vmul.f32 %v2217_v29, %v1090_v23  ;;  %vm1097_vm12 = vweird.f32 %v2217_v29  ;;  %v1118_v41 = vadd.f32 %v2215_v24, %v1117_v27 }
 0x786   :  { %vm1098_vm14 = vmor %vm1096_vm13, %vm1097_vm12 }
 0x787   :  { %v1093_v57 = vsub.f32 1.0, %v1092_v30  ;;  %v1122_v40 = vsel %vm1121_vm2, %v2215_v24, %v1118_v41  ;;  %v3310_v41 = vld [vmem:[#allocation9 + $0xa0] sm:$0xff] }
 0x789   :  { %v1094_v32 = vmul.f32 %v2217_v29, %v1093_v57  ;;  %v1123_v57 = vand.u32 2147483647, %v1113_v19 }
 0x78b   :  { %v1095_v52 = vadd.f32 %v2217_v29, %v1094_v32  ;;  %vm1124_vm3 = vcmp.eq.f32.partialorder %v1123_v57, 8.507059e+37 }
 0x78c   :  { %v1127_v23 = vsel %vm1124_vm3, %v1126_v45, %v1122_v40 }
 0x78d   :  { %v1099_v43 = vsel %vm1098_vm14, %v2217_v29, %v1095_v52  ;;  %v1134_v21 = vsub.f32 1.0, %v1127_v23  ;;  %v1136_v29 = vmul.f32 %v1127_v23, %v3167_v31 }
 0x78e   :  { %v1104_v54 = vsel %vm1101_vm15, %v1103_v62, %v1099_v43 }
 0x78f   :  { %v1129_v30 = vmul.f32 %v1104_v54, %v1084_v56 }
 0x791   :  { %v1132_v26 = vadd.f32 %v1130_v28, %v1129_v30 }
 0x793   :  { %2218 = vtanh.f32 %v1132_v26 }
 0x799   :  { %v2219_v32 = vpop.eup %2218 }
 0x79a   :  { %v1135_v51 = vmul.f32 %v2219_v32, %v1134_v21 }
 0x79c   :  { %v3277_v0 = vadd.f32 %v1136_v29, %v1135_v51 }
 0x79e   :  { %1139 = vst [vmem:[#allocation3 + $0x6] sm:$0x3] %v3277_v0  ;;  %1158 = vmatmul.f32.vlgmr.msra.gmra.mxu2 %v3277_v0  ;;  %1178 = vmatmul.f32.vlgmr.msra.gmra.mxu3 %v3277_v0 }
 0x79f   :  { %1198 = vmatmul.f32.vlgmr.msrb.gmra.mxu0 %v3277_v0  ;;  %1414 = vmatpush.msra.mxu2 %v3173_v18 }
 0x7a0   :  { %1490 = vmatpush.msra.mxu3 %v3086_v38  ;;  %1510 = vmatpush.msrb.mxu0 %v3089_v46  ;;  %v3315_v38 = vld [vmem:[#allocation9 + $0x88] sm:$0xff]  ;;  %v3320_v46 = vld [vmem:[#allocation9 + $0x70] sm:$0xff] }
 0x7a1   :  { %1415 = vmatpush.msra.mxu2 %v3178_v34 }
 0x7a2   :  { %1491 = vmatpush.msra.mxu3 %v3093_v15  ;;  %1511 = vmatpush.msrb.mxu0 %v3096_v47  ;;  %v3325_v15 = vld [vmem:[#allocation9 + $0x58] sm:$0xff]  ;;  %v3330_v47 = vld [vmem:[#allocation9 + $0x40] sm:$0xff] }
 0x7a3   :  { %1416 = vmatpush.msra.mxu2 %v3183_v10 }
 0x7a4   :  { %1492 = vmatpush.msra.mxu3 %v3100_v42  ;;  %1512 = vmatpush.msrb.mxu0 %v3103_v35  ;;  %v3335_v42 = vld [vmem:[#allocation9 + $0x28] sm:$0xff]  ;;  %v3340_v35 = vld [vmem:[#allocation9 + $0x10] sm:$0xff] }
 0x7a5   :  { %1417 = vmatpush.msra.mxu2 %v3188_v36  ;;  %v1607_v6 = vld [vmem:[#allocation3 + $0x6] sm:$0x3] }
 0x7a6   :  { %1645 = vst [vmem:[#allocation1 + $0x3] ss:$4 sm:$0xff] %v1607_v6  ;;  %1493 = vmatpush.msra.mxu3 %v3107_v16  ;;  %1513 = vmatpush.msrb.mxu0 %v3110_v4  ;;  %v3626_v16 = vld [vmem:[#allocation26_spill] sm:$0xff]  ;;  %v3627_v4 = vld [vmem:[#allocation20_spill] sm:$0xff] }
 0x7a7   :  { %1418 = vmatpush.msra.mxu2 %v3193_v20 }
 0x7a8   :  { %1494 = vmatpush.msra.mxu3 %v3114_v55  ;;  %1514 = vmatpush.msrb.mxu0 %v3117_v33  ;;  %v1141_v55 = vld [vmem:[#allocation2 + $0x18] sm:$0x3f] }
 0x7a9   :  { %1419 = vmatpush.msra.mxu2 %v3198_v22  ;;  %v1223_v31 = vrot.slane %v1141_v55, 2  ;;  %v1246_v28 = vrot.slane %v1141_v55, 4 }
 0x7aa   :  { %1495 = vmatpush.msra.mxu3 %v3121_v59  ;;  %1515 = vmatpush.msrb.mxu0 %v3202_v37 }
 0x7ab   :  { %1420 = vmatpush.msra.mxu2 %v3205_v49 }
 0x7ac   :  { %1496 = vmatpush.msra.mxu3 %v3126_v39  ;;  %1516 = vmatpush.msrb.mxu0 %v3209_v53  ;;  %v3628_v39 = vld [vmem:[#allocation29_spill] sm:$0xff] }
 0x7ad   :  { %1421 = vmatpush.msra.mxu2 %v3212_v58 }
 0x7ae   :  { %1497 = vmatpush.msra.mxu3 %v3131_v3  ;;  %1517 = vmatpush.msrb.mxu0 %v3216_v61 }
 0x7af   :  { %1422 = vmatpush.msra.mxu2 %v3219_v1 }
 0x7b0   :  { %1498 = vmatpush.msra.mxu3 %v3136_v11  ;;  %1518 = vmatpush.msrb.mxu0 %v3223_v2  ;;  %v3629_v11 = vld [vmem:[#allocation30_spill] sm:$0xff] }
 0x7b1   :  { %1423 = vmatpush.msra.mxu2 %v3310_v41 }
 0x7b2   :  { %1499 = vmatpush.msra.mxu3 %v3141_v14  ;;  %1519 = vmatpush.msrb.mxu0 %v3228_v8 }
 0x7b3   :  { %1424 = vmatpush.msra.mxu2 %v3315_v38 }
 0x7b4   :  { %1500 = vmatpush.msra.mxu3 %v3232_v7  ;;  %1520 = vmatpush.msrb.mxu0 %v3235_v5 }
 0x7b5   :  { %1425 = vmatpush.msra.mxu2 %v3320_v46 }
 0x7b6   :  { %1501 = vmatpush.msra.mxu3 %v3239_v9  ;;  %1521 = vmatpush.msrb.mxu0 %v3242_v48 }
 0x7b7   :  { %1426 = vmatpush.msra.mxu2 %v3325_v15 }
 0x7b8   :  { %1502 = vmatpush.msra.mxu3 %v3246_v44  ;;  %1522 = vmatpush.msrb.mxu0 %v3249_v13 }
 0x7b9   :  { %1427 = vmatpush.msra.mxu2 %v3330_v47 }
 0x7ba   :  { %1503 = vmatpush.msra.mxu3 %v3253_v60  ;;  %1523 = vmatpush.msrb.mxu0 %v3256_v17 }
 0x7bb   :  { %1428 = vmatpush.msra.mxu2 %v3335_v42 }
 0x7bc   :  { %1504 = vmatpush.msra.mxu3 %v3260_v63  ;;  %1524 = vmatpush.msrb.mxu0 %v3263_v25 }
 0x7bd   :  { %1429 = vmatpush.msra.mxu2 %v3340_v35 }
 0x7be   :  { %1505 = vmatpush.msra.mxu3 %v3626_v16  ;;  %1525 = vmatpush.msrb.mxu0 %v3627_v4 }
 0x81c   :  { %v1199_v12 = vpop.f32.mrf.mxu0 }
 0x81d   :  { %v1200_v52 = vadd.f32 %v1199_v12, %v3018_v50 }
 0x821   :  { %v1159_v33 = vpop.f32.mrf.mxu2  ;;  %v1179_v59 = vpop.f32.mrf.mxu3 }
 0x822   :  { %v1160_v3 = vadd.f32 %v1159_v33, %v3628_v39  ;;  %v1180_v14 = vadd.f32 %v1179_v59, %v3629_v11  ;;  %v1619_v59 = vld [vmem:[%s3567_s6 + $0x38] sm:$0xff] }
 0x824   :  { %v1202_v37 = vadd.f32 %v1160_v3, %v1141_v55  ;;  %v1225_v53 = vadd.f32 %v1223_v31, %v1180_v14  ;;  %v1618_v3 = vld [vmem:[%s3567_s6 + $0x30] sm:$0xff]  ;;  %v1617_v31 = vld [vmem:[%s3567_s6 + $0x28] sm:$0xff] }
 0x826   :  { %v2132_v61 = vmul.f32 -1.442695, %v1202_v37  ;;  %v2133_v2 = vmul.f32 -1.442695, %v1225_v53  ;;  %v1616_v53 = vld [vmem:[%s3567_s6 + $0x20] sm:$0xff] }
 0x828   :  { %2220 = vpow2.f32 %v2132_v61  ;;  %v1615_v61 = vld [vmem:[%s3567_s6 + $0x18] sm:$0xff] }
 0x829   :  { %2222 = vpow2.f32 %v2133_v2 }
 0x82e   :  { %v2221_v8 = vpop.eup %2220 }
 0x82f   :  { %v2223_v7 = vpop.eup %2222  ;;  %v1206_v5 = vadd.f32 1.0, %v2221_v8  ;;  %v1614_v8 = vld [vmem:[%s3567_s6 + $0x10] sm:$0xff] }
 0x830   :  { %v1229_v9 = vadd.f32 1.0, %v2223_v7 }
 0x831   :  { %2224 = vrcp.f32 %v1206_v5  ;;  %v1218_v63 = vand.u32 2147483648, %v1206_v5  ;;  %v1216_v26 = vand.u32 2147483647, %v1206_v5  ;;  %vm1212_vm5 = vweird.f32 %v1206_v5 }
 0x832   :  { %2226 = vrcp.f32 %v1229_v9  ;;  %v1241_v30 = vand.u32 2147483648, %v1229_v9  ;;  %vm1235_vm9 = vweird.f32 %v1229_v9  ;;  %v1239_v57 = vand.u32 2147483647, %v1229_v9 }
 0x833   :  { %v1219_v27 = vor.u32 1.1754944e-38, %v1218_v63  ;;  %vm1217_vm7 = vcmp.eq.f32.partialorder %v1216_v26, 8.507059e+37 }
 0x834   :  { %v1242_v21 = vor.u32 1.1754944e-38, %v1241_v30  ;;  %vm1240_vm11 = vcmp.eq.f32.partialorder %v1239_v57, 8.507059e+37 }
 0x837   :  { %v2225_v48 = vpop.eup %2224 }
 0x838   :  { %v2227_v44 = vpop.eup %2226  ;;  %v1208_v13 = vmul.f32 %v2225_v48, %v1206_v5  ;;  %vm1213_vm4 = vweird.f32 %v2225_v48  ;;  %v1613_v5 = vld [vmem:[%s3567_s6 + $0x8] sm:$0xff] }
 0x839   :  { %v1231_v60 = vmul.f32 %v2227_v44, %v1229_v9  ;;  %vm1214_vm6 = vmor %vm1212_vm5, %vm1213_vm4  ;;  %vm1236_vm8 = vweird.f32 %v2227_v44 }
 0x83a   :  { %v1209_v17 = vsub.f32 1.0, %v1208_v13  ;;  %vm1237_vm10 = vmor %vm1235_vm9, %vm1236_vm8 }
 0x83b   :  { %v1232_v25 = vsub.f32 1.0, %v1231_v60 }
 0x83c   :  { %v1210_v45 = vmul.f32 %v2225_v48, %v1209_v17 }
 0x83d   :  { %v1233_v19 = vmul.f32 %v2227_v44, %v1232_v25 }
 0x83e   :  { %v1211_v24 = vadd.f32 %v2225_v48, %v1210_v45 }
 0x83f   :  { %v1234_v43 = vadd.f32 %v2227_v44, %v1233_v19 }
 0x840   :  { %v1215_v62 = vsel %vm1214_vm6, %v2225_v48, %v1211_v24 }
 0x841   :  { %v1220_v56 = vsel %vm1217_vm7, %v1219_v27, %v1215_v62  ;;  %v1238_v23 = vsel %vm1237_vm10, %v2227_v44, %v1234_v43  ;;  %v1612_v44 = vld [vmem:[%s3567_s6] sm:$0xff] }
 0x842   :  { %v1245_v54 = vmul.f32 %v1220_v56, %v1200_v52  ;;  %v1243_v32 = vsel %vm1240_vm11, %v1242_v21, %v1238_v23 }
 0x843   :  { %v1250_v51 = vsub.f32 1.0, %v1243_v32  ;;  %v1252_v16 = vmul.f32 %v1243_v32, %v3277_v0 }
 0x844   :  { %v1248_v40 = vadd.f32 %v1246_v28, %v1245_v54 }
 0x846   :  { %2228 = vtanh.f32 %v1248_v40 }
 0x84c   :  { %v2229_v29 = vpop.eup %2228 }
 0x84d   :  { %v1251_v6 = vmul.f32 %v2229_v29, %v1250_v51 }
 0x84f   :  { %v3349_v4 = vadd.f32 %v1252_v16, %v1251_v6 }
 0x851   :  { %1255 = vst [vmem:[#allocation3 + $0x8] sm:$0x3] %v3349_v4  ;;  %1274 = vmatmul.f32.vlgmr.msrb.gmra.mxu1 %v3349_v4  ;;  %1294 = vmatmul.f32.vlgmr.msrb.gmra.mxu2 %v3349_v4 }
 0x852   :  { %1314 = vmatmul.f32.vlgmr.msrb.gmra.mxu3 %v3349_v4  ;;  %1530 = vmatpush.msrb.mxu1 %v3173_v18  ;;  %v1627_v18 = vld [vmem:[%s3567_s6 + $0x78] sm:$0xff] }
 0x853   :  { %1658 = vmatpush.msrb.mxu2 %v1627_v18 }
 0x854   :  { %1531 = vmatpush.msrb.mxu1 %v3178_v34  ;;  %v1626_v34 = vld [vmem:[%s3567_s6 + $0x70] sm:$0xff] }
 0x855   :  { %1659 = vmatpush.msrb.mxu2 %v1626_v34  ;;  %v1654_v34 = vld.sshfl [vmem:[#allocation1] sm:$0xff pattern:$0x73625140] }
 0x856   :  { %1532 = vmatpush.msrb.mxu1 %v3183_v10  ;;  %v1625_v10 = vld [vmem:[%s3567_s6 + $0x68] sm:$0xff] }
 0x857   :  { %1660 = vmatpush.msrb.mxu2 %v1625_v10  ;;  %v1373_v10 = vld [vmem:[#allocation2 + $0x24] sm:$0x3f] }
 0x858   :  { %1533 = vmatpush.msrb.mxu1 %v3188_v36  ;;  %v1608_v55 = vld [vmem:[#allocation3 + $0x8] sm:$0x3] }
 0x859   :  { %1647 = vst [vmem:[#allocation1 + $0x20] ss:$4 sm:$0xff] %v1608_v55 }
 0x85a   :  { %1534 = vmatpush.msrb.mxu1 %v3193_v20 }
 0x85c   :  { %1535 = vmatpush.msrb.mxu1 %v3198_v22  ;;  %v1624_v22 = vld [vmem:[%s3567_s6 + $0x60] sm:$0xff] }
 0x85d   :  { %1661 = vmatpush.msrb.mxu2 %v1624_v22 }
 0x85e   :  { %1536 = vmatpush.msrb.mxu1 %v3205_v49  ;;  %v3384_v49 = vld [vmem:[#allocation2 + $0x1e] sm:$0x3f] }
 0x85f   :  { %v1362_v56 = vrot.slane %v3384_v49, 4 }
 0x860   :  { %1537 = vmatpush.msrb.mxu1 %v3212_v58 }
 0x862   :  { %1538 = vmatpush.msrb.mxu1 %v3219_v1  ;;  %v1623_v1 = vld [vmem:[%s3567_s6 + $0x58] sm:$0xff] }
 0x863   :  { %1662 = vmatpush.msrb.mxu2 %v1623_v1 }
 0x864   :  { %1539 = vmatpush.msrb.mxu1 %v3310_v41  ;;  %v1622_v41 = vld [vmem:[%s3567_s6 + $0x50] sm:$0xff] }
 0x865   :  { %1663 = vmatpush.msrb.mxu2 %v1622_v41 }
 0x866   :  { %1540 = vmatpush.msrb.mxu1 %v3315_v38 }
 0x868   :  { %1541 = vmatpush.msrb.mxu1 %v3320_v46 }
 0x86a   :  { %1542 = vmatpush.msrb.mxu1 %v3325_v15  ;;  %v1339_v15 = vrot.slane %v3384_v49, 2 }
 0x86c   :  { %1543 = vmatpush.msrb.mxu1 %v3330_v47  ;;  %v1621_v47 = vld [vmem:[%s3567_s6 + $0x48] sm:$0xff] }
 0x86d   :  { %1664 = vmatpush.msrb.mxu2 %v1621_v47 }
 0x86e   :  { %1544 = vmatpush.msrb.mxu1 %v3335_v42 }
 0x870   :  { %1545 = vmatpush.msrb.mxu1 %v3340_v35  ;;  %v1620_v35 = vld [vmem:[%s3567_s6 + $0x40] sm:$0xff] }
 0x871   :  { %1665 = vmatpush.msrb.mxu2 %v1620_v35  ;;  %v3439_v35 = vld [vmem:[%s3571_s10 + $0x1b] ss:$0 sm:$0xff] }
 0x873   :  { %1666 = vmatpush.msrb.mxu2 %v1619_v59 }
 0x875   :  { %1667 = vmatpush.msrb.mxu2 %v1618_v3 }
 0x877   :  { %1668 = vmatpush.msrb.mxu2 %v1617_v31 }
 0x879   :  { %1669 = vmatpush.msrb.mxu2 %v1616_v53 }
 0x87b   :  { %1670 = vmatpush.msrb.mxu2 %v1615_v61 }
 0x87d   :  { %1671 = vmatpush.msrb.mxu2 %v1614_v8 }
 0x87f   :  { %1672 = vmatpush.msrb.mxu2 %v1613_v5 }
 0x881   :  { %1673 = vmatpush.msrb.mxu2 %v1612_v44 }
 0x8ce   :  { %v1275_v36 = vpop.f32.mrf.mxu1 }
 0x8cf   :  { %v1276_v20 = vadd.f32 %v1275_v36, %v3628_v39 }
 0x8d1   :  { %v1318_v58 = vadd.f32 %v1276_v20, %v3384_v49  ;;  %v1455_v49 = vrot.slane %v1373_v10, 2 }
 0x8d3   :  { %v2134_v0 = vmul.f32 -1.442695, %v1318_v58 }
 0x8d4   :  { %v1295_v38 = vpop.f32.mrf.mxu2 }
 0x8d5   :  { %2230 = vpow2.f32 %v2134_v0  ;;  %v1296_v46 = vadd.f32 %v1295_v38, %v3629_v11  ;;  %v1315_v45 = vpop.f32.mrf.mxu3 }
 0x8d6   :  { %v1316_v27 = vadd.f32 %v1315_v45, %v3018_v50  ;;  %v1478_v45 = vrot.slane %v1373_v10, 4 }
 0x8d7   :  { %v1341_v42 = vadd.f32 %v1339_v15, %v1296_v46 }
 0x8d9   :  { %v2135_v33 = vmul.f32 -1.442695, %v1341_v42 }
 0x8db   :  { %v2231_v14 = vpop.eup %2230  ;;  %2232 = vpow2.f32 %v2135_v33 }
 0x8dc   :  { %v1322_v37 = vadd.f32 1.0, %v2231_v14 }
 0x8de   :  { %2234 = vrcp.f32 %v1322_v37  ;;  %v1334_v60 = vand.u32 2147483648, %v1322_v37  ;;  %v1332_v63 = vand.u32 2147483647, %v1322_v37  ;;  %vm1328_vm13 = vweird.f32 %v1322_v37 }
 0x8e0   :  { %v1335_v19 = vor.u32 1.1754944e-38, %v1334_v60  ;;  %vm1333_vm15 = vcmp.eq.f32.partialorder %v1332_v63, 8.507059e+37 }
 0x8e1   :  { %v2233_v2 = vpop.eup %2232 }
 0x8e2   :  { %v1345_v7 = vadd.f32 1.0, %v2233_v2 }
 0x8e4   :  { %v2235_v9 = vpop.eup %2234  ;;  %2236 = vrcp.f32 %v1345_v7  ;;  %v1357_v54 = vand.u32 2147483648, %v1345_v7  ;;  %v1355_v30 = vand.u32 2147483647, %v1345_v7  ;;  %vm1351_vm1 = vweird.f32 %v1345_v7 }
 0x8e5   :  { %v1324_v48 = vmul.f32 %v2235_v9, %v1322_v37  ;;  %vm1329_vm12 = vweird.f32 %v2235_v9 }
 0x8e6   :  { %vm1330_vm14 = vmor %vm1328_vm13, %vm1329_vm12  ;;  %v1358_v23 = vor.u32 1.1754944e-38, %v1357_v54  ;;  %vm1356_vm3 = vcmp.eq.f32.partialorder %v1355_v30, 8.507059e+37 }
 0x8e7   :  { %v1325_v13 = vsub.f32 1.0, %v1324_v48 }
 0x8e9   :  { %v1326_v17 = vmul.f32 %v2235_v9, %v1325_v13 }
 0x8ea   :  { %v2237_v25 = vpop.eup %2236 }
 0x8eb   :  { %v1347_v26 = vmul.f32 %v2237_v25, %v1345_v7  ;;  %v1327_v12 = vadd.f32 %v2235_v9, %v1326_v17  ;;  %vm1352_vm0 = vweird.f32 %v2237_v25 }
 0x8ec   :  { %vm1353_vm2 = vmor %vm1351_vm1, %vm1352_vm0 }
 0x8ed   :  { %v1348_v24 = vsub.f32 1.0, %v1347_v26  ;;  %v1331_v52 = vsel %vm1330_vm14, %v2235_v9, %v1327_v12 }
 0x8ee   :  { %v1336_v62 = vsel %vm1333_vm15, %v1335_v19, %v1331_v52 }
 0x8ef   :  { %v1349_v43 = vmul.f32 %v2237_v25, %v1348_v24  ;;  %v1361_v28 = vmul.f32 %v1336_v62, %v1316_v27 }
 0x8f1   :  { %v1350_v57 = vadd.f32 %v2237_v25, %v1349_v43  ;;  %v1364_v40 = vadd.f32 %v1362_v56, %v1361_v28 }
 0x8f3   :  { %v1354_v21 = vsel %vm1353_vm2, %v2237_v25, %v1350_v57  ;;  %2238 = vtanh.f32 %v1364_v40  ;;  %v3630_v57 = vld [vmem:[#allocation19_spill] sm:$0xff] }
 0x8f4   :  { %v1359_v32 = vsel %vm1356_vm3, %v1358_v23, %v1354_v21 }
 0x8f5   :  { %v1366_v51 = vsub.f32 1.0, %v1359_v32  ;;  %v1368_v16 = vmul.f32 %v1359_v32, %v3349_v4  ;;  %v1489_v32 = vld [vmem:[#allocation2 + $0x2a] sm:$0x3f] }
 0x8f9   :  { %v2239_v29 = vpop.eup %2238 }
 0x8fa   :  { %v1367_v6 = vmul.f32 %v2239_v29, %v1366_v51 }
 0x8fc   :  { %v3428_v55 = vadd.f32 %v1368_v16, %v1367_v6  ;;  %v1571_v6 = vrot.slane %v1489_v32, 2 }
 0x8fe   :  { %1371 = vst [vmem:[#allocation3 + $0xa] sm:$0x3] %v3428_v55  ;;  %1390 = vmatmul.f32.vlgmr.msra.gmra.mxu0 %v3428_v55  ;;  %1410 = vmatmul.f32.vlgmr.msra.gmra.mxu1 %v3428_v55 }
 0x8ff   :  { %1430 = vmatmul.f32.vlgmr.msra.gmra.mxu2 %v3428_v55 }
 0x905   :  { %v1609_v18 = vld [vmem:[#allocation3 + $0xa] sm:$0x3] }
 0x906   :  { %1649 = vst [vmem:[#allocation1 + $0x21] ss:$4 sm:$0xff] %v1609_v18 }
 0x907   :  { %1674 = vmatmul.f32.vlgmr.msrb.gmra.mxu2 %v1654_v34 }
 0x97b   :  { %v1391_v36 = vpop.f32.mrf.mxu0  ;;  %v1411_v20 = vpop.f32.mrf.mxu1 }
 0x97c   :  { %v1392_v22 = vadd.f32 %v1391_v36, %v3628_v39  ;;  %v1412_v4 = vadd.f32 %v1411_v20, %v3629_v11 }
 0x97e   :  { %v1434_v58 = vadd.f32 %v1392_v22, %v1373_v10  ;;  %v1457_v1 = vadd.f32 %v1455_v49, %v1412_v4 }
 0x980   :  { %v2136_v0 = vmul.f32 -1.442695, %v1434_v58  ;;  %v2137_v41 = vmul.f32 -1.442695, %v1457_v1 }
 0x982   :  { %2240 = vpow2.f32 %v2136_v0  ;;  %v1431_v38 = vpop.f32.mrf.mxu2 }
 0x983   :  { %2242 = vpow2.f32 %v2137_v41  ;;  %v1432_v44 = vadd.f32 %v1431_v38, %v3018_v50 }
 0x988   :  { %v2241_v46 = vpop.eup %2240 }
 0x989   :  { %v2243_v15 = vpop.eup %2242  ;;  %v1438_v47 = vadd.f32 1.0, %v2241_v46 }
 0x98a   :  { %v1461_v42 = vadd.f32 1.0, %v2243_v15  ;;  %v1675_v33 = vpop.f32.mrf.mxu2 }
 0x98b   :  { %2244 = vrcp.f32 %v1438_v47  ;;  %v1676_v59 = vadd.f32 %v1675_v33, %v3439_v35  ;;  %v1450_v2 = vand.u32 2147483648, %v1438_v47  ;;  %v1448_v7 = vand.u32 2147483647, %v1438_v47 }
 0x98c   :  { %2246 = vrcp.f32 %v1461_v42  ;;  %vm1444_vm5 = vweird.f32 %v1438_v47  ;;  %v1473_v63 = vand.u32 2147483648, %v1461_v42  ;;  %vm1467_vm9 = vweird.f32 %v1461_v42 }
 0x98d   :  { %1681 = vadd.xlane.f32.xlu0 %v1676_v59  ;;  %v1451_v48 = vor.u32 1.1754944e-38, %v1450_v2  ;;  %vm1449_vm7 = vcmp.eq.f32.partialorder %v1448_v7, 8.507059e+37  ;;  %v1471_v26 = vand.u32 2147483647, %v1461_v42 }
 0x98e   :  { %v1474_v24 = vor.u32 1.1754944e-38, %v1473_v63  ;;  %v1746_v63 = vld [vmem:[#allocation11 + $0x78] sm:$0xff] }
 0x98f   :  { %vm1472_vm11 = vcmp.eq.f32.partialorder %v1471_v26, 8.507059e+37  ;;  %1750 = vmatpush.msrb.mxu3 %v1746_v63  ;;  %v1743_v26 = vld [vmem:[#allocation11 + $0x60] sm:$0xff] }
 0x991   :  { %v2245_v3 = vpop.eup %2244 }
 0x992   :  { %v2247_v14 = vpop.eup %2246  ;;  %v1440_v31 = vmul.f32 %v2245_v3, %v1438_v47  ;;  %vm1445_vm4 = vweird.f32 %v2245_v3 }
 0x993   :  { %v1463_v37 = vmul.f32 %v2247_v14, %v1461_v42  ;;  %vm1446_vm6 = vmor %vm1444_vm5, %vm1445_vm4  ;;  %vm1468_vm8 = vweird.f32 %v2247_v14 }
 0x994   :  { %v1441_v53 = vsub.f32 1.0, %v1440_v31  ;;  %vm1469_vm10 = vmor %vm1467_vm9, %vm1468_vm8 }
 0x995   :  { %v1464_v61 = vsub.f32 1.0, %v1463_v37 }
 0x996   :  { %v1442_v8 = vmul.f32 %v2245_v3, %v1441_v53 }
 0x997   :  { %v1465_v5 = vmul.f32 %v2247_v14, %v1464_v61  ;;  %v1594_v61 = vrot.slane %v1489_v32, 4 }
 0x998   :  { %v1443_v9 = vadd.f32 %v2245_v3, %v1442_v8 }
 0x999   :  { %v1466_v17 = vadd.f32 %v2247_v14, %v1465_v5 }
 0x99a   :  { %v1447_v13 = vsel %vm1446_vm6, %v2245_v3, %v1443_v9 }
 0x99b   :  { %v1452_v60 = vsel %vm1449_vm7, %v1451_v48, %v1447_v13  ;;  %v1470_v19 = vsel %vm1469_vm10, %v2247_v14, %v1466_v17 }
 0x99c   :  { %v1477_v25 = vmul.f32 %v1452_v60, %v1432_v44  ;;  %v1475_v27 = vsel %vm1472_vm11, %v1474_v24, %v1470_v19  ;;  %v1741_v24 = vld [vmem:[#allocation11 + $0x50] sm:$0xff] }
 0x99d   :  { %v1482_v52 = vsub.f32 1.0, %v1475_v27  ;;  %v1484_v43 = vmul.f32 %v1475_v27, %v3428_v55  ;;  %v1740_v27 = vld [vmem:[#allocation11 + $0x48] sm:$0xff] }
 0x99e   :  { %v1480_v12 = vadd.f32 %v1478_v45, %v1477_v25  ;;  %v1745_v25 = vld [vmem:[#allocation11 + $0x70] sm:$0xff]  ;;  %v1744_v45 = vld [vmem:[#allocation11 + $0x68] sm:$0xff] }
 0x99f   :  { %1751 = vmatpush.msrb.mxu3 %v1745_v25  ;;  %v1833_v25 = vld [vmem:[#allocation12 + $0x50] sm:$0xff] }
 0x9a0   :  { %2248 = vtanh.f32 %v1480_v12  ;;  %v1742_v12 = vld [vmem:[#allocation11 + $0x58] sm:$0xff] }
 0x9a1   :  { %1752 = vmatpush.msrb.mxu3 %v1744_v45 }
 0x9a3   :  { %1753 = vmatpush.msrb.mxu3 %v1743_v26  ;;  %v1832_v26 = vld [vmem:[#allocation12 + $0x48] sm:$0xff] }
 0x9a5   :  { %1754 = vmatpush.msrb.mxu3 %v1742_v12 }
 0x9a6   :  { %v2249_v62 = vpop.eup %2248 }
 0x9a7   :  { %v1483_v56 = vmul.f32 %v2249_v62, %v1482_v52  ;;  %1755 = vmatpush.msrb.mxu3 %v1741_v24  ;;  %v1739_v52 = vld [vmem:[#allocation11 + $0x40] sm:$0xff]  ;;  %v1738_v62 = vld [vmem:[#allocation11 + $0x38] sm:$0xff] }
 0x9a9   :  { %v3444_v54 = vadd.f32 %v1484_v43, %v1483_v56  ;;  %1756 = vmatpush.msrb.mxu3 %v1740_v27  ;;  %v1737_v43 = vld [vmem:[#allocation11 + $0x30] sm:$0xff]  ;;  %v1830_v27 = vld [vmem:[#allocation12 + $0x38] sm:$0xff] }
 0x9ab   :  { %1487 = vst [vmem:[#allocation3 + $0xc] sm:$0x3] %v3444_v54  ;;  %1506 = vmatmul.f32.vlgmr.msra.gmra.mxu3 %v3444_v54  ;;  %1526 = vmatmul.f32.vlgmr.msrb.gmra.mxu0 %v3444_v54 }
 0x9ac   :  { %1546 = vmatmul.f32.vlgmr.msrb.gmra.mxu1 %v3444_v54  ;;  %1757 = vmatpush.msrb.mxu3 %v1739_v52 }
 0x9ae   :  { %1758 = vmatpush.msrb.mxu3 %v1738_v62  ;;  %v1829_v62 = vld [vmem:[#allocation12 + $0x30] sm:$0xff] }
 0x9b0   :  { %1759 = vmatpush.msrb.mxu3 %v1737_v43  ;;  %v1827_v43 = vld [vmem:[#allocation12 + $0x20] sm:$0xff] }
 0x9b2   :  { %v1610_v28 = vld [vmem:[#allocation3 + $0xc] sm:$0x3] }
 0x9b3   :  { %1651 = vst [vmem:[#allocation1 + $0x22] ss:$4 sm:$0xff] %v1610_v28  ;;  %v1735_v28 = vld [vmem:[#allocation11 + $0x20] sm:$0xff] }
 0xa00   :  { %v1682_v30 = vpop.xlane.xlu0 %1681 }
 0xa01   :  { %v1685_v40 = vmul.f32 %v1682_v30, %v3630_v57  ;;  %v1734_v30 = vld [vmem:[#allocation11 + $0x18] sm:$0xff] }
 0xa03   :  { %v3451_v23 = vsub.f32 %v1676_v59, %v1685_v40  ;;  %v1733_v40 = vld [vmem:[#allocation11 + $0x10] sm:$0xff] }
 0xa05   :  { %v1689_v21 = vmul.f32 %v3451_v23, %v3451_v23 }
 0xa07   :  { %1691 = vadd.xlane.f32.xlu2 %v1689_v21  ;;  %v1732_v21 = vld [vmem:[#allocation11 + $0x8] sm:$0xff] }
 0xa28   :  { %v1527_v51 = vpop.f32.mrf.mxu0 }
 0xa29   :  { %v1528_v29 = vadd.f32 %v1527_v51, %v3629_v11  ;;  %v1547_v42 = vpop.f32.mrf.mxu1 }
 0xa2a   :  { %v1548_v3 = vadd.f32 %v1547_v42, %v3018_v50 }
 0xa2b   :  { %v1573_v16 = vadd.f32 %v1571_v6, %v1528_v29 }
 0xa2d   :  { %v2139_v55 = vmul.f32 -1.442695, %v1573_v16 }
 0xa2e   :  { %v1507_v18 = vpop.f32.mrf.mxu3 }
 0xa2f   :  { %2250 = vpow2.f32 %v2139_v55  ;;  %v1508_v34 = vadd.f32 %v1507_v18, %v3628_v39 }
 0xa31   :  { %v1550_v10 = vadd.f32 %v1508_v34, %v1489_v32  ;;  %v1731_v32 = vld [vmem:[#allocation11] sm:$0xff] }
 0xa33   :  { %v2138_v36 = vmul.f32 -1.442695, %v1550_v10 }
 0xa35   :  { %v2251_v20 = vpop.eup %2250  ;;  %2252 = vpow2.f32 %v2138_v36 }
 0xa36   :  { %v1577_v22 = vadd.f32 1.0, %v2251_v20 }
 0xa38   :  { %2254 = vrcp.f32 %v1577_v22  ;;  %v1589_v53 = vand.u32 2147483648, %v1577_v22  ;;  %vm1583_vm1 = vweird.f32 %v1577_v22  ;;  %v1587_v8 = vand.u32 2147483647, %v1577_v22 }
 0xa3a   :  { %v1590_v9 = vor.u32 1.1754944e-38, %v1589_v53  ;;  %vm1588_vm3 = vcmp.eq.f32.partialorder %v1587_v8, 8.507059e+37 }
 0xa3b   :  { %v2253_v4 = vpop.eup %2252 }
 0xa3c   :  { %v1554_v49 = vadd.f32 1.0, %v2253_v4 }
 0xa3e   :  { %2256 = vrcp.f32 %v1554_v49  ;;  %v2255_v58 = vpop.eup %2254  ;;  %v1566_v46 = vand.u32 2147483648, %v1554_v49  ;;  %v1564_v47 = vand.u32 2147483647, %v1554_v49  ;;  %vm1560_vm13 = vweird.f32 %v1554_v49 }
 0xa3f   :  { %v1579_v1 = vmul.f32 %v2255_v58, %v1577_v22  ;;  %vm1584_vm0 = vweird.f32 %v2255_v58  ;;  %v1629_v22 = vld [vmem:[%s3571_s10 + $0x1c] ss:$0 sm:$0xff] }
 0xa40   :  { %v1567_v59 = vor.u32 1.1754944e-38, %v1566_v46  ;;  %vm1565_vm15 = vcmp.eq.f32.partialorder %v1564_v47, 8.507059e+37  ;;  %vm1585_vm2 = vmor %vm1583_vm1, %vm1584_vm0  ;;  %v3471_v46 = vld [vmem:[%s3571_s10 + $0x1e] ss:$0 sm:$0xff] }
 0xa41   :  { %v1580_v41 = vsub.f32 1.0, %v1579_v1 }
 0xa43   :  { %v1581_v39 = vmul.f32 %v2255_v58, %v1580_v41 }
 0xa44   :  { %v2257_v0 = vpop.eup %2256 }
 0xa45   :  { %v1556_v11 = vmul.f32 %v2257_v0, %v1554_v49  ;;  %vm1561_vm12 = vweird.f32 %v2257_v0  ;;  %v1582_v31 = vadd.f32 %v2255_v58, %v1581_v39  ;;  %v1630_v49 = vld [vmem:[%s3571_s10 + $0x1d] ss:$0 sm:$0xff] }
 0xa46   :  { %vm1562_vm14 = vmor %vm1560_vm13, %vm1561_vm12 }
 0xa47   :  { %v1557_v38 = vsub.f32 1.0, %v1556_v11  ;;  %v1586_v5 = vsel %vm1585_vm2, %v2255_v58, %v1582_v31 }
 0xa48   :  { %v1591_v48 = vsel %vm1588_vm3, %v1590_v9, %v1586_v5  ;;  %v1837_v9 = vld [vmem:[#allocation12 + $0x70] sm:$0xff] }
 0xa49   :  { %v1558_v15 = vmul.f32 %v2257_v0, %v1557_v38  ;;  %v1598_v44 = vsub.f32 1.0, %v1591_v48  ;;  %v1600_v50 = vmul.f32 %v1591_v48, %v3444_v54  ;;  %v1736_v54 = vld [vmem:[#allocation11 + $0x28] sm:$0xff] }
 0xa4a   :  { %1760 = vmatpush.msrb.mxu3 %v1736_v54  ;;  %v1826_v54 = vld [vmem:[#allocation12 + $0x18] sm:$0xff] }
 0xa4b   :  { %v1559_v33 = vadd.f32 %v2257_v0, %v1558_v15 }
 0xa4c   :  { %1761 = vmatpush.msrb.mxu3 %v1735_v28  ;;  %v1825_v28 = vld [vmem:[#allocation12 + $0x10] sm:$0xff] }
 0xa4d   :  { %v1563_v14 = vsel %vm1562_vm14, %v2257_v0, %v1559_v33 }
 0xa4e   :  { %v1568_v37 = vsel %vm1565_vm15, %v1567_v59, %v1563_v14  ;;  %1762 = vmatpush.msrb.mxu3 %v1734_v30  ;;  %v1824_v30 = vld [vmem:[#allocation12 + $0x8] sm:$0xff] }
 0xa4f   :  { %v1593_v2 = vmul.f32 %v1568_v37, %v1548_v3 }
 0xa50   :  { %1763 = vmatpush.msrb.mxu3 %v1733_v40  ;;  %v1823_v40 = vld [vmem:[#allocation12] sm:$0xff] }
 0xa51   :  { %v1596_v7 = vadd.f32 %v1594_v61, %v1593_v2 }
 0xa52   :  { %1764 = vmatpush.msrb.mxu3 %v1732_v21 }
 0xa53   :  { %2258 = vtanh.f32 %v1596_v7  ;;  %v1838_v7 = vld [vmem:[#allocation12 + $0x78] sm:$0xff] }
 0xa54   :  { %1765 = vmatpush.msrb.mxu3 %v1731_v32  ;;  %1842 = vmatpush.msra.mxu0 %v1838_v7 }
 0xa56   :  { %1843 = vmatpush.msra.mxu0 %v1837_v9  ;;  %v1942_v9 = vld [vmem:[#allocation14 + $0xd8] sm:$0xff] }
 0xa59   :  { %v2259_v13 = vpop.eup %2258 }
 0xa5a   :  { %v1599_v60 = vmul.f32 %v2259_v13, %v1598_v44  ;;  %v1836_v44 = vld [vmem:[#allocation12 + $0x68] sm:$0xff] }
 0xa5b   :  { %1844 = vmatpush.msra.mxu0 %v1836_v44  ;;  %v1939_v44 = vld [vmem:[#allocation14 + $0xc0] sm:$0xff] }
 0xa5c   :  { %v1601_v17 = vadd.f32 %v1600_v50, %v1599_v60  ;;  %v1835_v50 = vld [vmem:[#allocation12 + $0x60] sm:$0xff] }
 0xa5d   :  { %1845 = vmatpush.msra.mxu0 %v1835_v50 }
 0xa5e   :  { %1603 = vst [vmem:[#allocation3 + $0xe] sm:$0x3] %v1601_v17  ;;  %v1834_v17 = vld [vmem:[#allocation12 + $0x58] sm:$0xff] }
 0xa5f   :  { %1846 = vmatpush.msra.mxu0 %v1834_v17  ;;  %v1938_v17 = vld [vmem:[#allocation14 + $0xb8] sm:$0xff] }
 0xa61   :  { %1847 = vmatpush.msra.mxu0 %v1833_v25  ;;  %v1935_v25 = vld [vmem:[#allocation14 + $0xa0] sm:$0xff] }
 0xa63   :  { %1848 = vmatpush.msra.mxu0 %v1832_v26 }
 0xa65   :  { %v1611_v19 = vld [vmem:[#allocation3 + $0xe] sm:$0x3] }
 0xa66   :  { %1653 = vst [vmem:[#allocation1 + $0x23] ss:$4 sm:$0xff] %v1611_v19  ;;  %v1831_v19 = vld [vmem:[#allocation12 + $0x40] sm:$0xff] }
 0xa67   :  { %1849 = vmatpush.msra.mxu0 %v1831_v19  ;;  %v1934_v19 = vld [vmem:[#allocation14 + $0x98] sm:$0xff] }
 0xa69   :  { %1850 = vmatpush.msra.mxu0 %v1830_v27  ;;  %v1931_v27 = vld [vmem:[#allocation14 + $0x80] sm:$0xff] }
 0xa6b   :  { %1851 = vmatpush.msra.mxu0 %v1829_v62 }
 0xa6d   :  { %v1655_v56 = vld.sshfl [vmem:[#allocation1 + $0x20] sm:$0xff pattern:$0x73625140] }
 0xa6e   :  { %1677 = vmatmul.f32.gmra.mxu2 %v1655_v56  ;;  %v1828_v56 = vld [vmem:[#allocation12 + $0x28] sm:$0xff] }
 0xa6f   :  { %1852 = vmatpush.msra.mxu0 %v1828_v56  ;;  %v1929_v56 = vld [vmem:[#allocation14 + $0x70] sm:$0xff] }
 0xa71   :  { %1853 = vmatpush.msra.mxu0 %v1827_v43  ;;  %v1930_v43 = vld [vmem:[#allocation14 + $0x78] sm:$0xff] }
 0xa73   :  { %1854 = vmatpush.msra.mxu0 %v1826_v54 }
 0xa75   :  { %1855 = vmatpush.msra.mxu0 %v1825_v28  ;;  %v1927_v28 = vld [vmem:[#allocation14 + $0x60] sm:$0xff] }
 0xa77   :  { %1856 = vmatpush.msra.mxu0 %v1824_v30  ;;  %v1928_v30 = vld [vmem:[#allocation14 + $0x68] sm:$0xff] }
 0xa79   :  { %1857 = vmatpush.msra.mxu0 %v1823_v40 }
 0xa7a   :  { %v1692_v51 = vpop.xlane.xlu2 %1691 }
 0xa7b   :  { %v1695_v29 = vmul.f32 %v1692_v51, %v3630_v57 }
 0xa7d   :  { %v1697_v6 = vadd.f32 1e-05, %v1695_v29 }
 0xa7f   :  { %2260 = vrsqrt.f32 %v1697_v6  ;;  %vm1705_vm5 = vweird.f32 %v1697_v6 }
 0xa85   :  { %v2261_v16 = vpop.eup %2260 }
 0xa86   :  { %v1700_v55 = vmul.f32 %v2261_v16, %v1697_v6  ;;  %vm1706_vm4 = vweird.f32 %v2261_v16 }
 0xa87   :  { %vm1707_vm6 = vmor %vm1705_vm5, %vm1706_vm4 }
 0xa88   :  { %v1701_v18 = vmul.f32 %v2261_v16, %v1700_v55 }
 0xa8a   :  { %v1702_v34 = vmul.f32 0.5, %v1701_v18 }
 0xa8c   :  { %v1703_v10 = vsub.f32 1.5, %v1702_v34 }
 0xa8e   :  { %v1704_v36 = vmul.f32 %v2261_v16, %v1703_v10 }
 0xa90   :  { %v1708_v20 = vsel %vm1707_vm6, %v2261_v16, %v1704_v36  ;;  %v3485_v36 = vld [vmem:[%s3571_s10 + $0x1f] ss:$0 sm:$0xff] }
 0xa91   :  { %v1719_v4 = vmul.f32 %v1708_v20, %v3451_v23 }
 0xa93   :  { %v1721_v58 = vmul.f32 %v1719_v4, %v1629_v22 }
 0xa95   :  { %v1723_v1 = vadd.f32 %v1721_v58, %v1630_v49 }
 0xa97   :  { %vm1725_vm7 = vcmp.ge.f32.partialorder %v1723_v1, 0.0  ;;  %v1727_v0 = vmul.f32 0.01, %v1723_v1 }
 0xa99   :  { %v1729_v11 = vsel %vm1725_vm7, %v1723_v1, %v1727_v0 }
 0xa9a   :  { %1766 = vmatmul.f32.vlgmr.msrb.gmra.mxu3 %v1729_v11 }
 0xaf1   :  { %v1678_v41 = vpop.f32.mrf.mxu2 }
 0xaf2   :  { %v1679_v38 = vadd.f32 %v1678_v41, %v3439_v35  ;;  %v3499_v41 = vld [vmem:[%s3571_s10 + $0x31] ss:$0 sm:$0xff] }
 0xaf4   :  { %1683 = vadd.xlane.f32.xlu1 %v1679_v38 }
 0xb1d   :  { %v1767_v23 = vpop.f32.mrf.mxu3 }
 0xb1e   :  { %v1768_v15 = vadd.f32 %v1767_v23, %v3471_v46 }
 0xb20   :  { %1773 = vadd.xlane.f32.xlu1 %v1768_v15 }
 0xb67   :  { %v1684_v47 = vpop.xlane.xlu1 %1683 }
 0xb68   :  { %v1686_v39 = vmul.f32 %v1684_v47, %v3630_v57 }
 0xb6a   :  { %v1688_v42 = vsub.f32 %v1679_v38, %v1686_v39 }
 0xb6c   :  { %v1690_v33 = vmul.f32 %v1688_v42, %v1688_v42 }
 0xb6e   :  { %1693 = vadd.xlane.f32.xlu0 %v1690_v33 }
 0xb93   :  { %v1774_v59 = vpop.xlane.xlu1 %1773 }
 0xb94   :  { %v1777_v3 = vmul.f32 %v1774_v59, %v3630_v57 }
 0xb96   :  { %v3476_v35 = vsub.f32 %v1768_v15, %v1777_v3 }
 0xb98   :  { %v1781_v14 = vmul.f32 %v3476_v35, %v3476_v35 }
 0xb9a   :  { %1783 = vadd.xlane.f32.xlu0 %v1781_v14 }
 0xbe1   :  { %v1694_v31 = vpop.xlane.xlu0 %1693 }
 0xbe2   :  { %v1696_v37 = vmul.f32 %v1694_v31, %v3630_v57 }
 0xbe4   :  { %v1698_v53 = vadd.f32 1e-05, %v1696_v37  ;;  %v1945_v37 = vld [vmem:[#allocation14 + $0xf0] sm:$0xff] }
 0xbe5   :  { %1954 = vmatpush.msra.mxu1 %v1945_v37 }
 0xbe6   :  { %2262 = vrsqrt.f32 %v1698_v53  ;;  %vm1715_vm9 = vweird.f32 %v1698_v53 }
 0xbec   :  { %v2263_v61 = vpop.eup %2262 }
 0xbed   :  { %v1710_v2 = vmul.f32 %v2263_v61, %v1698_v53  ;;  %vm1716_vm8 = vweird.f32 %v2263_v61  ;;  %v1946_v53 = vld [vmem:[#allocation14 + $0xf8] sm:$0xff] }
 0xbee   :  { %vm1717_vm10 = vmor %vm1715_vm9, %vm1716_vm8  ;;  %1977 = vmatpush.msra.mxu2 %v1946_v53 }
 0xbef   :  { %v1711_v8 = vmul.f32 %v2263_v61, %v1710_v2  ;;  %v1944_v2 = vld [vmem:[#allocation14 + $0xe8] sm:$0xff] }
 0xbf0   :  { %1978 = vmatpush.msra.mxu2 %v1944_v2 }
 0xbf1   :  { %v1712_v5 = vmul.f32 0.5, %v1711_v8 }
 0xbf2   :  { %1979 = vmatpush.msra.mxu2 %v1942_v9 }
 0xbf3   :  { %v1713_v48 = vsub.f32 1.5, %v1712_v5  ;;  %v1941_v5 = vld [vmem:[#allocation14 + $0xd0] sm:$0xff] }
 0xbf5   :  { %v1714_v13 = vmul.f32 %v2263_v61, %v1713_v48 }
 0xbf7   :  { %v1718_v60 = vsel %vm1717_vm10, %v2263_v61, %v1714_v13  ;;  %v1943_v61 = vld [vmem:[#allocation14 + $0xe0] sm:$0xff]  ;;  %v1940_v13 = vld [vmem:[#allocation14 + $0xc8] sm:$0xff] }
 0xbf8   :  { %v1720_v63 = vmul.f32 %v1718_v60, %v1688_v42  ;;  %1955 = vmatpush.msra.mxu1 %v1943_v61  ;;  %1980 = vmatpush.msra.mxu2 %v1940_v13  ;;  %v1937_v60 = vld [vmem:[#allocation14 + $0xb0] sm:$0xff] }
 0xbfa   :  { %v1722_v45 = vmul.f32 %v1720_v63, %v1629_v22  ;;  %v3491_v22 = vld [vmem:[%s3571_s10 + $0x30] ss:$0 sm:$0xff]  ;;  %1956 = vmatpush.msra.mxu1 %v1941_v5  ;;  %1981 = vmatpush.msra.mxu2 %v1938_v17 }
 0xbfc   :  { %v1724_v12 = vadd.f32 %v1722_v45, %v1630_v49  ;;  %1957 = vmatpush.msra.mxu1 %v1939_v44  ;;  %v1936_v45 = vld [vmem:[#allocation14 + $0xa8] sm:$0xff] }
 0xbfd   :  { %1982 = vmatpush.msra.mxu2 %v1936_v45 }
 0xbfe   :  { %vm1726_vm11 = vcmp.ge.f32.partialorder %v1724_v12, 0.0  ;;  %v1728_v24 = vmul.f32 0.01, %v1724_v12  ;;  %1958 = vmatpush.msra.mxu1 %v1937_v60 }
 0xbff   :  { %1983 = vmatpush.msra.mxu2 %v1934_v19 }
 0xc00   :  { %v1730_v52 = vsel %vm1726_vm11, %v1724_v12, %v1728_v24  ;;  %1959 = vmatpush.msra.mxu1 %v1935_v25  ;;  %v1933_v12 = vld [vmem:[#allocation14 + $0x90] sm:$0xff] }
 0xc01   :  { %1769 = vmatmul.f32.gmra.mxu3 %v1730_v52  ;;  %v1932_v52 = vld [vmem:[#allocation14 + $0x88] sm:$0xff] }
 0xc02   :  { %1960 = vmatpush.msra.mxu1 %v1933_v12  ;;  %1984 = vmatpush.msra.mxu2 %v1932_v52 }
 0xc04   :  { %1961 = vmatpush.msra.mxu1 %v1931_v27  ;;  %1985 = vmatpush.msra.mxu2 %v1930_v43 }
 0xc06   :  { %1962 = vmatpush.msra.mxu1 %v1929_v56  ;;  %1986 = vmatpush.msra.mxu2 %v1928_v30 }
 0xc08   :  { %1963 = vmatpush.msra.mxu1 %v1927_v28 }
 0xc0d   :  { %v1784_v21 = vpop.xlane.xlu0 %1783 }
 0xc0e   :  { %v1787_v32 = vmul.f32 %v1784_v21, %v3630_v57  ;;  %v1925_v21 = vld [vmem:[#allocation14 + $0x50] sm:$0xff] }
 0xc0f   :  { %1964 = vmatpush.msra.mxu1 %v1925_v21 }
 0xc10   :  { %v1789_v51 = vadd.f32 1e-05, %v1787_v32  ;;  %v1926_v32 = vld [vmem:[#allocation14 + $0x58] sm:$0xff] }
 0xc11   :  { %1987 = vmatpush.msra.mxu2 %v1926_v32 }
 0xc12   :  { %2264 = vrsqrt.f32 %v1789_v51  ;;  %vm1797_vm13 = vweird.f32 %v1789_v51 }
 0xc18   :  { %v2265_v29 = vpop.eup %2264 }
 0xc19   :  { %v1792_v6 = vmul.f32 %v2265_v29, %v1789_v51  ;;  %vm1798_vm12 = vweird.f32 %v2265_v29 }
 0xc1a   :  { %vm1799_vm14 = vmor %vm1797_vm13, %vm1798_vm12 }
 0xc1b   :  { %v1793_v16 = vmul.f32 %v2265_v29, %v1792_v6  ;;  %v1924_v6 = vld [vmem:[#allocation14 + $0x48] sm:$0xff] }
 0xc1c   :  { %1988 = vmatpush.msra.mxu2 %v1924_v6 }
 0xc1d   :  { %v1794_v55 = vmul.f32 0.5, %v1793_v16 }
 0xc1f   :  { %v1795_v18 = vsub.f32 1.5, %v1794_v55  ;;  %v1921_v55 = vld [vmem:[#allocation14 + $0x30] sm:$0xff] }
 0xc21   :  { %v1796_v34 = vmul.f32 %v2265_v29, %v1795_v18  ;;  %v1922_v18 = vld [vmem:[#allocation14 + $0x38] sm:$0xff] }
 0xc22   :  { %1989 = vmatpush.msra.mxu2 %v1922_v18 }
 0xc23   :  { %v1800_v10 = vsel %vm1799_vm14, %v2265_v29, %v1796_v34  ;;  %v1923_v29 = vld [vmem:[#allocation14 + $0x40] sm:$0xff] }
 0xc24   :  { %v1811_v20 = vmul.f32 %v1800_v10, %v3476_v35  ;;  %1965 = vmatpush.msra.mxu1 %v1923_v29  ;;  %v1919_v34 = vld [vmem:[#allocation14 + $0x20] sm:$0xff]  ;;  %v1920_v10 = vld [vmem:[#allocation14 + $0x28] sm:$0xff] }
 0xc25   :  { %1990 = vmatpush.msra.mxu2 %v1920_v10 }
 0xc26   :  { %v1813_v4 = vmul.f32 %v1811_v20, %v3485_v36  ;;  %1966 = vmatpush.msra.mxu1 %v1921_v55  ;;  %v1918_v20 = vld [vmem:[#allocation14 + $0x18] sm:$0xff] }
 0xc27   :  { %1991 = vmatpush.msra.mxu2 %v1918_v20 }
 0xc28   :  { %v1815_v49 = vadd.f32 %v1813_v4, %v3491_v22  ;;  %1967 = vmatpush.msra.mxu1 %v1919_v34  ;;  %v1916_v4 = vld [vmem:[#allocation14 + $0x8] sm:$0xff] }
 0xc29   :  { %1992 = vmatpush.msra.mxu2 %v1916_v4 }
 0xc2a   :  { %vm1817_vm15 = vcmp.ge.f32.partialorder %v1815_v49, 0.0  ;;  %v1819_v58 = vmul.f32 0.01, %v1815_v49 }
 0xc2c   :  { %v1821_v1 = vsel %vm1817_vm15, %v1815_v49, %v1819_v58 }
 0xc2d   :  { %1858 = vmatmul.f32.vlgmr.msra.gmra.mxu0 %v1821_v1 }
 0xc84   :  { %v1770_v0 = vpop.f32.mrf.mxu3 }
 0xc85   :  { %v1771_v11 = vadd.f32 %v1770_v0, %v3471_v46 }
 0xc87   :  { %1775 = vadd.xlane.f32.xlu2 %v1771_v11 }
 0xcaa   :  { %v1859_v38 = vpop.f32.mrf.mxu0 }
 0xcab   :  { %v1860_v23 = vadd.f32 %v1859_v38, %v3499_v41 }
 0xcad   :  { %1865 = vadd.xlane.f32.xlu2 %v1860_v23 }
 0xcfa   :  { %v1776_v15 = vpop.xlane.xlu2 %1775 }
 0xcfb   :  { %v1778_v47 = vmul.f32 %v1776_v15, %v3630_v57 }
 0xcfd   :  { %v1780_v39 = vsub.f32 %v1771_v11, %v1778_v47 }
 0xcff   :  { %v1782_v42 = vmul.f32 %v1780_v39, %v1780_v39 }
 0xd01   :  { %1785 = vadd.xlane.f32.xlu1 %v1782_v42  ;;  %v3515_v42 = vld [vmem:[%s3571_s10 + $0x32] ss:$0 sm:$0xff] }
 0xd20   :  { %v1866_v33 = vpop.xlane.xlu2 %1865 }
 0xd21   :  { %v1869_v59 = vmul.f32 %v1866_v33, %v3630_v57 }
 0xd23   :  { %v3504_v46 = vsub.f32 %v1860_v23, %v1869_v59  ;;  %v3521_v59 = vld [vmem:[%s3571_s10 + $0x33] ss:$0 sm:$0xff] }
 0xd25   :  { %v1873_v3 = vmul.f32 %v3504_v46, %v3504_v46 }
 0xd27   :  { %1875 = vadd.xlane.f32.xlu1 %v1873_v3 }
 0xd74   :  { %v1786_v35 = vpop.xlane.xlu1 %1785 }
 0xd75   :  { %v1788_v14 = vmul.f32 %v1786_v35, %v3630_v57 }
 0xd77   :  { %v1790_v31 = vadd.f32 1e-05, %v1788_v14 }
 0xd79   :  { %2266 = vrsqrt.f32 %v1790_v31  ;;  %vm1807_vm1 = vweird.f32 %v1790_v31 }
 0xd7f   :  { %v2267_v8 = vpop.eup %2266 }
 0xd80   :  { %v1802_v7 = vmul.f32 %v2267_v8, %v1790_v31  ;;  %vm1808_vm0 = vweird.f32 %v2267_v8 }
 0xd81   :  { %vm1809_vm2 = vmor %vm1807_vm1, %vm1808_vm0 }
 0xd82   :  { %v1803_v48 = vmul.f32 %v2267_v8, %v1802_v7 }
 0xd84   :  { %v1804_v50 = vmul.f32 0.5, %v1803_v48 }
 0xd86   :  { %v1805_v63 = vsub.f32 1.5, %v1804_v50 }
 0xd88   :  { %v1806_v26 = vmul.f32 %v2267_v8, %v1805_v63 }
 0xd8a   :  { %v1810_v24 = vsel %vm1809_vm2, %v2267_v8, %v1806_v26 }
 0xd8b   :  { %v1812_v62 = vmul.f32 %v1810_v24, %v1780_v39 }
 0xd8d   :  { %v1814_v54 = vmul.f32 %v1812_v62, %v3485_v36  ;;  %v1917_v36 = vld [vmem:[#allocation14 + $0x10] sm:$0xff] }
 0xd8e   :  { %1968 = vmatpush.msra.mxu1 %v1917_v36 }
 0xd8f   :  { %v1816_v40 = vadd.f32 %v1814_v54, %v3491_v22  ;;  %v1915_v22 = vld [vmem:[#allocation14] sm:$0xff] }
 0xd90   :  { %1969 = vmatpush.msra.mxu1 %v1915_v22 }
 0xd91   :  { %vm1818_vm3 = vcmp.ge.f32.partialorder %v1816_v40, 0.0  ;;  %v1820_v51 = vmul.f32 0.01, %v1816_v40 }
 0xd93   :  { %v1822_v16 = vsel %vm1818_vm3, %v1816_v40, %v1820_v51 }
 0xd94   :  { %1861 = vmatmul.f32.gmra.mxu0 %v1822_v16 }
 0xd9a   :  { %v1876_v49 = vpop.xlane.xlu1 %1875 }
 0xd9b   :  { %v1879_v58 = vmul.f32 %v1876_v49, %v3630_v57 }
 0xd9d   :  { %v1881_v1 = vadd.f32 1e-05, %v1879_v58 }
 0xd9f   :  { %2268 = vrsqrt.f32 %v1881_v1  ;;  %vm1889_vm5 = vweird.f32 %v1881_v1 }
 0xda5   :  { %v2269_v0 = vpop.eup %2268 }
 0xda6   :  { %v1884_v11 = vmul.f32 %v2269_v0, %v1881_v1  ;;  %vm1890_vm4 = vweird.f32 %v2269_v0 }
 0xda7   :  { %vm1891_vm6 = vmor %vm1889_vm5, %vm1890_vm4 }
 0xda8   :  { %v1885_v38 = vmul.f32 %v2269_v0, %v1884_v11 }
 0xdaa   :  { %v1886_v23 = vmul.f32 0.5, %v1885_v38 }
 0xdac   :  { %v1887_v15 = vsub.f32 1.5, %v1886_v23 }
 0xdae   :  { %v1888_v47 = vmul.f32 %v2269_v0, %v1887_v15 }
 0xdb0   :  { %v1892_v39 = vsel %vm1891_vm6, %v2269_v0, %v1888_v47 }
 0xdb1   :  { %v1903_v33 = vmul.f32 %v1892_v39, %v3504_v46  ;;  %v3532_v46 = vld [vmem:[%s3571_s10 + $0x34] ss:$8 sm:$0x3] }
 0xdb2   :  { %v1950_v61 = vperm.slane %v3532_v46, 0  ;;  %v1951_v5 = vperm.slane %v3532_v46, 1 }
 0xdb3   :  { %v1905_v3 = vmul.f32 %v1903_v33, %v3515_v42 }
 0xdb5   :  { %v1907_v35 = vadd.f32 %v1905_v3, %v3521_v59 }
 0xdb7   :  { %vm1909_vm7 = vcmp.ge.f32.partialorder %v1907_v35, 0.0  ;;  %v1911_v14 = vmul.f32 0.01, %v1907_v35 }
 0xdb9   :  { %v1913_v31 = vsel %vm1909_vm7, %v1907_v35, %v1911_v14 }
 0xdba   :  { %1970 = vmatmul.f32.vlgmr.msra.gmra.mxu1 %v1913_v31  ;;  %1993 = vmatmul.f32.vlgmr.msra.gmra.mxu2 %v1913_v31 }
 0xe11   :  { %v1862_v37 = vpop.f32.mrf.mxu0 }
 0xe12   :  { %v3526_v53 = vadd.f32 %v1862_v37, %v3499_v41 }
 0xe14   :  { %1867 = vadd.xlane.f32.xlu0 %v3526_v53 }
 0xe37   :  { %v1971_v2 = vpop.f32.mrf.mxu1 }
 0xe38   :  { %v1972_v8 = vadd.f32 %v1971_v2, %v1950_v61 }
 0xe3a   :  { %v2141_v7 = vmul.f32 -1.442695, %v1972_v8 }
 0xe3c   :  { %2270 = vpow2.f32 %v2141_v7 }
 0xe3d   :  { %v1994_v9 = vpop.f32.mrf.mxu2 }
 0xe3e   :  { %v1995_v41 = vadd.f32 %v1994_v9, %v1951_v5 }
 0xe40   :  { %v2142_v48 = vmul.f32 -1.442695, %v1995_v41 }
 0xe42   :  { %v2271_v44 = vpop.eup %2270  ;;  %2272 = vpow2.f32 %v2142_v48 }
 0xe43   :  { %v2012_v13 = vadd.f32 1.0, %v2271_v44 }
 0xe45   :  { %2274 = vrcp.f32 %v2012_v13  ;;  %v2027_v45 = vand.u32 2147483648, %v2012_v13  ;;  %v2025_v12 = vand.u32 2147483647, %v2012_v13  ;;  %vm2021_vm9 = vweird.f32 %v2012_v13 }
 0xe47   :  { %v2028_v52 = vor.u32 1.1754944e-38, %v2027_v45  ;;  %vm2026_vm11 = vcmp.eq.f32.partialorder %v2025_v12, 8.507059e+37 }
 0xe48   :  { %v2273_v50 = vpop.eup %2272 }
 0xe49   :  { %v2013_v60 = vadd.f32 1.0, %v2273_v50 }
 0xe4b   :  { %v2275_v17 = vpop.eup %2274  ;;  %2276 = vrcp.f32 %v2013_v60  ;;  %v2042_v54 = vand.u32 2147483648, %v2013_v60  ;;  %v2040_v30 = vand.u32 2147483647, %v2013_v60  ;;  %vm2036_vm13 = vweird.f32 %v2013_v60 }
 0xe4c   :  { %v2017_v63 = vmul.f32 %v2275_v17, %v2012_v13  ;;  %vm2022_vm8 = vweird.f32 %v2275_v17 }
 0xe4d   :  { %vm2023_vm10 = vmor %vm2021_vm9, %vm2022_vm8  ;;  %v2043_v21 = vor.u32 1.1754944e-38, %v2042_v54  ;;  %vm2041_vm15 = vcmp.eq.f32.partialorder %v2040_v30, 8.507059e+37 }
 0xe4e   :  { %v2018_v25 = vsub.f32 1.0, %v2017_v63 }
 0xe50   :  { %v2019_v26 = vmul.f32 %v2275_v17, %v2018_v25 }
 0xe51   :  { %v2277_v19 = vpop.eup %2276 }
 0xe52   :  { %v2020_v24 = vadd.f32 %v2275_v17, %v2019_v26  ;;  %v2032_v27 = vmul.f32 %v2277_v19, %v2013_v60  ;;  %vm2037_vm12 = vweird.f32 %v2277_v19 }
 0xe53   :  { %vm2038_vm14 = vmor %vm2036_vm13, %vm2037_vm12 }
 0xe54   :  { %v2024_v62 = vsel %vm2023_vm10, %v2275_v17, %v2020_v24  ;;  %v2033_v56 = vsub.f32 1.0, %v2032_v27 }
 0xe55   :  { %v2029_v43 = vsel %vm2026_vm11, %v2028_v52, %v2024_v62 }
 0xe56   :  { %2278 = vlog2.f32 %v2029_v43  ;;  %v2034_v28 = vmul.f32 %v2277_v19, %v2033_v56 }
 0xe58   :  { %v2035_v40 = vadd.f32 %v2277_v19, %v2034_v28 }
 0xe5a   :  { %v2039_v32 = vsel %vm2038_vm14, %v2277_v19, %v2035_v40 }
 0xe5b   :  { %v2044_v51 = vsel %vm2041_vm15, %v2043_v21, %v2039_v32 }
 0xe5c   :  { %v2279_v29 = vpop.eup %2278  ;;  %2280 = vlog2.f32 %v2044_v51 }
 0xe5d   :  { %v2077_v6 = vmul.f32 0.6931472, %v2279_v29 }
 0xe5f   :  { %v2084_v16 = vmul.f32 2.3025851, %v2077_v6 }
 0xe61   :  { %v2088_v55 = vmul.f32 1.442695, %v2084_v16 }
 0xe62   :  { %v2281_v18 = vpop.eup %2280 }
 0xe63   :  { %2282 = vpow2.f32 %v2088_v55  ;;  %v2079_v34 = vmul.f32 0.6931472, %v2281_v18 }
 0xe65   :  { %v2085_v10 = vmul.f32 2.3025851, %v2079_v34 }
 0xe67   :  { %v2090_v36 = vmul.f32 1.442695, %v2085_v10 }
 0xe69   :  { %v2283_v20 = vpop.eup %2282  ;;  %2284 = vpow2.f32 %v2090_v36 }
 0xe6a   :  { %v2096_v22 = vmul.f32 2.0, %v2283_v20 }
 0xe6c   :  { %v2100_v4 = vadd.f32 1e-18, %v2096_v22 }
 0xe6e   :  { %2104 = vst [vmem:[%s3572_s11] sm:$0xff] %v2100_v4 }
 0xe6f   :  { %v2285_v49 = vpop.eup %2284 }
 0xe70   :  { %v2097_v58 = vmul.f32 2.0, %v2285_v49 }
 0xe72   :  { %v2101_v1 = vadd.f32 1e-18, %v2097_v58 }
 0xe74   :  { %2105 = vst [vmem:[%s3572_s11 + $0x8] sm:$0xff] %v2101_v1 }
 0xe87   :  { %v1868_v0 = vpop.xlane.xlu0 %1867 }
 0xe88   :  { %v1870_v11 = vmul.f32 %v1868_v0, %v3630_v57 }
 0xe8a   :  { %v1872_v38 = vsub.f32 %v3526_v53, %v1870_v11 }
 0xe8c   :  { %v1874_v23 = vmul.f32 %v1872_v38, %v1872_v38 }
 0xe8e   :  { %1877 = vadd.xlane.f32.xlu2 %v1874_v23 }
 0xf01   :  { %v1878_v15 = vpop.xlane.xlu2 %1877 }
 0xf02   :  { %v1880_v47 = vmul.f32 %v1878_v15, %v3630_v57 }
 0xf04   :  { %v1882_v39 = vadd.f32 1e-05, %v1880_v47 }
 0xf06   :  { %2286 = vrsqrt.f32 %v1882_v39  ;;  %vm1899_vm1 = vweird.f32 %v1882_v39 }
 0xf0c   :  { %v2287_v33 = vpop.eup %2286 }
 0xf0d   :  { %v1894_v3 = vmul.f32 %v2287_v33, %v1882_v39  ;;  %vm1900_vm0 = vweird.f32 %v2287_v33 }
 0xf0e   :  { %vm1901_vm2 = vmor %vm1899_vm1, %vm1900_vm0 }
 0xf0f   :  { %v1895_v35 = vmul.f32 %v2287_v33, %v1894_v3 }
 0xf11   :  { %v1896_v14 = vmul.f32 0.5, %v1895_v35 }
 0xf13   :  { %v1897_v31 = vsub.f32 1.5, %v1896_v14 }
 0xf15   :  { %v1898_v37 = vmul.f32 %v2287_v33, %v1897_v31 }
 0xf17   :  { %v1902_v2 = vsel %vm1901_vm2, %v2287_v33, %v1898_v37 }
 0xf18   :  { %v1904_v8 = vmul.f32 %v1902_v2, %v1872_v38 }
 0xf1a   :  { %v1906_v53 = vmul.f32 %v1904_v8, %v3515_v42 }
 0xf1c   :  { %v1908_v7 = vadd.f32 %v1906_v53, %v3521_v59 }
 0xf1e   :  { %vm1910_vm3 = vcmp.ge.f32.partialorder %v1908_v7, 0.0  ;;  %v1912_v9 = vmul.f32 0.01, %v1908_v7 }
 0xf20   :  { %v1914_v57 = vsel %vm1910_vm3, %v1908_v7, %v1912_v9 }
 0xf21   :  { %1973 = vmatmul.f32.gmra.mxu1 %v1914_v57  ;;  %1996 = vmatmul.f32.gmra.mxu2 %v1914_v57 }
 0xf9e   :  { %v1974_v41 = vpop.f32.mrf.mxu1 }
 0xf9f   :  { %v1975_v48 = vadd.f32 %v1974_v41, %v1950_v61 }
 0xfa1   :  { %v2143_v44 = vmul.f32 -1.442695, %v1975_v48 }
 0xfa3   :  { %2288 = vpow2.f32 %v2143_v44 }
 0xfa4   :  { %v1997_v13 = vpop.f32.mrf.mxu2 }
 0xfa5   :  { %v1998_v50 = vadd.f32 %v1997_v13, %v1951_v5 }
 0xfa7   :  { %v2144_v60 = vmul.f32 -1.442695, %v1998_v50 }
 0xfa9   :  { %v2289_v17 = vpop.eup %2288  ;;  %2290 = vpow2.f32 %v2144_v60 }
 0xfaa   :  { %v2014_v42 = vadd.f32 1.0, %v2289_v17 }
 0xfac   :  { %2292 = vrcp.f32 %v2014_v42  ;;  %v2057_v12 = vand.u32 2147483648, %v2014_v42  ;;  %v2055_v61 = vand.u32 2147483647, %v2014_v42  ;;  %vm2051_vm5 = vweird.f32 %v2014_v42 }
 0xfae   :  { %v2058_v5 = vor.u32 1.1754944e-38, %v2057_v12  ;;  %vm2056_vm7 = vcmp.eq.f32.partialorder %v2055_v61, 8.507059e+37 }
 0xfaf   :  { %v2291_v59 = vpop.eup %2290 }
 0xfb0   :  { %v2015_v63 = vadd.f32 1.0, %v2291_v59 }
 0xfb2   :  { %v2293_v25 = vpop.eup %2292  ;;  %2294 = vrcp.f32 %v2015_v63  ;;  %v2072_v43 = vand.u32 2147483648, %v2015_v63  ;;  %v2070_v28 = vand.u32 2147483647, %v2015_v63  ;;  %vm2066_vm9 = vweird.f32 %v2015_v63 }
 0xfb3   :  { %v2047_v45 = vmul.f32 %v2293_v25, %v2014_v42  ;;  %vm2052_vm4 = vweird.f32 %v2293_v25 }
 0xfb4   :  { %vm2053_vm6 = vmor %vm2051_vm5, %vm2052_vm4  ;;  %v2073_v40 = vor.u32 1.1754944e-38, %v2072_v43  ;;  %vm2071_vm11 = vcmp.eq.f32.partialorder %v2070_v28, 8.507059e+37 }
 0xfb5   :  { %v2048_v26 = vsub.f32 1.0, %v2047_v45 }
 0xfb7   :  { %v2049_v19 = vmul.f32 %v2293_v25, %v2048_v26 }
 0xfb8   :  { %v2295_v24 = vpop.eup %2294 }
 0xfb9   :  { %v2050_v27 = vadd.f32 %v2293_v25, %v2049_v19  ;;  %v2062_v46 = vmul.f32 %v2295_v24, %v2015_v63  ;;  %vm2067_vm8 = vweird.f32 %v2295_v24 }
 0xfba   :  { %vm2068_vm10 = vmor %vm2066_vm9, %vm2067_vm8 }
 0xfbb   :  { %v2054_v52 = vsel %vm2053_vm6, %v2293_v25, %v2050_v27  ;;  %v2063_v62 = vsub.f32 1.0, %v2062_v46 }
 0xfbc   :  { %v2059_v56 = vsel %vm2056_vm7, %v2058_v5, %v2054_v52 }
 0xfbd   :  { %2296 = vlog2.f32 %v2059_v56  ;;  %v2064_v54 = vmul.f32 %v2295_v24, %v2063_v62 }
 0xfbf   :  { %v2065_v30 = vadd.f32 %v2295_v24, %v2064_v54 }
 0xfc1   :  { %v2069_v21 = vsel %vm2068_vm10, %v2295_v24, %v2065_v30 }
 0xfc2   :  { %v2074_v32 = vsel %vm2071_vm11, %v2073_v40, %v2069_v21 }
 0xfc3   :  { %v2297_v51 = vpop.eup %2296  ;;  %2298 = vlog2.f32 %v2074_v32 }
 0xfc4   :  { %v2081_v29 = vmul.f32 0.6931472, %v2297_v51 }
 0xfc6   :  { %v2086_v6 = vmul.f32 2.3025851, %v2081_v29 }
 0xfc8   :  { %v2092_v16 = vmul.f32 1.442695, %v2086_v6 }
 0xfc9   :  { %v2299_v55 = vpop.eup %2298 }
 0xfca   :  { %2300 = vpow2.f32 %v2092_v16  ;;  %v2083_v18 = vmul.f32 0.6931472, %v2299_v55 }
 0xfcc   :  { %v2087_v34 = vmul.f32 2.3025851, %v2083_v18 }
 0xfce   :  { %v2094_v10 = vmul.f32 1.442695, %v2087_v34 }
 0xfd0   :  { %v2301_v36 = vpop.eup %2300  ;;  %2302 = vpow2.f32 %v2094_v10 }
 0xfd1   :  { %v2098_v20 = vmul.f32 2.0, %v2301_v36 }
 0xfd3   :  { %v2102_v22 = vadd.f32 1e-18, %v2098_v20 }
 0xfd5   :  { %2106 = vst [vmem:[%s3572_s11 + $0x10] sm:$0xff] %v2102_v22 }
 0xfd6   :  { %v2303_v4 = vpop.eup %2302 }
 0xfd7   :  { %v2099_v49 = vmul.f32 2.0, %v2303_v4 }
 0xfd9   :  { %v2103_v58 = vadd.f32 1e-18, %v2099_v49 }
 0xfdb   :  { %2107 = vst [vmem:[%s3572_s11 + $0x18] sm:$0xff] %v2103_v58 }
 0xfdc   :  { %2112 = vsyncpa [#allocation5], 1 }
 0xfdd   :  { %2113 = vsyncpa [#allocation7], 1 }
 0xfde   :  { %2114 = vsyncpa [#allocation10], 1 }
 0xfdf   :  { %2115 = vsyncpa [#allocation13], 1 }

</bundles_post_ra>
